<compile_context>
chip_gen: v5e
topology: v5e:2x2
jax: 0.10.0
libtpu: 0.0.40
codegen_flags: <defaults>
</compile_context>

<pallas_src>
import functools

import jax
import jax.numpy as jnp
from jax.experimental import pallas as pl
from jax.experimental.pallas import tpu as pltpu

RESNET_OUT_DIM = 2048
HIDDEN1 = 512
HIDDEN2 = 256
NUM_CLASSES = 3
PAD_CLASSES = 128          # lane-dense classifier width (zero-padded)

# packed-bias layout (all offsets are multiples of 128 -> lane-aligned slices)
OFF_BP = 0
OFF_B1 = OFF_BP + RESNET_OUT_DIM
OFF_B2 = OFF_B1 + HIDDEN1
OFF_BC = OFF_B2 + HIDDEN2
BIAS_LEN = OFF_BC + PAD_CLASSES          # 2048 + 512 + 256 + 128 = 2944


def _round_up(x, m):
    return ((x + m - 1) // m) * m


def image_sentiment_kernel(img_ref, wp_ref, w1_ref, w2_ref, wc_ref, bias_ref,
                           logits_ref, feat_ref):
    # ---- backbone stand-in ------------------------------------------------
    img = img_ref[...]                                  # (TB, C, HW) f32, lane-dense
    pooled = jnp.mean(img, axis=-1)                     # (TB, C)  global avg pool
    # TODO(synk): the pretrained ResNet50 conv trunk has no loadable weights
    # here; replaced by a deterministic projection to the 2048-dim feature
    # interface (pool -> linear -> ReLU).

    bp = bias_ref[:, OFF_BP:OFF_B1]                     # (1, 2048)
    b1 = bias_ref[:, OFF_B1:OFF_B2]                     # (1, 512)
    b2 = bias_ref[:, OFF_B2:OFF_BC]                     # (1, 256)
    bc = bias_ref[:, OFF_BC:OFF_BC + PAD_CLASSES]       # (1, 128)

    backbone = jnp.maximum(
        jnp.dot(pooled.astype(jnp.bfloat16), wp_ref[...],
                preferred_element_type=jnp.float32) + bp, 0.0)      # (TB, 2048)

    # ---- classification head (dropout == identity in eval) ----------------
    h1 = jnp.maximum(
        jnp.dot(backbone.astype(jnp.bfloat16), w1_ref[...],
                preferred_element_type=jnp.float32) + b1, 0.0)      # (TB, 512)
    feats = (jnp.dot(h1.astype(jnp.bfloat16), w2_ref[...],
                     preferred_element_type=jnp.float32) + b2)      # (TB, 256) pre-ReLU
    h2 = jnp.maximum(feats, 0.0)
    logits = (jnp.dot(h2.astype(jnp.bfloat16), wc_ref[...],
                      preferred_element_type=jnp.float32) + bc)     # (TB, 128)

    feat_ref[...] = feats
    logits_ref[...] = logits


def prepare_params(params):
    """One-time packing: bf16 weights, lane-padded classifier, packed biases."""
    wp, bp, w1, b1, w2, b2, wc, bc = params
    wc_pad = jnp.zeros((HIDDEN2, PAD_CLASSES), jnp.float32)
    wc_pad = wc_pad.at[:, :NUM_CLASSES].set(wc)
    bc_pad = jnp.zeros((1, PAD_CLASSES), jnp.float32)
    bc_pad = bc_pad.at[:, :NUM_CLASSES].set(bc)
    biases = jnp.concatenate([bp, b1, b2, bc_pad], axis=1)          # (1, 2944) f32
    return (wp.astype(jnp.bfloat16),
            w1.astype(jnp.bfloat16),
            w2.astype(jnp.bfloat16),
            wc_pad.astype(jnp.bfloat16),
            biases)


@functools.partial(jax.jit, static_argnames=())
def image_sentiment_forward(images, packed_params):
    """images: (B, C, H, W) float32.  Returns (logits (B,3), features (B,256))."""
    wp, w1, w2, wc, biases = packed_params
    B, C, H, W = images.shape
    HW = H * W

    # Lane-dense layout for the pooling reduction.
    x = images.reshape(B, C, HW).astype(jnp.float32)

    # Pad batch to a sublane multiple; tile it over a parallel grid.
    TB = min(128, _round_up(B, 8))
    Bp = _round_up(B, TB)
    if Bp != B:
        x = jnp.pad(x, ((0, Bp - B), (0, 0), (0, 0)))
    grid = (Bp // TB,)

    flops = 2 * Bp * (C * RESNET_OUT_DIM + RESNET_OUT_DIM * HIDDEN1
                      + HIDDEN1 * HIDDEN2 + HIDDEN2 * PAD_CLASSES) + Bp * C * HW
    bytes_accessed = (x.size * 4 + wp.size * 2 + w1.size * 2 + w2.size * 2
                      + wc.size * 2 + biases.size * 4
                      + Bp * PAD_CLASSES * 4 + Bp * HIDDEN2 * 4)

    logits_pad, feats = pl.pallas_call(
        image_sentiment_kernel,
        grid=grid,
        in_specs=[
            pl.BlockSpec((TB, C, HW), lambda i: (i, 0, 0)),          # image tile
            pl.BlockSpec((C, RESNET_OUT_DIM), lambda i: (0, 0)),     # wp (resident)
            pl.BlockSpec((RESNET_OUT_DIM, HIDDEN1), lambda i: (0, 0)),  # w1
            pl.BlockSpec((HIDDEN1, HIDDEN2), lambda i: (0, 0)),      # w2
            pl.BlockSpec((HIDDEN2, PAD_CLASSES), lambda i: (0, 0)),  # wc (padded)
            pl.BlockSpec((1, BIAS_LEN), lambda i: (0, 0)),           # packed biases
        ],
        out_specs=(
            pl.BlockSpec((TB, PAD_CLASSES), lambda i: (i, 0)),
            pl.BlockSpec((TB, HIDDEN2), lambda i: (i, 0)),
        ),
        out_shape=(
            jax.ShapeDtypeStruct((Bp, PAD_CLASSES), jnp.float32),
            jax.ShapeDtypeStruct((Bp, HIDDEN2), jnp.float32),
        ),
        compiler_params=pltpu.CompilerParams(
            dimension_semantics=("parallel",)),
        cost_estimate=pl.CostEstimate(
            flops=int(flops), transcendentals=0,
            bytes_accessed=int(bytes_accessed)),
    )(x, wp, w1, w2, wc, biases)

    return logits_pad[:B, :NUM_CLASSES], feats[:B, :]


def init_params(key, in_channels):
    """Deterministic synthetic parameters (shapes follow the module's __init__)."""
    ks = jax.random.split(key, 4)

    def lin(k, fan_in, fan_out):
        w = jax.random.normal(k, (fan_in, fan_out), jnp.float32) / jnp.sqrt(fan_in)
        b = jnp.zeros((1, fan_out), jnp.float32)
        return w, b

    wp, bp = lin(ks[0], in_channels, RESNET_OUT_DIM)   # backbone stand-in
    w1, b1 = lin(ks[1], RESNET_OUT_DIM, HIDDEN1)       # fc1: 2048 -> 512
    w2, b2 = lin(ks[2], HIDDEN1, HIDDEN2)              # fc2: 512 -> 256
    wc, bc = lin(ks[3], HIDDEN2, NUM_CLASSES)          # classifier: 256 -> 3
    return (wp, bp, w1, b1, w2, b2, wc, bc)


if __name__ == "__main__":
    key = jax.random.PRNGKey(0)
    k_img, k_par = jax.random.split(key)

    B, C, H, W = 2, 3, 16, 16                          # small images, NCHW
    images = jax.random.normal(k_img, (B, C, H, W), jnp.float32)
    raw_params = init_params(k_par, C)
    packed_params = prepare_params(raw_params)          # bf16 / padded / packed, once

    logits, features = image_sentiment_forward(images, packed_params)
    jax.block_until_ready((logits, features))

    assert logits.shape == (B, NUM_CLASSES)
    assert features.shape == (B, HIDDEN2)
    print("KERNEL_OK")
</pallas_src>

<mosaic_0001>
module attributes {stable_mosaic.version = 11 : i64} {
  func.func @image_sentiment_kernel(%arg0: i32, %arg1: memref<8x3x256xf32, #tpu.memory_space<vmem>>, %arg2: memref<3x2048xbf16, #tpu.memory_space<vmem>>, %arg3: memref<2048x512xbf16, #tpu.memory_space<vmem>>, %arg4: memref<512x256xbf16, #tpu.memory_space<vmem>>, %arg5: memref<256x128xbf16, #tpu.memory_space<vmem>>, %arg6: memref<1x2944xf32, #tpu.memory_space<vmem>>, %arg7: memref<8x128xf32, #tpu.memory_space<vmem>>, %arg8: memref<8x256xf32, #tpu.memory_space<vmem>>) attributes {dimension_semantics = [#tpu.dimension_semantics<parallel>], iteration_bounds = array<i64: 1>, scalar_prefetch = 0 : i64, scratch_operands = 0 : i64, tpu.core_type = #tpu.core_type<tc>, window_params = [{transform_indices = @transform_0, window_bounds = array<i64: 8, 3, 256>}, {pipeline_mode = #tpu.pipeline_mode<synchronous>, transform_indices = @transform_1, window_bounds = array<i64: 3, 2048>}, {pipeline_mode = #tpu.pipeline_mode<synchronous>, transform_indices = @transform_2, window_bounds = array<i64: 2048, 512>}, {pipeline_mode = #tpu.pipeline_mode<synchronous>, transform_indices = @transform_3, window_bounds = array<i64: 512, 256>}, {pipeline_mode = #tpu.pipeline_mode<synchronous>, transform_indices = @transform_4, window_bounds = array<i64: 256, 128>}, {pipeline_mode = #tpu.pipeline_mode<synchronous>, transform_indices = @transform_5, window_bounds = array<i64: 1, 2944>}, {transform_indices = @transform_6, window_bounds = array<i64: 8, 128>}, {transform_indices = @transform_7, window_bounds = array<i64: 8, 256>}]} {
    %c0 = arith.constant 0 : index
    %c0_0 = arith.constant 0 : index
    %c0_1 = arith.constant 0 : index
    %0 = vector.load %arg1[%c0, %c0_0, %c0_1] : memref<8x3x256xf32, #tpu.memory_space<vmem>>, vector<8x3x256xf32>
    %cst = arith.constant dense<0.000000e+00> : vector<8x3xf32>
    %1 = vector.multi_reduction <add>, %0, %cst [2] : vector<8x3x256xf32> to vector<8x3xf32>
    %cst_2 = arith.constant 2.560000e+02 : f32
    %2 = vector.broadcast %cst_2 : f32 to vector<8x3xf32>
    %3 = arith.divf %1, %2 : vector<8x3xf32>
    %c0_3 = arith.constant 0 : index
    %c0_4 = arith.constant 0 : index
    %4 = vector.load %arg6[%c0_3, %c0_4] : memref<1x2944xf32, #tpu.memory_space<vmem>>, vector<1x2048xf32>
    %c0_5 = arith.constant 0 : index
    %c2048 = arith.constant 2048 : index
    %5 = vector.load %arg6[%c0_5, %c2048] : memref<1x2944xf32, #tpu.memory_space<vmem>>, vector<1x512xf32>
    %c0_6 = arith.constant 0 : index
    %c2560 = arith.constant 2560 : index
    %6 = vector.load %arg6[%c0_6, %c2560] : memref<1x2944xf32, #tpu.memory_space<vmem>>, vector<1x256xf32>
    %c0_7 = arith.constant 0 : index
    %c2816 = arith.constant 2816 : index
    %7 = vector.load %arg6[%c0_7, %c2816] : memref<1x2944xf32, #tpu.memory_space<vmem>>, vector<1x128xf32>
    %8 = arith.truncf %3 : vector<8x3xf32> to vector<8x3xbf16>
    %c0_8 = arith.constant 0 : index
    %c0_9 = arith.constant 0 : index
    %9 = vector.load %arg2[%c0_8, %c0_9] : memref<3x2048xbf16, #tpu.memory_space<vmem>>, vector<3x2048xbf16>
    %cst_10 = arith.constant dense<0.000000e+00> : vector<8x2048xf32>
    %10 = tpu.matmul %8, %9, %cst_10 {dimension_numbers = #tpu.dot_dimension_numbers<[1], [0], [0], [1], [0, 0, 1, 1], [], []>} : vector<8x3xbf16>, vector<3x2048xbf16>, vector<8x2048xf32> -> vector<8x2048xf32>
    %11 = vector.broadcast %4 : vector<1x2048xf32> to vector<8x2048xf32>
    %12 = arith.addf %10, %11 : vector<8x2048xf32>
    %cst_11 = arith.constant 0.000000e+00 : f32
    %13 = vector.broadcast %cst_11 : f32 to vector<8x2048xf32>
    %14 = arith.maximumf %12, %13 : vector<8x2048xf32>
    %15 = arith.truncf %14 : vector<8x2048xf32> to vector<8x2048xbf16>
    %c0_12 = arith.constant 0 : index
    %c0_13 = arith.constant 0 : index
    %16 = vector.load %arg3[%c0_12, %c0_13] : memref<2048x512xbf16, #tpu.memory_space<vmem>>, vector<2048x512xbf16>
    %cst_14 = arith.constant dense<0.000000e+00> : vector<8x512xf32>
    %17 = tpu.matmul %15, %16, %cst_14 {dimension_numbers = #tpu.dot_dimension_numbers<[1], [0], [0], [1], [0, 0, 1, 1], [], []>} : vector<8x2048xbf16>, vector<2048x512xbf16>, vector<8x512xf32> -> vector<8x512xf32>
    %18 = vector.broadcast %5 : vector<1x512xf32> to vector<8x512xf32>
    %19 = arith.addf %17, %18 : vector<8x512xf32>
    %cst_15 = arith.constant 0.000000e+00 : f32
    %20 = vector.broadcast %cst_15 : f32 to vector<8x512xf32>
    %21 = arith.maximumf %19, %20 : vector<8x512xf32>
    %22 = arith.truncf %21 : vector<8x512xf32> to vector<8x512xbf16>
    %c0_16 = arith.constant 0 : index
    %c0_17 = arith.constant 0 : index
    %23 = vector.load %arg4[%c0_16, %c0_17] : memref<512x256xbf16, #tpu.memory_space<vmem>>, vector<512x256xbf16>
    %cst_18 = arith.constant dense<0.000000e+00> : vector<8x256xf32>
    %24 = tpu.matmul %22, %23, %cst_18 {dimension_numbers = #tpu.dot_dimension_numbers<[1], [0], [0], [1], [0, 0, 1, 1], [], []>} : vector<8x512xbf16>, vector<512x256xbf16>, vector<8x256xf32> -> vector<8x256xf32>
    %25 = vector.broadcast %6 : vector<1x256xf32> to vector<8x256xf32>
    %26 = arith.addf %24, %25 : vector<8x256xf32>
    %cst_19 = arith.constant 0.000000e+00 : f32
    %27 = vector.broadcast %cst_19 : f32 to vector<8x256xf32>
    %28 = arith.maximumf %26, %27 : vector<8x256xf32>
    %29 = arith.truncf %28 : vector<8x256xf32> to vector<8x256xbf16>
    %c0_20 = arith.constant 0 : index
    %c0_21 = arith.constant 0 : index
    %30 = vector.load %arg5[%c0_20, %c0_21] : memref<256x128xbf16, #tpu.memory_space<vmem>>, vector<256x128xbf16>
    %cst_22 = arith.constant dense<0.000000e+00> : vector<8x128xf32>
    %31 = tpu.matmul %29, %30, %cst_22 {dimension_numbers = #tpu.dot_dimension_numbers<[1], [0], [0], [1], [0, 0, 1, 1], [], []>} : vector<8x256xbf16>, vector<256x128xbf16>, vector<8x128xf32> -> vector<8x128xf32>
    %32 = vector.broadcast %7 : vector<1x128xf32> to vector<8x128xf32>
    %33 = arith.addf %31, %32 : vector<8x128xf32>
    %c0_23 = arith.constant 0 : index
    %c0_24 = arith.constant 0 : index
    %34 = vector.load %arg8[%c0_23, %c0_24] : memref<8x256xf32, #tpu.memory_space<vmem>>, vector<8x256xf32>
    tpu.vector_store %arg8[%c0_23, %c0_24], %26 {strides = array<i32>} : memref<8x256xf32, #tpu.memory_space<vmem>>, vector<8x256xf32>,
    %c0_25 = arith.constant 0 : index
    %c0_26 = arith.constant 0 : index
    %35 = vector.load %arg7[%c0_25, %c0_26] : memref<8x128xf32, #tpu.memory_space<vmem>>, vector<8x128xf32>
    tpu.vector_store %arg7[%c0_25, %c0_26], %33 {strides = array<i32>} : memref<8x128xf32, #tpu.memory_space<vmem>>, vector<8x128xf32>,
    return
  }
  func.func @transform_0(%arg0: i32) -> (i32, i32, i32) {
    %c0_i32 = arith.constant 0 : i32
    %c0_i32_0 = arith.constant 0 : i32
    %c0_i32_1 = arith.constant 0 : i32
    return %arg0, %c0_i32, %c0_i32_0 : i32, i32, i32
  }
  func.func @transform_1(%arg0: i32) -> (i32, i32) {
    %c0_i32 = arith.constant 0 : i32
    %c0_i32_0 = arith.constant 0 : i32
    %c0_i32_1 = arith.constant 0 : i32
    return %c0_i32, %c0_i32_0 : i32, i32
  }
  func.func @transform_2(%arg0: i32) -> (i32, i32) {
    %c0_i32 = arith.constant 0 : i32
    %c0_i32_0 = arith.constant 0 : i32
    %c0_i32_1 = arith.constant 0 : i32
    return %c0_i32, %c0_i32_0 : i32, i32
  }
  func.func @transform_3(%arg0: i32) -> (i32, i32) {
    %c0_i32 = arith.constant 0 : i32
    %c0_i32_0 = arith.constant 0 : i32
    %c0_i32_1 = arith.constant 0 : i32
    return %c0_i32, %c0_i32_0 : i32, i32
  }
  func.func @transform_4(%arg0: i32) -> (i32, i32) {
    %c0_i32 = arith.constant 0 : i32
    %c0_i32_0 = arith.constant 0 : i32
    %c0_i32_1 = arith.constant 0 : i32
    return %c0_i32, %c0_i32_0 : i32, i32
  }
  func.func @transform_5(%arg0: i32) -> (i32, i32) {
    %c0_i32 = arith.constant 0 : i32
    %c0_i32_0 = arith.constant 0 : i32
    %c0_i32_1 = arith.constant 0 : i32
    return %c0_i32, %c0_i32_0 : i32, i32
  }
  func.func @transform_6(%arg0: i32) -> (i32, i32) {
    %c0_i32 = arith.constant 0 : i32
    %c0_i32_0 = arith.constant 0 : i32
    return %arg0, %c0_i32 : i32, i32
  }
  func.func @transform_7(%arg0: i32) -> (i32, i32) {
    %c0_i32 = arith.constant 0 : i32
    %c0_i32_0 = arith.constant 0 : i32
    return %arg0, %c0_i32 : i32, i32
  }
}

</mosaic_0001>

<bundles_post_ra>
// kernel: image_sentiment_forward.1
= control target key start
LH: loop header
LB: loop body
LE: loop exit
PB: predicated region body
PF: predicated region fallthrough
CT: control target
= control target key end

     0   :  { %13 = vsyncpa [#allocation3], 0  ;;  %s8701_s0 = inlined_call_operand.vmem [shape: f32[8,3,256], index: 0, kind: input, shape index: {}]   ;;  %s8702_s1 = inlined_call_operand.hbm [shape: bf16[3,2048], index: 1, kind: input, shape index: {}]   ;;  %s8703_s2 = inlined_call_operand.hbm [shape: bf16[2048,512], index: 2, kind: input, shape index: {}]   ;;  %s8704_s3 = inlined_call_operand.hbm [shape: bf16[512,256], index: 3, kind: input, shape index: {}]   ;;  %s8705_s4 = inlined_call_operand.hbm [shape: bf16[256,128], index: 4, kind: input, shape index: {}]   ;;  %s8706_s5 = inlined_call_operand.hbm [shape: f32[1,2944], index: 5, kind: input, shape index: {}]   ;;  %s8707_s6 = inlined_call_operand.vmem [shape: f32[8,128], index: 6, kind: output, shape index: {0}]   ;;  %s8708_s7 = inlined_call_operand.vmem [shape: f32[8,256], index: 7, kind: output, shape index: {1}]  }
   0x1   :  { %14 = vsyncpa [#allocation5], 0  ;;  %s33_s26 = sshll.u32 %s8703_s2, 4  ;;  %s34_s26 = int_to_ptr.hbm [resolvable:$true] %s33_s26 }
   0x2   :  { %15 = vsyncpa [#allocation8], 0  ;;  %s8321_s27 = smov [#allocation4]   ;;  %s59_s8 = sshll.u32 %s8705_s4, 4  ;;  %s60_s8 = int_to_ptr.hbm [resolvable:$true] %s59_s8 }
   0x3   :  { %s35_s28 = sshll.u32 %s8321_s27, 4  ;;  %s8322_s9 = smov 256   ;;  %s36_s28 = int_to_ptr.vmem [resolvable:$true] %s35_s28 }
   0x4   :  { %s8323_s10 = smov 16   ;;  %s8324_s11 = smov [#allocation7]  }
   0x5   :  { %41 = dma.hbm_to_vmem [thread:$0]  %s34_s26, 65536, %s36_s28, [#allocation5], %s8322_s9, %s8322_s9, %s8323_s10  }
   0x6   :  { %s61_s12 = sshll.u32 %s8324_s11, 4  ;;  %s8325_s13 = smov 64   ;;  %s62_s12 = int_to_ptr.vmem [resolvable:$true] %s61_s12 }
   0x7   :  { %s8326_s14 = smov 4   ;;  %s23_s16 = sshll.u32 %s8702_s1, 4  ;;  %s24_s16 = int_to_ptr.hbm [resolvable:$true] %s23_s16 }
   0x8   :  { %67 = dma.hbm_to_vmem [thread:$0]  %s60_s8, 2048, %s62_s12, [#allocation8], %s8325_s13, %s8325_s13, %s8326_s14  }
   0x9   :  { %s8327_s17 = smov [#allocation2]   ;;  %s46_s20 = sshll.u32 %s8704_s3, 4  ;;  %s47_s20 = int_to_ptr.hbm [resolvable:$true] %s46_s20 }
   0xa   :  { %s25_s18 = sshll.u32 %s8327_s17, 4  ;;  %s8328_s21 = smov [#allocation6]   ;;  %s26_s18 = int_to_ptr.vmem [resolvable:$true] %s25_s18 }
   0xb   :  { %28 = dma.hbm_to_vmem [thread:$0]  %s24_s16, 512, %s26_s18, [#allocation3]  }
   0xc   :  { %s48_s22 = sshll.u32 %s8328_s21, 4  ;;  %s8329_s23 = smov 128   ;;  %s49_s22 = int_to_ptr.vmem [resolvable:$true] %s48_s22 }
   0xd   :  { %s8330_s24 = smov 8   ;;  %s73_s1 = sshll.u32 %s8706_s5, 4  ;;  %s74_s1 = int_to_ptr.hbm [resolvable:$true] %s73_s1 }
   0xe   :  { %54 = dma.hbm_to_vmem [thread:$0]  %s47_s20, 8192, %s49_s22, [#allocation5], %s8329_s23, %s8329_s23, %s8330_s24  }
   0xf   :  { %s8331_s27 = smov [#allocation9]  }
  0x10   :  { %s75_s28 = sshll.u32 %s8331_s27, 4  ;;  %s76_s28 = int_to_ptr.vmem [resolvable:$true] %s75_s28 }
  0x11   :  { %78 = dma.hbm_to_vmem [thread:$0]  %s74_s1, 368, %s76_s28, [#allocation8]  }
  0x12   :  { %8315 = dma.done.wait [#allocation3], 512  }
  0x13   :  { %8316 = vsyncadd [#allocation3], 4294966784 }
  0x14   :  { %8317 = dma.done.wait [#allocation5], 73728  }
  0x15   :  { %8318 = vsyncadd [#allocation5], 4294893568 }
  0x16   :  { %8319 = dma.done.wait [#allocation8], 2416  }
  0x17   :  { %8320 = vsyncadd [#allocation8], 4294964880  ;;  %v100_v0 = vld [vmem:[%s8701_s0] sm:$0x77]  ;;  %v102_v1 = vld [vmem:[%s8701_s0 + $0x10] sm:$0x77] }
  0x18   :  { %116 = vst [vmem:[#allocation1] ss:$2 sm:$0xff] %v100_v0  ;;  %v101_v2 = vld [vmem:[%s8701_s0 + $0x8] sm:$0x77]  ;;  %v103_v3 = vld [vmem:[%s8701_s0 + $0x18] sm:$0x77] }
  0x19   :  { %124 = vst [vmem:[#allocation1 + $0x20] ss:$2 sm:$0xff] %v102_v1  ;;  %v104_v4 = vld [vmem:[%s8701_s0 + $0x20] sm:$0x77]  ;;  %vm159_vm0 = vcmask 1042432   ;;  %v8332_v48 = vmov 256.0  }
  0x1a   :  { %120 = vst [vmem:[#allocation1 + $0x10] ss:$2 sm:$0xff] %v101_v2  ;;  %v106_v5 = vld [vmem:[%s8701_s0 + $0x30] sm:$0x77]  ;;  %v105_v10 = vld [vmem:[%s8701_s0 + $0x28] sm:$0x77]  ;;  %8191 = vrcp.f32 %v8332_v48 }
  0x1b   :  { %128 = vst [vmem:[#allocation1 + $0x30] ss:$2 sm:$0xff] %v103_v3  ;;  %v107_v16 = vld [vmem:[%s8701_s0 + $0x38] sm:$0x77]  ;;  %v228_v51 = vld [vmem:[#allocation2] sm:$0xff]  ;;  %v229_v52 = vld [vmem:[#allocation2 + $0x8] sm:$0xff] }
  0x1c   :  { %vm336_vm1 = vcmask 1040384   ;;  %vm337_vm2 = vcmask 1041408   ;;  %v8333_v54 = vmov 65535   ;;  %vm292_vm4 = vcmask 1041409  }
  0x1d   :  { %v338_v55 = vsel %vm336_vm1, 4294967295, %v8333_v54  ;;  %vm294_vm5 = vcmask 1042434   ;;  %vm296_vm6 = vcmask 1043459   ;;  %vm298_vm7 = vcmask 1044484  }
  0x1e   :  { %v8429_v58 = vsel %vm337_vm2, %v338_v55, 0  ;;  %vm300_vm8 = vcmask 1045509   ;;  %vm302_vm9 = vcmask 1046534   ;;  %vm304_vm10 = vcmask 1047559  }
  0x1f   :  { %v117_v6 = vld.sshfl [vmem:[#allocation1] sm:$0xff pattern:$0x75316420]  ;;  %v118_v7 = vld.sshfl [vmem:[#allocation1 + $0x8] sm:$0xff pattern:$0x75316420] }
  0x20   :  { %v160_v8 = vsel %vm159_vm0, %v117_v6, 0.0  ;;  %v161_v9 = vsel %vm159_vm0, %v118_v7, 0.0  ;;  %131 = vst [vmem:[#allocation1] ss:$2 sm:$0xff] %v104_v4  ;;  %v8192_v49 = vpop.eup %8191  ;;  %vm332_vm11 = vcmask 23552  }
  0x21   :  { %v162_v11 = vadd.f32 %v161_v9, %v160_v8  ;;  %v125_v12 = vld.sshfl [vmem:[#allocation1 + $0x20] sm:$0xff pattern:$0x75316420]  ;;  %v126_v13 = vld.sshfl [vmem:[#allocation1 + $0x28] sm:$0xff pattern:$0x75316420]  ;;  %vm205_vm3 = vweird.f32 %v8192_v49 }
  0x22   :  { %v170_v14 = vsel %vm159_vm0, %v125_v12, 0.0  ;;  %v171_v15 = vsel %vm159_vm0, %v126_v13, 0.0  ;;  %137 = vst [vmem:[#allocation1 + $0x20] ss:$2 sm:$0xff] %v106_v5  ;;  %v201_v50 = vmul.f32 256.0, %v8192_v49  ;;  %v230_v9 = vld [vmem:[#allocation2 + $0x10] sm:$0xff]  ;;  %v282_v13 = vlaneseq }
  0x23   :  { %163 = vadd.xlane.f32.xlu0 %v162_v11  ;;  %v172_v17 = vadd.f32 %v171_v15, %v170_v14  ;;  %v121_v18 = vld.sshfl [vmem:[#allocation1 + $0x10] sm:$0xff pattern:$0x75316420]  ;;  %v122_v19 = vld.sshfl [vmem:[#allocation1 + $0x18] sm:$0xff pattern:$0x75316420] }
  0x24   :  { %134 = vst [vmem:[#allocation1 + $0x10] ss:$2 sm:$0xff] %v105_v10  ;;  %v165_v20 = vsel %vm159_vm0, %v121_v18, 0.0  ;;  %v166_v21 = vsel %vm159_vm0, %v122_v19, 0.0  ;;  %v202_v53 = vsub.f32 1.0, %v201_v50 }
  0x25   :  { %173 = vadd.xlane.f32.xlu1 %v172_v17  ;;  %v129_v22 = vld.sshfl [vmem:[#allocation1 + $0x30] sm:$0xff pattern:$0x75316420]  ;;  %v130_v23 = vld.sshfl [vmem:[#allocation1 + $0x38] sm:$0xff pattern:$0x75316420]  ;;  %v167_v26 = vadd.f32 %v166_v21, %v165_v20 }
  0x26   :  { %140 = vst [vmem:[#allocation1 + $0x30] ss:$2 sm:$0xff] %v107_v16  ;;  %v175_v24 = vsel %vm159_vm0, %v129_v22, 0.0  ;;  %v176_v25 = vsel %vm159_vm0, %v130_v23, 0.0  ;;  %v203_v56 = vmul.f32 %v8192_v49, %v202_v53 }
  0x27   :  { %v132_v27 = vld.sshfl [vmem:[#allocation1] sm:$0xff pattern:$0x75316420]  ;;  %v133_v28 = vld.sshfl [vmem:[#allocation1 + $0x8] sm:$0xff pattern:$0x75316420]  ;;  %v177_v32 = vadd.f32 %v176_v25, %v175_v24 }
  0x28   :  { %v180_v29 = vsel %vm159_vm0, %v132_v27, 0.0  ;;  %v181_v30 = vsel %vm159_vm0, %v133_v28, 0.0  ;;  %v204_v1 = vadd.f32 %v8192_v49, %v203_v56  ;;  %v283_v25 = vand.u32 127, %v282_v13 }
  0x29   :  { %v182_v31 = vadd.f32 %v181_v30, %v180_v29  ;;  %v138_v33 = vld.sshfl [vmem:[#allocation1 + $0x20] sm:$0xff pattern:$0x75316420]  ;;  %v139_v34 = vld.sshfl [vmem:[#allocation1 + $0x28] sm:$0xff pattern:$0x75316420] }
  0x2a   :  { %v190_v39 = vsel %vm159_vm0, %v138_v33, 0.0  ;;  %v191_v40 = vsel %vm159_vm0, %v139_v34, 0.0  ;;  %v206_v5 = vsel %vm205_vm3, %v8192_v49, %v204_v1 }
  0x2b   :  { %168 = vadd.xlane.f32.xlu0 %v167_v26  ;;  %183 = vadd.xlane.f32.xlu2 %v182_v31  ;;  %v135_v35 = vld.sshfl [vmem:[#allocation1 + $0x10] sm:$0xff pattern:$0x75316420]  ;;  %v136_v36 = vld.sshfl [vmem:[#allocation1 + $0x18] sm:$0xff pattern:$0x75316420]  ;;  %v192_v46 = vadd.f32 %v191_v40, %v190_v39 }
  0x2c   :  { %v185_v37 = vsel %vm159_vm0, %v135_v35, 0.0  ;;  %v186_v38 = vsel %vm159_vm0, %v136_v36, 0.0  ;;  %308 = vst [vmem:[#allocation1] ss:$4 sm:$0xff] %v228_v51 }
  0x2d   :  { %178 = vadd.xlane.f32.xlu1 %v177_v32  ;;  %v141_v41 = vld.sshfl [vmem:[#allocation1 + $0x30] sm:$0xff pattern:$0x75316420]  ;;  %v142_v42 = vld.sshfl [vmem:[#allocation1 + $0x38] sm:$0xff pattern:$0x75316420]  ;;  %v187_v45 = vadd.f32 %v186_v38, %v185_v37 }
  0x2e   :  { %v195_v43 = vsel %vm159_vm0, %v141_v41, 0.0  ;;  %v196_v44 = vsel %vm159_vm0, %v142_v42, 0.0  ;;  %311 = vst [vmem:[#allocation1 + $0x20] ss:$4 sm:$0xff] %v229_v52  ;;  %v231_v41 = vld [vmem:[#allocation2 + $0x18] sm:$0xff] }
  0x2f   :  { %v197_v47 = vadd.f32 %v196_v44, %v195_v43 }
  0x33   :  { %188 = vadd.xlane.f32.xlu2 %v187_v45  ;;  %193 = vadd.xlane.f32.xlu0 %v192_v46  ;;  %v312_v57 = vld.sshfl [vmem:[#allocation1] sm:$0xff pattern:$0x73625140]  ;;  %v313_v60 = vld.sshfl [vmem:[#allocation1 + $0x8] sm:$0xff pattern:$0x73625140] }
  0x34   :  { %v340_v59 = vand.u32 %v8429_v58, %v312_v57  ;;  %v342_v61 = vand.u32 %v8429_v58, %v313_v60  ;;  %v314_v3 = vld.sshfl [vmem:[#allocation1 + $0x10] sm:$0xff pattern:$0x73625140]  ;;  %v315_v4 = vld.sshfl [vmem:[#allocation1 + $0x18] sm:$0xff pattern:$0x73625140] }
  0x35   :  { %198 = vadd.xlane.f32.xlu1 %v197_v47  ;;  %v316_v62 = vld.sshfl [vmem:[#allocation1 + $0x20] sm:$0xff pattern:$0x73625140]  ;;  %v317_v0 = vld.sshfl [vmem:[#allocation1 + $0x28] sm:$0xff pattern:$0x73625140]  ;;  %v344_v7 = vand.u32 %v8429_v58, %v314_v3  ;;  %v346_v8 = vand.u32 %v8429_v58, %v315_v4 }
  0x36   :  { %379 = vmatpush.bf16.msra.mxu2 %v340_v59  ;;  %v348_v63 = vand.u32 %v8429_v58, %v316_v62  ;;  %392 = vmatpush.bf16.msra.mxu3 %v342_v61  ;;  %v350_v2 = vand.u32 %v8429_v58, %v317_v0  ;;  %321 = vst [vmem:[#allocation1] ss:$4 sm:$0xff] %v230_v9  ;;  %v318_v36 = vld.sshfl [vmem:[#allocation1 + $0x30] sm:$0xff pattern:$0x73625140] }
  0x37   :  { %v319_v37 = vld.sshfl [vmem:[#allocation1 + $0x38] sm:$0xff pattern:$0x73625140] }
  0x38   :  { %431 = vmatpush.bf16.msra.mxu0 %v348_v63  ;;  %444 = vmatpush.bf16.msra.mxu1 %v350_v2  ;;  %323 = vst [vmem:[#allocation1 + $0x20] ss:$4 sm:$0xff] %v231_v41  ;;  %v5715_v41 = vld [vmem:[#allocation4 + $0x3e0] sm:$0xf] }
  0x3a   :  { %405 = vmatpush.bf16.msrb.mxu2 %v344_v7  ;;  %418 = vmatpush.bf16.msrb.mxu3 %v346_v8 }
  0x3d   :  { %v324_v18 = vld.sshfl [vmem:[#allocation1] sm:$0xff pattern:$0x73625140]  ;;  %v325_v19 = vld.sshfl [vmem:[#allocation1 + $0x8] sm:$0xff pattern:$0x73625140] }
  0x3e   :  { %v356_v21 = vand.u32 %v8429_v58, %v324_v18  ;;  %v358_v24 = vand.u32 %v8429_v58, %v325_v19  ;;  %v326_v9 = vld.sshfl [vmem:[#allocation1 + $0x10] sm:$0xff pattern:$0x73625140]  ;;  %v7615_v18 = vld [vmem:[#allocation4 + $0xec] sm:$0xf0] }
  0x3f   :  { %v328_v1 = vld.sshfl [vmem:[#allocation1 + $0x20] sm:$0xff pattern:$0x73625140]  ;;  %v329_v2 = vld.sshfl [vmem:[#allocation1 + $0x28] sm:$0xff pattern:$0x73625140] }
  0x40   :  { %483 = vmatpush.bf16.msrb.mxu0 %v356_v21  ;;  %496 = vmatpush.bf16.msrb.mxu1 %v358_v24  ;;  %v364_v7 = vand.u32 %v8429_v58, %v328_v1  ;;  %v366_v8 = vand.u32 %v8429_v58, %v329_v2  ;;  %v330_v13 = vld.sshfl [vmem:[#allocation1 + $0x30] sm:$0xff pattern:$0x73625140]  ;;  %v5459_v19 = vld [vmem:[#allocation4 + $0x1e0] sm:$0xf] }
  0x41   :  { %v7647_v21 = vld [vmem:[#allocation4 + $0x1ec] sm:$0xf0]  ;;  %v5443_v24 = vld [vmem:[#allocation4 + $0x1c0] sm:$0xf] }
  0x42   :  { %v5683_v2 = vld [vmem:[#allocation4 + $0x3a0] sm:$0xf] }
  0x96   :  { %v164_v6 = vpop.xlane.xlu0 %163 }
  0x97   :  { %v207_v11 = vmul.f32 %v206_v5, %v164_v6  ;;  %v354_v6 = vand.u32 %v8429_v58, %v319_v37  ;;  %v7635_v37 = vld [vmem:[#allocation4 + $0x18c] sm:$0xf0] }
  0x98   :  { %v174_v10 = vpop.xlane.xlu1 %173 }
  0x99   :  { %v209_v12 = vmul.f32 %v206_v5, %v174_v10  ;;  %v220_v14 = vpack.c.bf16 %v207_v11, %v207_v11  ;;  %v327_v10 = vld.sshfl [vmem:[#allocation1 + $0x18] sm:$0xff pattern:$0x73625140]  ;;  %v360_v11 = vand.u32 %v8429_v58, %v326_v9 }
  0x9b   :  { %v222_v15 = vpack.c.bf16 %v209_v12, %v209_v12  ;;  %v274_v26 = vunpack.c.l.b16 %v220_v14  ;;  %v362_v12 = vand.u32 %v8429_v58, %v327_v10  ;;  %v331_v14 = vld.sshfl [vmem:[#allocation1 + $0x38] sm:$0xff pattern:$0x73625140] }
  0x9c   :  { %v7623_v10 = vld [vmem:[#allocation4 + $0x12c] sm:$0xf0] }
  0x9d   :  { %v276_v29 = vunpack.c.l.b16 %v222_v15  ;;  %v284_v33 = vperm.slane %v274_v26, %v283_v25  ;;  %v368_v15 = vand.u32 %v8429_v58, %v330_v13  ;;  %v7667_v13 = vld [vmem:[#allocation4 + $0x28c] sm:$0xf0] }
  0x9e   :  { %v169_v16 = vpop.xlane.xlu0 %168  ;;  %v184_v17 = vpop.xlane.xlu2 %183 }
  0x9f   :  { %v208_v20 = vmul.f32 %v206_v5, %v169_v16  ;;  %v211_v22 = vmul.f32 %v206_v5, %v184_v17  ;;  %v286_v38 = vperm.slane %v276_v29, %v283_v25  ;;  %v370_v16 = vand.u32 %v8429_v58, %v331_v14  ;;  %v5331_v17 = vld [vmem:[#allocation4 + $0xe0] sm:$0xf]  ;;  %v7607_v29 = vld [vmem:[#allocation4 + $0xac] sm:$0xf0] }
  0xa0   :  { %v179_v23 = vpop.xlane.xlu1 %178 }
  0xa1   :  { %v221_v27 = vpack.c.bf16 %v208_v20, %v208_v20  ;;  %v210_v28 = vmul.f32 %v206_v5, %v179_v23  ;;  %v224_v32 = vpack.c.bf16 %v211_v22, %v211_v22  ;;  %v5332_v20 = vor.u32 %v7615_v18, %v5331_v17  ;;  %v5315_v22 = vld [vmem:[#allocation4 + $0xc0] sm:$0xf]  ;;  %v7611_v23 = vld [vmem:[#allocation4 + $0xcc] sm:$0xf0] }
  0xa2   :  { %v5316_v26 = vor.u32 %v7611_v23, %v5315_v22  ;;  %v5219_v17 = vld [vmem:[#allocation4] sm:$0xf]  ;;  %v7587_v18 = vld [vmem:[#allocation4 + $0xc] sm:$0xf0] }
  0xa3   :  { %v275_v30 = vunpack.c.l.b16 %v221_v27  ;;  %v223_v31 = vpack.c.bf16 %v210_v28, %v210_v28  ;;  %v278_v46 = vunpack.c.l.b16 %v224_v32  ;;  %v5299_v28 = vld [vmem:[#allocation4 + $0xa0] sm:$0xf] }
  0xa4   :  { %v5300_v32 = vor.u32 %v7607_v29, %v5299_v28  ;;  %v5523_v28 = vld [vmem:[#allocation4 + $0x260] sm:$0xf]  ;;  %v7663_v29 = vld [vmem:[#allocation4 + $0x26c] sm:$0xf0] }
  0xa5   :  { %v285_v34 = vperm.slane %v275_v30, %v283_v25  ;;  %v277_v35 = vunpack.c.l.b16 %v223_v31  ;;  %v288_v56 = vperm.slane %v278_v46, %v283_v25  ;;  %v5427_v30 = vld [vmem:[#allocation4 + $0x1a0] sm:$0xf]  ;;  %v7639_v31 = vld [vmem:[#allocation4 + $0x1ac] sm:$0xf0] }
  0xa6   :  { %v189_v39 = vpop.xlane.xlu2 %188  ;;  %v194_v40 = vpop.xlane.xlu0 %193  ;;  %v5395_v46 = vld [vmem:[#allocation4 + $0x160] sm:$0xf] }
  0xa7   :  { %v293_v42 = vsel %vm292_vm4, %v285_v34, %v284_v33  ;;  %v287_v43 = vperm.slane %v277_v35, %v283_v25  ;;  %v212_v44 = vmul.f32 %v206_v5, %v189_v39  ;;  %v213_v45 = vmul.f32 %v206_v5, %v194_v40  ;;  %v5283_v34 = vld [vmem:[#allocation4 + $0x80] sm:$0xf]  ;;  %v7603_v35 = vld [vmem:[#allocation4 + $0x8c] sm:$0xf0] }
  0xa8   :  { %v295_v47 = vsel %vm294_vm5, %v286_v38, %v293_v42  ;;  %v199_v48 = vpop.xlane.xlu1 %198  ;;  %v5428_v33 = vor.u32 %v7639_v31, %v5427_v30  ;;  %v5587_v38 = vld [vmem:[#allocation4 + $0x2e0] sm:$0xf]  ;;  %v7679_v39 = vld [vmem:[#allocation4 + $0x2ec] sm:$0xf0]  ;;  %v5284_v40 = vor.u32 %v7603_v35, %v5283_v34  ;;  %v5524_v35 = vor.u32 %v7663_v29, %v5523_v28 }
  0xa9   :  { %v225_v49 = vpack.c.bf16 %v212_v44, %v212_v44  ;;  %v226_v50 = vpack.c.bf16 %v213_v45, %v213_v45  ;;  %v214_v51 = vmul.f32 %v206_v5, %v199_v48  ;;  %v297_v52 = vsel %vm296_vm6, %v287_v43, %v295_v47  ;;  %v7711_v42 = vld [vmem:[#allocation4 + $0x3ec] sm:$0xf0]  ;;  %v5267_v43 = vld [vmem:[#allocation4 + $0x60] sm:$0xf] }
  0xaa   :  { %v299_v61 = vsel %vm298_vm7, %v288_v56, %v297_v52  ;;  %v352_v5 = vand.u32 %v8429_v58, %v318_v36  ;;  %v5460_v58 = vor.u32 %v7647_v21, %v5459_v19  ;;  %v5411_v36 = vld [vmem:[#allocation4 + $0x180] sm:$0xf]  ;;  %v7599_v44 = vld [vmem:[#allocation4 + $0x6c] sm:$0xf0]  ;;  %v5588_v47 = vor.u32 %v7679_v39, %v5587_v38 }
  0xab   :  { %v279_v53 = vunpack.c.l.b16 %v225_v49  ;;  %v280_v54 = vunpack.c.l.b16 %v226_v50  ;;  %v227_v55 = vpack.c.bf16 %v214_v51, %v214_v51  ;;  %v5412_v45 = vor.u32 %v7635_v37, %v5411_v36  ;;  %v7631_v48 = vld [vmem:[#allocation4 + $0x16c] sm:$0xf0]  ;;  %v5571_v50 = vld [vmem:[#allocation4 + $0x2c0] sm:$0xf] }
  0xac   :  { %v5716_v49 = vor.u32 %v7711_v42, %v5715_v41  ;;  %v7675_v51 = vld [vmem:[#allocation4 + $0x2cc] sm:$0xf0]  ;;  %v5268_v52 = vor.u32 %v7599_v44, %v5267_v43  ;;  %v5651_v30 = vld [vmem:[#allocation4 + $0x360] sm:$0xf] }
  0xad   :  { %v289_v57 = vperm.slane %v279_v53, %v283_v25  ;;  %v290_v59 = vperm.slane %v280_v54, %v283_v25  ;;  %v281_v60 = vunpack.c.l.b16 %v227_v55  ;;  %v5699_v53 = vld [vmem:[#allocation4 + $0x3c0] sm:$0xf]  ;;  %v7707_v54 = vld [vmem:[#allocation4 + $0x3cc] sm:$0xf0] }
  0xae   :  { %v5251_v55 = vld [vmem:[#allocation4 + $0x40] sm:$0xf]  ;;  %v7595_v56 = vld [vmem:[#allocation4 + $0x4c] sm:$0xf0] }
  0xaf   :  { %v301_v62 = vsel %vm300_vm8, %v289_v57, %v299_v61  ;;  %v291_v63 = vperm.slane %v281_v60, %v283_v25  ;;  %v7643_v25 = vld [vmem:[#allocation4 + $0x1cc] sm:$0xf0]  ;;  %v5396_v57 = vor.u32 %v7631_v48, %v5395_v46  ;;  %v5572_v60 = vor.u32 %v7675_v51, %v5571_v50  ;;  %v5827_v36 = vld [vmem:[#allocation4 + $0x4c0] sm:$0xf] }
  0xb0   :  { %v303_v0 = vsel %vm302_vm9, %v290_v59, %v301_v62  ;;  %v5444_v27 = vor.u32 %v7643_v25, %v5443_v24  ;;  %v5379_v59 = vld [vmem:[#allocation4 + $0x140] sm:$0xf]  ;;  %v7627_v61 = vld [vmem:[#allocation4 + $0x14c] sm:$0xf0]  ;;  %v5700_v62 = vor.u32 %v7707_v54, %v5699_v53  ;;  %v5252_v1 = vor.u32 %v7595_v56, %v5251_v55 }
  0xb1   :  { %v305_v3 = vsel %vm304_vm10, %v291_v63, %v303_v0  ;;  %v5555_v63 = vld [vmem:[#allocation4 + $0x2a0] sm:$0xf]  ;;  %v7671_v0 = vld [vmem:[#allocation4 + $0x2ac] sm:$0xf0] }
  0xb2   :  { %v8440_v4 = vpack.c.b16 %v305_v3, %v305_v3  ;;  %v7703_v3 = vld [vmem:[#allocation4 + $0x3ac] sm:$0xf0]  ;;  %v5556_v9 = vor.u32 %v7671_v0, %v5555_v63  ;;  %v5971_v25 = vld [vmem:[#allocation4 + $0x5e0] sm:$0xf] }
  0xb3   :  { %v7619_v21 = vld [vmem:[#allocation4 + $0x10c] sm:$0xf0]  ;;  %v5955_v38 = vld [vmem:[#allocation4 + $0x5c0] sm:$0xf] }
  0xb4   :  { %5201 = vmatmul.msk.bf16.vlgmr.msra.gmra.mxu2 %vm332_vm11, %v8440_v4  ;;  %5202 = vmatmul.msk.bf16.vlgmr.msra.gmra.mxu3 %vm332_vm11, %v8440_v4  ;;  %v7743_v24 = vld [vmem:[#allocation4 + $0x4ec] sm:$0xf0]  ;;  %v5507_v41 = vld [vmem:[#allocation4 + $0x240] sm:$0xf] }
  0xb5   :  { %5205 = vmatmul.msk.bf16.vlgmr.msra.gmra.mxu0 %vm332_vm11, %v8440_v4  ;;  %5206 = vmatmul.msk.bf16.vlgmr.msra.gmra.mxu1 %vm332_vm11, %v8440_v4  ;;  %v7695_v31 = vld [vmem:[#allocation4 + $0x36c] sm:$0xf0]  ;;  %v5635_v43 = vld [vmem:[#allocation4 + $0x340] sm:$0xf] }
  0xb6   :  { %457 = vmatpush.bf16.msra.mxu2 %v352_v5  ;;  %470 = vmatpush.bf16.msra.mxu3 %v354_v6  ;;  %v5235_v5 = vld [vmem:[#allocation4 + $0x20] sm:$0xf]  ;;  %v7591_v6 = vld [vmem:[#allocation4 + $0x2c] sm:$0xf0]  ;;  %v5652_v39 = vor.u32 %v7695_v31, %v5651_v30 }
  0xb7   :  { %535 = vmatpush.bf16.msra.mxu0 %v364_v7  ;;  %548 = vmatpush.bf16.msra.mxu1 %v366_v8  ;;  %v5380_v7 = vor.u32 %v7627_v61, %v5379_v59  ;;  %v5363_v8 = vld [vmem:[#allocation4 + $0x120] sm:$0xf]  ;;  %v5236_v14 = vor.u32 %v7591_v6, %v5235_v5  ;;  %v7739_v37 = vld [vmem:[#allocation4 + $0x4cc] sm:$0xf0] }
  0xb8   :  { %v5364_v19 = vor.u32 %v7623_v10, %v5363_v8  ;;  %v7659_v42 = vld [vmem:[#allocation4 + $0x24c] sm:$0xf0]  ;;  %v5811_v48 = vld [vmem:[#allocation4 + $0x4a0] sm:$0xf] }
  0xb9   :  { %v7691_v44 = vld [vmem:[#allocation4 + $0x34c] sm:$0xf0]  ;;  %v5939_v50 = vld [vmem:[#allocation4 + $0x5a0] sm:$0xf] }
  0xba   :  { %v5636_v51 = vor.u32 %v7691_v44, %v5635_v43  ;;  %v5491_v53 = vld [vmem:[#allocation4 + $0x220] sm:$0xf]  ;;  %v7655_v54 = vld [vmem:[#allocation4 + $0x22c] sm:$0xf0] }
  0xbb   :  { %v5619_v55 = vld [vmem:[#allocation4 + $0x320] sm:$0xf]  ;;  %v7687_v56 = vld [vmem:[#allocation4 + $0x32c] sm:$0xf0]  ;;  %v5492_v59 = vor.u32 %v7655_v54, %v5491_v53 }
  0xbc   :  { %v7731_v61 = vld [vmem:[#allocation4 + $0x48c] sm:$0xf0]  ;;  %v5620_v63 = vor.u32 %v7687_v56, %v5619_v55  ;;  %v5779_v10 = vld [vmem:[#allocation4 + $0x460] sm:$0xf] }
  0xbd   :  { %v7763_v0 = vld [vmem:[#allocation4 + $0x58c] sm:$0xf0]  ;;  %v6211_v30 = vld [vmem:[#allocation4 + $0x7c0] sm:$0xf] }
  0xbe   :  { %v7683_v5 = vld [vmem:[#allocation4 + $0x30c] sm:$0xf0]  ;;  %v6179_v54 = vld [vmem:[#allocation4 + $0x780] sm:$0xf] }
  0xbf   :  { %v7835_v31 = vld [vmem:[#allocation4 + $0x7cc] sm:$0xf0] }
  0xc0   :  { %v7827_v55 = vld [vmem:[#allocation4 + $0x78c] sm:$0xf0] }
  0xc1   :  { %v6180_v56 = vor.u32 %v7827_v55, %v6179_v54 }
  0xc4   :  { %5203 = vmatmul.msk.bf16.vlgmr.msrb.gmra.mxu2 %vm332_vm11, %v8440_v4  ;;  %5204 = vmatmul.msk.bf16.vlgmr.msrb.gmra.mxu3 %vm332_vm11, %v8440_v4 }
  0xc5   :  { %5209 = vmatmul.msk.bf16.vlgmr.msrb.gmra.mxu0 %vm332_vm11, %v8440_v4  ;;  %5210 = vmatmul.msk.bf16.vlgmr.msrb.gmra.mxu1 %vm332_vm11, %v8440_v4 }
  0xc6   :  { %509 = vmatpush.bf16.msrb.mxu2 %v360_v11  ;;  %522 = vmatpush.bf16.msrb.mxu3 %v362_v12  ;;  %v5684_v11 = vor.u32 %v7703_v3, %v5683_v2  ;;  %v5539_v12 = vld [vmem:[#allocation4 + $0x280] sm:$0xf]  ;;  %v7651_v2 = vld [vmem:[#allocation4 + $0x20c] sm:$0xf0] }
  0xc7   :  { %3693 = vmatpush.bf16.msrb.mxu0 %v5332_v20  ;;  %3706 = vmatpush.bf16.msrb.mxu1 %v5460_v58  ;;  %v5347_v20 = vld [vmem:[#allocation4 + $0x100] sm:$0xf]  ;;  %v5540_v22 = vor.u32 %v7667_v13, %v5539_v12 }
  0xc8   :  { %v5843_v58 = vld [vmem:[#allocation4 + $0x4e0] sm:$0xf] }
  0xc9   :  { %v5603_v3 = vld [vmem:[#allocation4 + $0x300] sm:$0xf] }
  0xca   :  { %v5907_v12 = vld [vmem:[#allocation4 + $0x560] sm:$0xf] }
  0xcb   :  { %3694 = vmatpush.bf16.msrb.mxu0 %v5316_v26  ;;  %3707 = vmatpush.bf16.msrb.mxu1 %v5444_v27  ;;  %v5220_v26 = vor.u32 %v7587_v18, %v5219_v17  ;;  %v7775_v27 = vld [vmem:[#allocation4 + $0x5ec] sm:$0xf0] }
  0xcc   :  { %v5972_v34 = vor.u32 %v7775_v27, %v5971_v25  ;;  %v7755_v25 = vld [vmem:[#allocation4 + $0x54c] sm:$0xf0] }
  0xcd   :  { %v7803_v27 = vld [vmem:[#allocation4 + $0x6cc] sm:$0xf0] }
  0xcf   :  { %3695 = vmatpush.bf16.msrb.mxu0 %v5300_v32  ;;  %3708 = vmatpush.bf16.msrb.mxu1 %v5428_v33  ;;  %v5348_v32 = vor.u32 %v7619_v21, %v5347_v20  ;;  %v5844_v33 = vor.u32 %v7743_v24, %v5843_v58  ;;  %v7839_v20 = vld [vmem:[#allocation4 + $0x7ec] sm:$0xf0]  ;;  %v5891_v58 = vld [vmem:[#allocation4 + $0x540] sm:$0xf] }
  0xd0   :  { %v5892_v28 = vor.u32 %v7755_v25, %v5891_v58 }
  0xd3   :  { %3696 = vmatpush.bf16.msrb.mxu0 %v5284_v40  ;;  %3709 = vmatpush.bf16.msrb.mxu1 %v5412_v45  ;;  %v7771_v40 = vld [vmem:[#allocation4 + $0x5cc] sm:$0xf0]  ;;  %v5828_v45 = vor.u32 %v7739_v37, %v5827_v36  ;;  %v5875_v36 = vld [vmem:[#allocation4 + $0x520] sm:$0xf] }
  0xd4   :  { %5207 = vmatmul.msk.bf16.vlgmr.msra.gmra.mxu2 %vm332_vm11, %v8440_v4  ;;  %5208 = vmatmul.msk.bf16.vlgmr.msra.gmra.mxu3 %vm332_vm11, %v8440_v4  ;;  %v5956_v46 = vor.u32 %v7771_v40, %v5955_v38  ;;  %v7751_v37 = vld [vmem:[#allocation4 + $0x52c] sm:$0xf0]  ;;  %v6067_v38 = vld [vmem:[#allocation4 + $0x6a0] sm:$0xf] }
  0xd5   :  { %5213 = vmatmul.msk.bf16.vlgmr.msra.gmra.mxu0 %vm332_vm11, %v8440_v4  ;;  %5214 = vmatmul.msk.bf16.vlgmr.msra.gmra.mxu1 %vm332_vm11, %v8440_v4  ;;  %v7799_v40 = vld [vmem:[#allocation4 + $0x6ac] sm:$0xf0] }
  0xd6   :  { %561 = vmatpush.bf16.msra.mxu2 %v368_v15  ;;  %574 = vmatpush.bf16.msra.mxu3 %v370_v16  ;;  %v5667_v15 = vld [vmem:[#allocation4 + $0x380] sm:$0xf]  ;;  %v7699_v16 = vld [vmem:[#allocation4 + $0x38c] sm:$0xf0]  ;;  %v6068_v43 = vor.u32 %v7799_v40, %v6067_v38 }
  0xd7   :  { %3697 = vmatpush.bf16.msrb.mxu0 %v5268_v52  ;;  %3710 = vmatpush.bf16.msrb.mxu1 %v5396_v57  ;;  %v5668_v23 = vor.u32 %v7699_v16, %v5667_v15  ;;  %v7767_v52 = vld [vmem:[#allocation4 + $0x5ac] sm:$0xf0]  ;;  %v6099_v15 = vld [vmem:[#allocation4 + $0x6e0] sm:$0xf] }
  0xd8   :  { %v5940_v57 = vor.u32 %v7767_v52, %v5939_v50  ;;  %v7807_v16 = vld [vmem:[#allocation4 + $0x6ec] sm:$0xf0]  ;;  %v6051_v50 = vld [vmem:[#allocation4 + $0x680] sm:$0xf] }
  0xd9   :  { %v6100_v18 = vor.u32 %v7807_v16, %v6099_v15  ;;  %v7811_v16 = vld [vmem:[#allocation4 + $0x70c] sm:$0xf0]  ;;  %v6467_v40 = vld [vmem:[#allocation4 + $0x9c0] sm:$0xf] }
  0xdb   :  { %3698 = vmatpush.bf16.msrb.mxu0 %v5252_v1  ;;  %3711 = vmatpush.bf16.msrb.mxu1 %v5380_v7  ;;  %v5475_v1 = vld [vmem:[#allocation4 + $0x200] sm:$0xf] }
  0xdc   :  { %v5476_v8 = vor.u32 %v7651_v2, %v5475_v1  ;;  %v6147_v1 = vld [vmem:[#allocation4 + $0x740] sm:$0xf] }
  0xdf   :  { %3699 = vmatpush.bf16.msrb.mxu0 %v5236_v14  ;;  %3712 = vmatpush.bf16.msrb.mxu1 %v5364_v19  ;;  %v7759_v14 = vld [vmem:[#allocation4 + $0x56c] sm:$0xf0]  ;;  %v6227_v19 = vld [vmem:[#allocation4 + $0x7e0] sm:$0xf] }
  0xe0   :  { %v5908_v17 = vor.u32 %v7759_v14, %v5907_v12  ;;  %v6228_v21 = vor.u32 %v7839_v20, %v6227_v19  ;;  %v5987_v12 = vld [vmem:[#allocation4 + $0x600] sm:$0xf] }
  0xe1   :  { %v6115_v14 = vld [vmem:[#allocation4 + $0x700] sm:$0xf] }
  0xe2   :  { %v8482_v20 = vld [vmem:[#allocation9] sm:$0xff] }
  0xe3   :  { %3700 = vmatpush.bf16.msrb.mxu0 %v5220_v26  ;;  %3713 = vmatpush.bf16.msrb.mxu1 %v5348_v32  ;;  %v6083_v26 = vld [vmem:[#allocation4 + $0x6c0] sm:$0xf]  ;;  %v6212_v32 = vor.u32 %v7835_v31, %v6211_v30 }
  0xe4   :  { %5211 = vmatmul.msk.bf16.vlgmr.msrb.gmra.mxu2 %vm332_vm11, %v8440_v4  ;;  %5212 = vmatmul.msk.bf16.vlgmr.msrb.gmra.mxu3 %vm332_vm11, %v8440_v4  ;;  %v6084_v29 = vor.u32 %v7803_v27, %v6083_v26  ;;  %v7871_v27 = vld [vmem:[#allocation4 + $0x8ec] sm:$0xf0] }
  0xe5   :  { %3719 = vmatpush.bf16.msrb.mxu2 %v5588_v47  ;;  %3732 = vmatpush.bf16.msrb.mxu3 %v5716_v49  ;;  %v5508_v47 = vor.u32 %v7659_v42, %v5507_v41  ;;  %v7735_v49 = vld [vmem:[#allocation4 + $0x4ac] sm:$0xf0]  ;;  %v6195_v41 = vld [vmem:[#allocation4 + $0x7a0] sm:$0xf] }
  0xe6   :  { %v7831_v42 = vld [vmem:[#allocation4 + $0x7ac] sm:$0xf0] }
  0xe7   :  { %3745 = vmatpush.bf16.msra.mxu0 %v5844_v33  ;;  %3758 = vmatpush.bf16.msra.mxu1 %v5972_v34  ;;  %v5747_v33 = vld [vmem:[#allocation4 + $0x420] sm:$0xf]  ;;  %v7719_v34 = vld [vmem:[#allocation4 + $0x42c] sm:$0xf0]  ;;  %v6196_v44 = vor.u32 %v7831_v42, %v6195_v41 }
  0xe8   :  { %v7899_v41 = vld [vmem:[#allocation4 + $0x9cc] sm:$0xf0] }
  0xe9   :  { %3720 = vmatpush.bf16.msrb.mxu2 %v5572_v60  ;;  %3733 = vmatpush.bf16.msrb.mxu3 %v5700_v62  ;;  %v5795_v60 = vld [vmem:[#allocation4 + $0x480] sm:$0xf] }
  0xea   :  { %v5923_v62 = vld [vmem:[#allocation4 + $0x580] sm:$0xf]  ;;  %v5796_v6 = vor.u32 %v7731_v61, %v5795_v60  ;;  %v7823_v61 = vld [vmem:[#allocation4 + $0x76c] sm:$0xf0] }
  0xeb   :  { %3746 = vmatpush.bf16.msra.mxu0 %v5828_v45  ;;  %3759 = vmatpush.bf16.msra.mxu1 %v5956_v46  ;;  %v5924_v7 = vor.u32 %v7763_v0, %v5923_v62  ;;  %v5731_v45 = vld [vmem:[#allocation4 + $0x400] sm:$0xf]  ;;  %v7715_v46 = vld [vmem:[#allocation4 + $0x40c] sm:$0xf0] }
  0xec   :  { %v6163_v60 = vld [vmem:[#allocation4 + $0x760] sm:$0xf]  ;;  %v7787_v0 = vld [vmem:[#allocation4 + $0x64c] sm:$0xf0] }
  0xed   :  { %3721 = vmatpush.bf16.msrb.mxu2 %v5556_v9  ;;  %3734 = vmatpush.bf16.msrb.mxu3 %v5684_v11  ;;  %v5604_v9 = vor.u32 %v7683_v5, %v5603_v3  ;;  %v7727_v11 = vld [vmem:[#allocation4 + $0x46c] sm:$0xf0]  ;;  %v6164_v62 = vor.u32 %v7823_v61, %v6163_v60  ;;  %v6435_v60 = vld [vmem:[#allocation4 + $0x980] sm:$0xf] }
  0xee   :  { %v5780_v13 = vor.u32 %v7727_v11, %v5779_v10  ;;  %v7819_v3 = vld [vmem:[#allocation4 + $0x74c] sm:$0xf0] }
  0xef   :  { %3760 = vmatpush.bf16.msra.mxu1 %v5940_v57  ;;  %v7791_v57 = vld [vmem:[#allocation4 + $0x66c] sm:$0xf0]  ;;  %v6148_v5 = vor.u32 %v7819_v3, %v6147_v1 }
  0xf0   :  { %v7815_v10 = vld [vmem:[#allocation4 + $0x72c] sm:$0xf0] }
  0xf1   :  { %3722 = vmatpush.bf16.msrb.mxu2 %v5540_v22  ;;  %3735 = vmatpush.bf16.msrb.mxu3 %v5668_v23  ;;  %v5763_v22 = vld [vmem:[#allocation4 + $0x440] sm:$0xf]  ;;  %v7723_v23 = vld [vmem:[#allocation4 + $0x44c] sm:$0xf0] }
  0xf2   :  { %v5764_v24 = vor.u32 %v7723_v23, %v5763_v22  ;;  %v235_v22 = vperm.slane %v8482_v20, 1  ;;  %v7891_v61 = vld [vmem:[#allocation4 + $0x98c] sm:$0xf0] }
  0xf3   :  { %3761 = vmatpush.bf16.msra.mxu1 %v5924_v7  ;;  %v7783_v7 = vld [vmem:[#allocation4 + $0x62c] sm:$0xf0]  ;;  %v6436_v3 = vor.u32 %v7891_v61, %v6435_v60  ;;  %v240_v60 = vperm.slane %v8482_v20, 6  ;;  %v241_v61 = vperm.slane %v8482_v20, 7 }
  0xf4   :  { %5215 = vmatmul.msk.bf16.vlgmr.msra.gmra.mxu2 %vm332_vm11, %v8440_v4  ;;  %5216 = vmatmul.msk.bf16.vlgmr.msra.gmra.mxu3 %vm332_vm11, %v8440_v4  ;;  %v5812_v4 = vor.u32 %v7735_v49, %v5811_v48  ;;  %v5732_v48 = vor.u32 %v7715_v46, %v5731_v45  ;;  %v7747_v49 = vld [vmem:[#allocation4 + $0x50c] sm:$0xf0]  ;;  %v6468_v45 = vor.u32 %v7899_v41, %v6467_v40  ;;  %v6323_v46 = vld [vmem:[#allocation4 + $0x8a0] sm:$0xf] }
  0xf5   :  { %3723 = vmatpush.bf16.msrb.mxu2 %v5524_v35  ;;  %3736 = vmatpush.bf16.msrb.mxu3 %v5652_v39  ;;  %v5748_v35 = vor.u32 %v7719_v34, %v5747_v33  ;;  %v5876_v39 = vor.u32 %v7751_v37, %v5875_v36  ;;  %v6339_v36 = vld [vmem:[#allocation4 + $0x8c0] sm:$0xf] }
  0xf6   :  { %3747 = vmatpush.bf16.msra.mxu0 %v5812_v4  ;;  %v6035_v4 = vld [vmem:[#allocation4 + $0x660] sm:$0xf] }
  0xf7   :  { %3762 = vmatpush.bf16.msra.mxu1 %v5908_v17  ;;  %v6116_v17 = vor.u32 %v7811_v16, %v6115_v14  ;;  %v7935_v14 = vld [vmem:[#allocation4 + $0xaec] sm:$0xf0] }
  0xf9   :  { %3724 = vmatpush.bf16.msrb.mxu2 %v5508_v47  ;;  %3737 = vmatpush.bf16.msrb.mxu3 %v5636_v51  ;;  %v5859_v47 = vld [vmem:[#allocation4 + $0x500] sm:$0xf]  ;;  %v7795_v51 = vld [vmem:[#allocation4 + $0x68c] sm:$0xf0] }
  0xfa   :  { %3748 = vmatpush.bf16.msra.mxu0 %v5796_v6  ;;  %v5860_v52 = vor.u32 %v7747_v49, %v5859_v47  ;;  %v6052_v53 = vor.u32 %v7795_v51, %v6051_v50  ;;  %v6003_v6 = vld [vmem:[#allocation4 + $0x620] sm:$0xf]  ;;  %v7863_v47 = vld [vmem:[#allocation4 + $0x8ac] sm:$0xf0]  ;;  %v238_v50 = vperm.slane %v8482_v20, 4  ;;  %v239_v51 = vperm.slane %v8482_v20, 5 }
  0xfb   :  { %3763 = vmatpush.bf16.msra.mxu1 %v5892_v28  ;;  %v6483_v28 = vld [vmem:[#allocation4 + $0x9e0] sm:$0xf]  ;;  %v7895_v49 = vld [vmem:[#allocation4 + $0x9ac] sm:$0xf0]  ;;  %v6324_v54 = vor.u32 %v7863_v47, %v6323_v46 }
  0xfc   :  { %v6259_v46 = vld [vmem:[#allocation4 + $0x820] sm:$0xf]  ;;  %v7847_v47 = vld [vmem:[#allocation4 + $0x82c] sm:$0xf0] }
  0xfd   :  { %3725 = vmatpush.bf16.msrb.mxu2 %v5492_v59  ;;  %3738 = vmatpush.bf16.msrb.mxu3 %v5620_v63  ;;  %v6036_v59 = vor.u32 %v7791_v57, %v6035_v4  ;;  %v6019_v63 = vld [vmem:[#allocation4 + $0x640] sm:$0xf]  ;;  %v237_v4 = vperm.slane %v8482_v20, 3 }
  0xfe   :  { %3749 = vmatpush.bf16.msra.mxu0 %v5780_v13  ;;  %v6020_v2 = vor.u32 %v7787_v0, %v6019_v63  ;;  %v7779_v13 = vld [vmem:[#allocation4 + $0x60c] sm:$0xf0]  ;;  %v6307_v57 = vld [vmem:[#allocation4 + $0x880] sm:$0xf] }
  0xff   :  { %3764 = vmatpush.bf16.msra.mxu1 %v5876_v39  ;;  %v5988_v15 = vor.u32 %v7779_v13, %v5987_v12  ;;  %v7867_v39 = vld [vmem:[#allocation4 + $0x8cc] sm:$0xf0]  ;;  %v6611_v13 = vld [vmem:[#allocation4 + $0xae0] sm:$0xf] }
 0x101   :  { %3726 = vmatpush.bf16.msrb.mxu2 %v5476_v8  ;;  %3739 = vmatpush.bf16.msrb.mxu3 %v5604_v9  ;;  %v6004_v8 = vor.u32 %v7783_v7, %v6003_v6  ;;  %v6131_v9 = vld [vmem:[#allocation4 + $0x720] sm:$0xf] }
 0x102   :  { %3750 = vmatpush.bf16.msra.mxu0 %v5764_v24  ;;  %v6132_v11 = vor.u32 %v7815_v10, %v6131_v9  ;;  %v6355_v24 = vld [vmem:[#allocation4 + $0x8e0] sm:$0xf]  ;;  %v7887_v10 = vld [vmem:[#allocation4 + $0x96c] sm:$0xf0] }
 0x103   :  { %3765 = vmatpush.bf16.msra.mxu1 %v5860_v52  ;;  %v6356_v34 = vor.u32 %v7871_v27, %v6355_v24  ;;  %v6419_v9 = vld [vmem:[#allocation4 + $0x960] sm:$0xf]  ;;  %v7851_v27 = vld [vmem:[#allocation4 + $0x84c] sm:$0xf0] }
 0x105   :  { %3771 = vmatpush.bf16.msra.mxu2 %v6100_v18  ;;  %3784 = vmatpush.bf16.msra.mxu3 %v6228_v21  ;;  %v234_v21 = vperm.slane %v8482_v20, 0 }
 0x106   :  { %3751 = vmatpush.bf16.msra.mxu0 %v5748_v35 }
 0x109   :  { %3772 = vmatpush.bf16.msra.mxu2 %v6084_v29  ;;  %3785 = vmatpush.bf16.msra.mxu3 %v6212_v32  ;;  %v7903_v29 = vld [vmem:[#allocation4 + $0x9ec] sm:$0xf0] }
 0x10a   :  { %3752 = vmatpush.bf16.msra.mxu0 %v5732_v48  ;;  %v6484_v35 = vor.u32 %v7903_v29, %v6483_v28  ;;  %v6451_v48 = vld [vmem:[#allocation4 + $0x9a0] sm:$0xf] }
 0x10b   :  { %v6452_v55 = vor.u32 %v7895_v49, %v6451_v48  ;;  %v6387_v48 = vld [vmem:[#allocation4 + $0x920] sm:$0xf] }
 0x10d   :  { %3773 = vmatpush.bf16.msra.mxu2 %v6068_v43  ;;  %3786 = vmatpush.bf16.msra.mxu3 %v6196_v44  ;;  %v6340_v44 = vor.u32 %v7867_v39, %v6339_v36  ;;  %v6723_v36 = vld [vmem:[#allocation4 + $0xbc0] sm:$0xf]  ;;  %v7963_v39 = vld [vmem:[#allocation4 + $0xbcc] sm:$0xf0] }
 0x111   :  { %3774 = vmatpush.bf16.msra.mxu2 %v6052_v53  ;;  %3787 = vmatpush.bf16.msra.mxu3 %v6180_v56  ;;  %v236_v56 = vperm.slane %v8482_v20, 2 }
 0x115   :  { %3775 = vmatpush.bf16.msra.mxu2 %v6036_v59  ;;  %3788 = vmatpush.bf16.msra.mxu3 %v6164_v62  ;;  %v7859_v59 = vld [vmem:[#allocation4 + $0x88c] sm:$0xf0] }
 0x119   :  { %3776 = vmatpush.bf16.msra.mxu2 %v6020_v2  ;;  %3789 = vmatpush.bf16.msra.mxu3 %v6148_v5  ;;  %v6308_v2 = vor.u32 %v7859_v59, %v6307_v57  ;;  %v6291_v5 = vld [vmem:[#allocation4 + $0x860] sm:$0xf]  ;;  %v7959_v59 = vld [vmem:[#allocation4 + $0xbac] sm:$0xf0] }
 0x11a   :  { %v6707_v57 = vld [vmem:[#allocation4 + $0xba0] sm:$0xf] }
 0x11d   :  { %3777 = vmatpush.bf16.msra.mxu2 %v6004_v8  ;;  %3790 = vmatpush.bf16.msra.mxu3 %v6132_v11  ;;  %v7855_v8 = vld [vmem:[#allocation4 + $0x86c] sm:$0xf0] }
 0x11e   :  { %v6292_v24 = vor.u32 %v7855_v8, %v6291_v5  ;;  %v6563_v5 = vld [vmem:[#allocation4 + $0xa80] sm:$0xf]  ;;  %v6708_v8 = vor.u32 %v7959_v59, %v6707_v57 }
 0x11f   :  { %v6659_v59 = vld [vmem:[#allocation4 + $0xb40] sm:$0xf] }
 0x121   :  { %3778 = vmatpush.bf16.msra.mxu2 %v5988_v15  ;;  %3791 = vmatpush.bf16.msra.mxu3 %v6116_v17 }
 0x132   :  { %v433_v18 = vpop.f32.mrf.mxu0  ;;  %v446_v19 = vpop.f32.mrf.mxu1 }
 0x133   :  { %v434_v62 = vadd.f32 %v433_v18, %v238_v50  ;;  %v447_v63 = vadd.f32 %v446_v19, %v239_v51  ;;  %v6739_v19 = vld [vmem:[#allocation4 + $0xbe0] sm:$0xf]  ;;  %v6724_v50 = vor.u32 %v7963_v39, %v6723_v36  ;;  %v7879_v51 = vld [vmem:[#allocation4 + $0x92c] sm:$0xf0] }
 0x135   :  { %v584_v11 = vmax.f32 %v434_v62, 0.0  ;;  %v585_v12 = vmax.f32 %v447_v63, 0.0  ;;  %v6243_v62 = vld [vmem:[#allocation4 + $0x800] sm:$0xf]  ;;  %v7843_v63 = vld [vmem:[#allocation4 + $0x80c] sm:$0xf0] }
 0x137   :  { %v381_v23 = vpop.f32.mrf.mxu2  ;;  %v394_v58 = vpop.f32.mrf.mxu3  ;;  %v8506_v28 = vpack.c.bf16 %v584_v11, %v584_v11  ;;  %v8508_v29 = vpack.c.bf16 %v585_v12, %v585_v12  ;;  %v6867_v11 = vld [vmem:[#allocation4 + $0xce0] sm:$0xf] }
 0x138   :  { %v382_v25 = vadd.f32 %v381_v23, %v234_v21  ;;  %v395_v26 = vadd.f32 %v394_v58, %v235_v22  ;;  %v7967_v21 = vld [vmem:[#allocation4 + $0xbec] sm:$0xf0]  ;;  %v8500_v22 = vld [vmem:[#allocation9 + $0x8] sm:$0xff] }
 0x139   :  { %v242_v40 = vperm.slane %v8500_v22, 0  ;;  %v243_v41 = vperm.slane %v8500_v22, 1 }
 0x13a   :  { %v580_v30 = vmax.f32 %v382_v25, 0.0  ;;  %v581_v31 = vmax.f32 %v395_v26, 0.0  ;;  %v435_v32 = vpop.f32.mrf.mxu0  ;;  %v448_v33 = vpop.f32.mrf.mxu1  ;;  %v6420_v25 = vor.u32 %v7887_v10, %v6419_v9  ;;  %v6275_v26 = vld [vmem:[#allocation4 + $0x840] sm:$0xf]  ;;  %v7955_v10 = vld [vmem:[#allocation4 + $0xb8c] sm:$0xf0] }
 0x13b   :  { %v6403_v32 = vld [vmem:[#allocation4 + $0x940] sm:$0xf]  ;;  %v7883_v33 = vld [vmem:[#allocation4 + $0x94c] sm:$0xf0] }
 0x13c   :  { %v8486_v37 = vpack.c.bf16 %v580_v30, %v580_v30  ;;  %v8488_v38 = vpack.c.bf16 %v581_v31, %v581_v31  ;;  %v6612_v30 = vor.u32 %v7935_v14, %v6611_v13  ;;  %v6740_v31 = vor.u32 %v7967_v21, %v6739_v19  ;;  %v6691_v9 = vld [vmem:[#allocation4 + $0xb80] sm:$0xf]  ;;  %v7999_v13 = vld [vmem:[#allocation4 + $0xcec] sm:$0xf0] }
 0x13d   :  { %v6995_v14 = vld [vmem:[#allocation4 + $0xde0] sm:$0xf] }
 0x13e   :  { %3701 = vmatmul.bf16.vlgmr.msrb.gmra.mxu0 %v8486_v37  ;;  %3714 = vmatmul.bf16.vlgmr.msrb.gmra.mxu1 %v8488_v38 }
 0x13f   :  { %3797 = vmatpush.bf16.msrb.mxu0 %v6356_v34  ;;  %3810 = vmatpush.bf16.msrb.mxu1 %v6484_v35  ;;  %v383_v42 = vpop.f32.mrf.mxu2  ;;  %v396_v43 = vpop.f32.mrf.mxu3  ;;  %v6595_v34 = vld [vmem:[#allocation4 + $0xac0] sm:$0xf]  ;;  %v7931_v35 = vld [vmem:[#allocation4 + $0xacc] sm:$0xf0] }
 0x140   :  { %v6596_v49 = vor.u32 %v7931_v35, %v6595_v34 }
 0x142   :  { %v8494_v52 = vpop.f32.mrf.mxu0  ;;  %v8496_v53 = vpop.f32.mrf.mxu1 }
 0x143   :  { %3798 = vmatpush.bf16.msrb.mxu0 %v6340_v44  ;;  %3811 = vmatpush.bf16.msrb.mxu1 %v6468_v45  ;;  %v6276_v44 = vor.u32 %v7851_v27, %v6275_v26  ;;  %v6404_v45 = vor.u32 %v7883_v33, %v6403_v32  ;;  %v486_v12 = vadd.f32 %v8494_v52, %v242_v40  ;;  %v6547_v26 = vld [vmem:[#allocation4 + $0xa60] sm:$0xf]  ;;  %v7919_v27 = vld [vmem:[#allocation4 + $0xa6c] sm:$0xf0] }
 0x144   :  { %v499_v20 = vadd.f32 %v8496_v53, %v243_v41  ;;  %v6868_v52 = vor.u32 %v7999_v13, %v6867_v11  ;;  %v6675_v53 = vld [vmem:[#allocation4 + $0xb60] sm:$0xf]  ;;  %v7951_v32 = vld [vmem:[#allocation4 + $0xb6c] sm:$0xf0] }
 0x145   :  { %v6851_v33 = vld [vmem:[#allocation4 + $0xcc0] sm:$0xf]  ;;  %v588_v34 = vmax.f32 %v486_v12, 0.0  ;;  %v7943_v11 = vld [vmem:[#allocation4 + $0xb2c] sm:$0xf0] }
 0x146   :  { %v589_v35 = vmax.f32 %v499_v20, 0.0  ;;  %v6819_v12 = vld [vmem:[#allocation4 + $0xc80] sm:$0xf]  ;;  %v7987_v20 = vld [vmem:[#allocation4 + $0xc8c] sm:$0xf0] }
 0x147   :  { %3799 = vmatpush.bf16.msrb.mxu0 %v6324_v54  ;;  %3812 = vmatpush.bf16.msrb.mxu1 %v6452_v55  ;;  %v407_v0 = vpop.f32.mrf.mxu2  ;;  %v420_v1 = vpop.f32.mrf.mxu3  ;;  %v6579_v54 = vld [vmem:[#allocation4 + $0xaa0] sm:$0xf]  ;;  %v7927_v55 = vld [vmem:[#allocation4 + $0xaac] sm:$0xf0] }
 0x148   :  { %v408_v6 = vadd.f32 %v407_v0, %v236_v56  ;;  %v421_v7 = vadd.f32 %v420_v1, %v237_v4  ;;  %v6371_v0 = vld [vmem:[#allocation4 + $0x900] sm:$0xf]  ;;  %v6260_v1 = vor.u32 %v7847_v47, %v6259_v46  ;;  %v6548_v47 = vor.u32 %v7919_v27, %v6547_v26  ;;  %v7939_v27 = vld [vmem:[#allocation4 + $0xb0c] sm:$0xf0] }
 0x149   :  { %v6947_v13 = vld [vmem:[#allocation4 + $0xd80] sm:$0xf] }
 0x14a   :  { %v582_v15 = vmax.f32 %v408_v6, 0.0  ;;  %v583_v16 = vmax.f32 %v421_v7, 0.0  ;;  %v487_v17 = vpop.f32.mrf.mxu0  ;;  %v500_v18 = vpop.f32.mrf.mxu1  ;;  %v7923_v6 = vld [vmem:[#allocation4 + $0xa8c] sm:$0xf0]  ;;  %v6580_v7 = vor.u32 %v7927_v55, %v6579_v54  ;;  %v8528_v54 = vpack.c.bf16 %v588_v34, %v588_v34  ;;  %v7123_v34 = vld [vmem:[#allocation4 + $0xee0] sm:$0xf] }
 0x14b   :  { %3800 = vmatpush.bf16.msrb.mxu0 %v6308_v2  ;;  %3813 = vmatpush.bf16.msrb.mxu1 %v6436_v3  ;;  %v6388_v2 = vor.u32 %v7879_v51, %v6387_v48  ;;  %v7875_v3 = vld [vmem:[#allocation4 + $0x90c] sm:$0xf0]  ;;  %v6244_v18 = vor.u32 %v7843_v63, %v6243_v62  ;;  %v6676_v48 = vor.u32 %v7951_v32, %v6675_v53  ;;  %v6931_v32 = vld [vmem:[#allocation4 + $0xd60] sm:$0xf] }
 0x14c   :  { %v8502_v23 = vpack.c.bf16 %v582_v15, %v582_v15  ;;  %v8504_v58 = vpack.c.bf16 %v583_v16, %v583_v16  ;;  %v8031_v15 = vld [vmem:[#allocation4 + $0xdec] sm:$0xf0]  ;;  %v6372_v19 = vor.u32 %v7875_v3, %v6371_v0  ;;  %v8530_v55 = vpack.c.bf16 %v589_v35, %v589_v35 }
 0x14d   :  { %v7915_v51 = vld [vmem:[#allocation4 + $0xa4c] sm:$0xf0] }
 0x14e   :  { %3727 = vmatmul.bf16.vlgmr.msrb.gmra.mxu2 %v8502_v23  ;;  %3740 = vmatmul.bf16.vlgmr.msrb.gmra.mxu3 %v8504_v58  ;;  %v7991_v0 = vld [vmem:[#allocation4 + $0xcac] sm:$0xf0] }
 0x14f   :  { %3753 = vmatmul.bf16.vlgmr.msra.gmra.mxu0 %v8506_v28  ;;  %3766 = vmatmul.bf16.vlgmr.msra.gmra.mxu1 %v8508_v29  ;;  %v409_v42 = vpop.f32.mrf.mxu2  ;;  %v422_v43 = vpop.f32.mrf.mxu3 }
 0x150   :  { %3801 = vmatpush.bf16.msrb.mxu0 %v6292_v24  ;;  %3814 = vmatpush.bf16.msrb.mxu1 %v6420_v25  ;;  %v6564_v25 = vor.u32 %v7923_v6, %v6563_v5  ;;  %v7995_v42 = vld [vmem:[#allocation4 + $0xccc] sm:$0xf0]  ;;  %v6979_v43 = vld [vmem:[#allocation4 + $0xdc0] sm:$0xf] }
 0x151   :  { %3823 = vmatpush.bf16.msrb.mxu2 %v6612_v30  ;;  %3836 = vmatpush.bf16.msrb.mxu3 %v6740_v31  ;;  %v6692_v30 = vor.u32 %v7955_v10, %v6691_v9  ;;  %v6996_v31 = vor.u32 %v8031_v15, %v6995_v14  ;;  %v6515_v6 = vld [vmem:[#allocation4 + $0xa20] sm:$0xf]  ;;  %v8019_v14 = vld [vmem:[#allocation4 + $0xd8c] sm:$0xf0]  ;;  %v244_v15 = vperm.slane %v8500_v22, 2 }
 0x152   :  { %v8516_v56 = vpop.f32.mrf.mxu0  ;;  %v8518_v4 = vpop.f32.mrf.mxu1  ;;  %v6643_v10 = vld [vmem:[#allocation4 + $0xb20] sm:$0xf]  ;;  %v6948_v26 = vor.u32 %v8019_v14, %v6947_v13 }
 0x153   :  { %v6899_v14 = vld [vmem:[#allocation4 + $0xd20] sm:$0xf] }
 0x154   :  { %3802 = vmatpush.bf16.msrb.mxu0 %v6276_v44  ;;  %3815 = vmatpush.bf16.msrb.mxu1 %v6404_v45  ;;  %v8027_v44 = vld [vmem:[#allocation4 + $0xdcc] sm:$0xf0] }
 0x155   :  { %3824 = vmatpush.bf16.msrb.mxu2 %v6596_v49  ;;  %3837 = vmatpush.bf16.msrb.mxu3 %v6724_v50  ;;  %v6852_v49 = vor.u32 %v7995_v42, %v6851_v33  ;;  %v6531_v50 = vld [vmem:[#allocation4 + $0xa40] sm:$0xf]  ;;  %v6980_v57 = vor.u32 %v8027_v44, %v6979_v43  ;;  %v8015_v33 = vld [vmem:[#allocation4 + $0xd6c] sm:$0xf0] }
 0x156   :  { %v6532_v3 = vor.u32 %v7915_v51, %v6531_v50  ;;  %v6787_v50 = vld [vmem:[#allocation4 + $0xc40] sm:$0xf]  ;;  %v7979_v51 = vld [vmem:[#allocation4 + $0xc4c] sm:$0xf0] }
 0x157   :  { %v459_v16 = vpop.f32.mrf.mxu2  ;;  %v472_v17 = vpop.f32.mrf.mxu3 }
 0x158   :  { %3803 = vmatpush.bf16.msrb.mxu0 %v6260_v1  ;;  %3816 = vmatpush.bf16.msrb.mxu1 %v6388_v2  ;;  %v460_v21 = vadd.f32 %v459_v16, %v240_v60  ;;  %v473_v24 = vadd.f32 %v472_v17, %v241_v61  ;;  %v7947_v60 = vld [vmem:[#allocation4 + $0xb4c] sm:$0xf0]  ;;  %v6835_v61 = vld [vmem:[#allocation4 + $0xca0] sm:$0xf]  ;;  %v245_v16 = vperm.slane %v8500_v22, 3 }
 0x159   :  { %3825 = vmatpush.bf16.msrb.mxu2 %v6580_v7  ;;  %3838 = vmatpush.bf16.msrb.mxu3 %v6708_v8  ;;  %v6963_v1 = vld [vmem:[#allocation4 + $0xda0] sm:$0xf]  ;;  %v8023_v2 = vld [vmem:[#allocation4 + $0xdac] sm:$0xf0]  ;;  %v6660_v5 = vor.u32 %v7947_v60, %v6659_v59  ;;  %v6836_v8 = vor.u32 %v7991_v0, %v6835_v61 }
 0x15a   :  { %v586_v36 = vmax.f32 %v460_v21, 0.0  ;;  %v587_v39 = vmax.f32 %v473_v24, 0.0  ;;  %v539_v40 = vpop.f32.mrf.mxu0  ;;  %v552_v41 = vpop.f32.mrf.mxu1  ;;  %v7911_v7 = vld [vmem:[#allocation4 + $0xa2c] sm:$0xf0]  ;;  %v6964_v9 = vor.u32 %v8023_v2, %v6963_v1  ;;  %v6627_v24 = vld [vmem:[#allocation4 + $0xb00] sm:$0xf] }
 0x15b   :  { %v6516_v17 = vor.u32 %v7911_v7, %v6515_v6  ;;  %v7907_v21 = vld [vmem:[#allocation4 + $0xa0c] sm:$0xf0]  ;;  %v7251_v40 = vld [vmem:[#allocation4 + $0xfe0] sm:$0xf]  ;;  %v6628_v43 = vor.u32 %v7939_v27, %v6627_v24  ;;  %v247_v6 = vperm.slane %v8500_v22, 5  ;;  %v6788_v7 = vor.u32 %v7979_v51, %v6787_v50 }
 0x15c   :  { %v8524_v45 = vpack.c.bf16 %v586_v36, %v586_v36  ;;  %v8526_v46 = vpack.c.bf16 %v587_v39, %v587_v39  ;;  %3804 = vmatpush.bf16.msrb.mxu0 %v6244_v18  ;;  %3817 = vmatpush.bf16.msrb.mxu1 %v6372_v19  ;;  %v6644_v18 = vor.u32 %v7943_v11, %v6643_v10  ;;  %v6499_v19 = vld [vmem:[#allocation4 + $0xa00] sm:$0xf]  ;;  %v8063_v39 = vld [vmem:[#allocation4 + $0xeec] sm:$0xf0] }
 0x15d   :  { %3826 = vmatpush.bf16.msrb.mxu2 %v6564_v25  ;;  %3839 = vmatpush.bf16.msrb.mxu3 %v6692_v30  ;;  %v6820_v25 = vor.u32 %v7987_v20, %v6819_v12  ;;  %v6803_v30 = vld [vmem:[#allocation4 + $0xc60] sm:$0xf]  ;;  %v8095_v41 = vld [vmem:[#allocation4 + $0xfec] sm:$0xf0]  ;;  %v6500_v42 = vor.u32 %v7907_v21, %v6499_v19 }
 0x15e   :  { %3779 = vmatmul.bf16.vlgmr.msra.gmra.mxu2 %v8524_v45  ;;  %3792 = vmatmul.bf16.vlgmr.msra.gmra.mxu3 %v8526_v46  ;;  %v7252_v59 = vor.u32 %v8095_v41, %v7251_v40  ;;  %v6915_v60 = vld [vmem:[#allocation4 + $0xd40] sm:$0xf]  ;;  %v8011_v61 = vld [vmem:[#allocation4 + $0xd4c] sm:$0xf0]  ;;  %v7645_v40 = vld [vmem:[#allocation4 + $0x1e4] sm:$0xf] }
 0x15f   :  { %v461_v62 = vpop.f32.mrf.mxu2  ;;  %v474_v63 = vpop.f32.mrf.mxu3  ;;  %3805 = vmatmul.bf16.vlgmr.msrb.gmra.mxu0 %v8528_v54  ;;  %3818 = vmatmul.bf16.vlgmr.msrb.gmra.mxu1 %v8530_v55  ;;  %v8059_v1 = vld [vmem:[#allocation4 + $0xecc] sm:$0xf0]  ;;  %v7235_v2 = vld [vmem:[#allocation4 + $0xfc0] sm:$0xf]  ;;  %v5461_v41 = vld [vmem:[#allocation4 + $0x1f0] sm:$0xf0] }
 0x160   :  { %3849 = vmatpush.bf16.msra.mxu0 %v6868_v52  ;;  %3862 = vmatpush.bf16.msra.mxu1 %v6996_v31  ;;  %v7983_v52 = vld [vmem:[#allocation4 + $0xc6c] sm:$0xf0]  ;;  %v7107_v62 = vld [vmem:[#allocation4 + $0xec0] sm:$0xf] }
 0x161   :  { %3827 = vmatpush.bf16.msrb.mxu2 %v6548_v47  ;;  %3840 = vmatpush.bf16.msrb.mxu3 %v6676_v48  ;;  %v6804_v48 = vor.u32 %v7983_v52, %v6803_v30  ;;  %v7975_v10 = vld [vmem:[#allocation4 + $0xc2c] sm:$0xf0]  ;;  %v7108_v20 = vor.u32 %v8059_v1, %v7107_v62  ;;  %v6883_v30 = vld [vmem:[#allocation4 + $0xd00] sm:$0xf]  ;;  %v551_v52 = vadd.f32 %v8518_v4, %v247_v6  ;;  %v7609_v1 = vld [vmem:[#allocation4 + $0xc4] sm:$0xf] }
 0x162   :  { %v8087_v19 = vld [vmem:[#allocation4 + $0xfac] sm:$0xf0]  ;;  %v7059_v51 = vld [vmem:[#allocation4 + $0xe60] sm:$0xf] }
 0x163   :  { %v7971_v27 = vld [vmem:[#allocation4 + $0xc0c] sm:$0xf0] }
 0x164   :  { %3850 = vmatpush.bf16.msra.mxu0 %v6852_v49  ;;  %3863 = vmatpush.bf16.msra.mxu1 %v6980_v57  ;;  %v6932_v49 = vor.u32 %v8015_v33, %v6931_v32  ;;  %v7124_v57 = vor.u32 %v8063_v39, %v7123_v34  ;;  %v8003_v32 = vld [vmem:[#allocation4 + $0xd0c] sm:$0xf0]  ;;  %v7075_v33 = vld [vmem:[#allocation4 + $0xe80] sm:$0xf]  ;;  %v7613_v39 = vld [vmem:[#allocation4 + $0xe4] sm:$0xf] }
 0x165   :  { %3828 = vmatpush.bf16.msrb.mxu2 %v6532_v3  ;;  %3841 = vmatpush.bf16.msrb.mxu3 %v6660_v5  ;;  %v8091_v3 = vld [vmem:[#allocation4 + $0xfcc] sm:$0xf0]  ;;  %v246_v5 = vperm.slane %v8500_v22, 4 }
 0x166   :  { %v7236_v13 = vor.u32 %v8091_v3, %v7235_v2  ;;  %v8051_v34 = vld [vmem:[#allocation4 + $0xe8c] sm:$0xf0]  ;;  %v5317_v2 = vld [vmem:[#allocation4 + $0xd0] sm:$0xf0]  ;;  %v7641_v3 = vld [vmem:[#allocation4 + $0x1c4] sm:$0xf] }
 0x167   :  { %v511_v31 = vpop.f32.mrf.mxu2  ;;  %v524_v53 = vpop.f32.mrf.mxu3  ;;  %v538_v21 = vadd.f32 %v8516_v56, %v246_v5  ;;  %v5333_v56 = vld [vmem:[#allocation4 + $0xf0] sm:$0xf0]  ;;  %v8079_v62 = vld [vmem:[#allocation4 + $0xf6c] sm:$0xf0] }
 0x168   :  { %3851 = vmatpush.bf16.msra.mxu0 %v6836_v8  ;;  %3864 = vmatpush.bf16.msra.mxu1 %v6964_v9  ;;  %v512_v35 = vadd.f32 %v511_v31, %v244_v15  ;;  %v525_v36 = vadd.f32 %v524_v53, %v245_v16  ;;  %v6916_v8 = vor.u32 %v8011_v61, %v6915_v60  ;;  %v6771_v9 = vld [vmem:[#allocation4 + $0xc20] sm:$0xf]  ;;  %v8007_v15 = vld [vmem:[#allocation4 + $0xd2c] sm:$0xf0]  ;;  %v5445_v5 = vld [vmem:[#allocation4 + $0x1d0] sm:$0xf0] }
 0x169   :  { %3829 = vmatpush.bf16.msrb.mxu2 %v6516_v17  ;;  %3842 = vmatpush.bf16.msrb.mxu3 %v6644_v18  ;;  %v7091_v16 = vld [vmem:[#allocation4 + $0xea0] sm:$0xf]  ;;  %v8055_v17 = vld [vmem:[#allocation4 + $0xeac] sm:$0xf0]  ;;  %v6772_v24 = vor.u32 %v7975_v10, %v6771_v9  ;;  %v5464_v60 = vor.u32 %v7645_v40, %v5461_v41 }
 0x16a   :  { %v590_v44 = vmax.f32 %v512_v35, 0.0  ;;  %v591_v47 = vmax.f32 %v525_v36, 0.0  ;;  %v7219_v18 = vld [vmem:[#allocation4 + $0xfa0] sm:$0xf]  ;;  %v7092_v31 = vor.u32 %v8055_v17, %v7091_v16  ;;  %v8083_v36 = vld [vmem:[#allocation4 + $0xf8c] sm:$0xf0] }
 0x16b   :  { %v7220_v53 = vor.u32 %v8087_v19, %v7219_v18  ;;  %v7203_v35 = vld [vmem:[#allocation4 + $0xf80] sm:$0xf]  ;;  %v5301_v16 = vld [vmem:[#allocation4 + $0xb0] sm:$0xf0]  ;;  %v7637_v17 = vld [vmem:[#allocation4 + $0x1a4] sm:$0xf] }
 0x16c   :  { %3852 = vmatpush.bf16.msra.mxu0 %v6820_v25  ;;  %3865 = vmatpush.bf16.msra.mxu1 %v6948_v26  ;;  %v8538_v63 = vpack.c.bf16 %v590_v44, %v590_v44  ;;  %v8540_v0 = vpack.c.bf16 %v591_v47, %v591_v47  ;;  %v6900_v25 = vor.u32 %v8007_v15, %v6899_v14  ;;  %v6755_v26 = vld [vmem:[#allocation4 + $0xc00] sm:$0xf]  ;;  %v593_v47 = vmax.f32 %v551_v52, 0.0  ;;  %v8075_v14 = vld [vmem:[#allocation4 + $0xf4c] sm:$0xf0] }
 0x16d   :  { %3830 = vmatpush.bf16.msrb.mxu2 %v6500_v42  ;;  %3843 = vmatpush.bf16.msrb.mxu3 %v6628_v43  ;;  %v592_v42 = vmax.f32 %v538_v21, 0.0  ;;  %v6756_v43 = vor.u32 %v7971_v27, %v6755_v26  ;;  %v6884_v44 = vor.u32 %v8003_v32, %v6883_v30  ;;  %v7204_v50 = vor.u32 %v8083_v36, %v7203_v35  ;;  %v7187_v61 = vld [vmem:[#allocation4 + $0xf60] sm:$0xf]  ;;  %v7605_v15 = vld [vmem:[#allocation4 + $0xa4] sm:$0xf] }
 0x16e   :  { %v7188_v9 = vor.u32 %v8079_v62, %v7187_v61  ;;  %v7043_v10 = vld [vmem:[#allocation4 + $0xe40] sm:$0xf]  ;;  %v5429_v18 = vld [vmem:[#allocation4 + $0x1b0] sm:$0xf0]  ;;  %v248_v19 = vperm.slane %v8500_v22, 6  ;;  %v249_v21 = vperm.slane %v8500_v22, 7 }
 0x16f   :  { %v513_v11 = vpop.f32.mrf.mxu2  ;;  %v526_v12 = vpop.f32.mrf.mxu3  ;;  %v8552_v6 = vpack.c.bf16 %v592_v42, %v592_v42  ;;  %v7027_v30 = vld [vmem:[#allocation4 + $0xe20] sm:$0xf]  ;;  %v8039_v52 = vld [vmem:[#allocation4 + $0xe2c] sm:$0xf0]  ;;  %v5432_v32 = vor.u32 %v7637_v17, %v5429_v18  ;;  %v5285_v35 = vld [vmem:[#allocation4 + $0x90] sm:$0xf0] }
 0x170   :  { %3853 = vmatpush.bf16.msra.mxu0 %v6804_v48  ;;  %3866 = vmatpush.bf16.msra.mxu1 %v6932_v49  ;;  %v7076_v49 = vor.u32 %v8051_v34, %v7075_v33  ;;  %v8043_v11 = vld [vmem:[#allocation4 + $0xe4c] sm:$0xf0]  ;;  %v5320_v12 = vor.u32 %v7609_v1, %v5317_v2  ;;  %v7601_v34 = vld [vmem:[#allocation4 + $0x84] sm:$0xf]  ;;  %v7028_v22 = vor.u32 %v8039_v52, %v7027_v30  ;;  %v7011_v41 = vld [vmem:[#allocation4 + $0xe00] sm:$0xf] }
 0x171   :  { %3875 = vmatpush.bf16.msra.mxu2 %v7124_v57  ;;  %3888 = vmatpush.bf16.msra.mxu3 %v7252_v59  ;;  %v8047_v57 = vld [vmem:[#allocation4 + $0xe6c] sm:$0xf0]  ;;  %v5336_v59 = vor.u32 %v7613_v39, %v5333_v56  ;;  %v7044_v26 = vor.u32 %v8043_v11, %v7043_v10  ;;  %v7633_v36 = vld [vmem:[#allocation4 + $0x184] sm:$0xf]  ;;  %v5413_v39 = vld [vmem:[#allocation4 + $0x190] sm:$0xf0]  ;;  %v5288_v40 = vor.u32 %v7601_v34, %v5285_v35 }
 0x172   :  { %3831 = vmatmul.bf16.vlgmr.msrb.gmra.mxu2 %v8538_v63  ;;  %3844 = vmatmul.bf16.vlgmr.msrb.gmra.mxu3 %v8540_v0  ;;  %v8071_v33 = vld [vmem:[#allocation4 + $0xf2c] sm:$0xf0]  ;;  %v7677_v61 = vld [vmem:[#allocation4 + $0x2e4] sm:$0xf]  ;;  %v5589_v62 = vld [vmem:[#allocation4 + $0x2f0] sm:$0xf0] }
 0x173   :  { %v8035_v42 = vld [vmem:[#allocation4 + $0xe0c] sm:$0xf0]  ;;  %v7709_v1 = vld [vmem:[#allocation4 + $0x3e4] sm:$0xf]  ;;  %v5717_v2 = vld [vmem:[#allocation4 + $0x3f0] sm:$0xf0] }
 0x174   :  { %3854 = vmatpush.bf16.msra.mxu0 %v6788_v7  ;;  %3867 = vmatpush.bf16.msra.mxu1 %v6916_v8  ;;  %v8554_v7 = vpack.c.bf16 %v593_v47, %v593_v47  ;;  %v7060_v8 = vor.u32 %v8047_v57, %v7059_v51  ;;  %v7597_v51 = vld [vmem:[#allocation4 + $0x64] sm:$0xf]  ;;  %v5269_v57 = vld [vmem:[#allocation4 + $0x70] sm:$0xf0] }
 0x175   :  { %3876 = vmatpush.bf16.msra.mxu2 %v7108_v20  ;;  %3889 = vmatpush.bf16.msra.mxu3 %v7236_v13  ;;  %v5448_v20 = vor.u32 %v7641_v3, %v5445_v5  ;;  %v7171_v13 = vld [vmem:[#allocation4 + $0xf40] sm:$0xf]  ;;  %v7012_v3 = vor.u32 %v8035_v42, %v7011_v41  ;;  %v7593_v10 = vld [vmem:[#allocation4 + $0x44] sm:$0xf]  ;;  %v5253_v11 = vld [vmem:[#allocation4 + $0x50] sm:$0xf0] }
 0x176   :  { %v7172_v27 = vor.u32 %v8075_v14, %v7171_v13  ;;  %v7625_v13 = vld [vmem:[#allocation4 + $0x144] sm:$0xf]  ;;  %v5381_v14 = vld [vmem:[#allocation4 + $0x150] sm:$0xf0] }
 0x177   :  { %v8548_v4 = vpop.f32.mrf.mxu2  ;;  %v8550_v48 = vpop.f32.mrf.mxu3  ;;  %v7705_v17 = vld [vmem:[#allocation4 + $0x3c4] sm:$0xf]  ;;  %v5701_v18 = vld [vmem:[#allocation4 + $0x3d0] sm:$0xf0] }
 0x178   :  { %3855 = vmatpush.bf16.msra.mxu0 %v6772_v24  ;;  %3868 = vmatpush.bf16.msra.mxu1 %v6900_v25  ;;  %v577_v47 = vadd.f32 %v8550_v48, %v249_v21  ;;  %v5272_v48 = vor.u32 %v7597_v51, %v5269_v57  ;;  %v5704_v52 = vor.u32 %v7705_v17, %v5701_v18  ;;  %v7701_v34 = vld [vmem:[#allocation4 + $0x3a4] sm:$0xf]  ;;  %v5685_v35 = vld [vmem:[#allocation4 + $0x3b0] sm:$0xf0] }
 0x179   :  { %3877 = vmatpush.bf16.msra.mxu2 %v7092_v31  ;;  %3890 = vmatpush.bf16.msra.mxu3 %v7220_v53  ;;  %v7155_v31 = vld [vmem:[#allocation4 + $0xf20] sm:$0xf]  ;;  %v5304_v53 = vor.u32 %v7605_v15, %v5301_v16  ;;  %v7673_v15 = vld [vmem:[#allocation4 + $0x2c4] sm:$0xf]  ;;  %v5573_v16 = vld [vmem:[#allocation4 + $0x2d0] sm:$0xf0]  ;;  %v5688_v42 = vor.u32 %v7701_v34, %v5685_v35 }
 0x17a   :  { %v7156_v56 = vor.u32 %v8071_v33, %v7155_v31  ;;  %v5576_v30 = vor.u32 %v7673_v15, %v5573_v16  ;;  %v7621_v31 = vld [vmem:[#allocation4 + $0x124] sm:$0xf]  ;;  %v5557_v33 = vld [vmem:[#allocation4 + $0x2b0] sm:$0xf0] }
 0x17b   :  { %v7741_v51 = vld [vmem:[#allocation4 + $0x4e4] sm:$0xf]  ;;  %v5845_v57 = vld [vmem:[#allocation4 + $0x4f0] sm:$0xf0] }
 0x17c   :  { %3856 = vmatpush.bf16.msra.mxu0 %v6756_v43  ;;  %3869 = vmatpush.bf16.msra.mxu1 %v6884_v44  ;;  %v7139_v43 = vld [vmem:[#allocation4 + $0xf00] sm:$0xf]  ;;  %v564_v44 = vadd.f32 %v8548_v4, %v248_v19  ;;  %v595_v4 = vmax.f32 %v577_v47, 0.0  ;;  %v5256_v19 = vor.u32 %v7593_v10, %v5253_v11  ;;  %v5541_v47 = vld [vmem:[#allocation4 + $0x290] sm:$0xf0] }
 0x17d   :  { %3878 = vmatpush.bf16.msra.mxu2 %v7076_v49  ;;  %3891 = vmatpush.bf16.msra.mxu3 %v7204_v50  ;;  %v5416_v49 = vor.u32 %v7633_v36, %v5413_v39  ;;  %v8067_v50 = vld [vmem:[#allocation4 + $0xf0c] sm:$0xf0]  ;;  %v7737_v10 = vld [vmem:[#allocation4 + $0x4c4] sm:$0xf]  ;;  %v5829_v11 = vld [vmem:[#allocation4 + $0x4d0] sm:$0xf0] }
 0x17e   :  { %v7140_v5 = vor.u32 %v8067_v50, %v7139_v43  ;;  %v5349_v43 = vld [vmem:[#allocation4 + $0x110] sm:$0xf0]  ;;  %v7657_v15 = vld [vmem:[#allocation4 + $0x244] sm:$0xf]  ;;  %v5832_v17 = vor.u32 %v7737_v10, %v5829_v11 }
 0x17f   :  { %3857 = vmatmul.bf16.vlgmr.msra.gmra.mxu0 %v8552_v6  ;;  %3870 = vmatmul.bf16.vlgmr.msra.gmra.mxu1 %v8554_v7  ;;  %v565_v24 = vpop.f32.mrf.mxu2  ;;  %v578_v25 = vpop.f32.mrf.mxu3  ;;  %v5669_v50 = vld [vmem:[#allocation4 + $0x390] sm:$0xf0]  ;;  %v7721_v10 = vld [vmem:[#allocation4 + $0x444] sm:$0xf] }
 0x180   :  { %3901 = vmatpush.bf16.msrb.mxu0 %v5336_v59  ;;  %3914 = vmatpush.bf16.msrb.mxu1 %v5464_v60  ;;  %v7629_v59 = vld [vmem:[#allocation4 + $0x164] sm:$0xf]  ;;  %v5397_v60 = vld [vmem:[#allocation4 + $0x170] sm:$0xf0]  ;;  %v8564_v24 = vpack.c.bf16 %v595_v4, %v595_v4  ;;  %v5384_v25 = vor.u32 %v7625_v13, %v5381_v14 }
 0x181   :  { %3879 = vmatpush.bf16.msra.mxu2 %v7060_v8  ;;  %3892 = vmatpush.bf16.msra.mxu3 %v7188_v9  ;;  %v594_v8 = vmax.f32 %v564_v44, 0.0  ;;  %v5400_v9 = vor.u32 %v7629_v59, %v5397_v60  ;;  %v7665_v44 = vld [vmem:[#allocation4 + $0x284] sm:$0xf]  ;;  %v5973_v60 = vld [vmem:[#allocation4 + $0x5f0] sm:$0xf0] }
 0x182   :  { %v7773_v59 = vld [vmem:[#allocation4 + $0x5e4] sm:$0xf]  ;;  %v5509_v16 = vld [vmem:[#allocation4 + $0x250] sm:$0xf0] }
 0x183   :  { %v8562_v21 = vpack.c.bf16 %v594_v8, %v594_v8  ;;  %v5848_v8 = vor.u32 %v7741_v51, %v5845_v57  ;;  %v5976_v4 = vor.u32 %v7773_v59, %v5973_v60  ;;  %v5605_v57 = vld [vmem:[#allocation4 + $0x310] sm:$0xf0]  ;;  %v7725_v59 = vld [vmem:[#allocation4 + $0x464] sm:$0xf] }
 0x184   :  { %3902 = vmatpush.bf16.msrb.mxu0 %v5320_v12  ;;  %3915 = vmatpush.bf16.msrb.mxu1 %v5448_v20  ;;  %v5592_v12 = vor.u32 %v7677_v61, %v5589_v62  ;;  %v5720_v20 = vor.u32 %v7709_v1, %v5717_v2  ;;  %v5544_v1 = vor.u32 %v7665_v44, %v5541_v47  ;;  %v7649_v44 = vld [vmem:[#allocation4 + $0x204] sm:$0xf]  ;;  %v5477_v47 = vld [vmem:[#allocation4 + $0x210] sm:$0xf0] }
 0x185   :  { %3880 = vmatpush.bf16.msra.mxu2 %v7044_v26  ;;  %3893 = vmatpush.bf16.msra.mxu3 %v7172_v27  ;;  %v7589_v26 = vld [vmem:[#allocation4 + $0x24] sm:$0xf]  ;;  %v5237_v27 = vld [vmem:[#allocation4 + $0x30] sm:$0xf0] }
 0x186   :  { %v5240_v36 = vor.u32 %v7589_v26, %v5237_v27  ;;  %v7733_v26 = vld [vmem:[#allocation4 + $0x4a4] sm:$0xf]  ;;  %v5813_v27 = vld [vmem:[#allocation4 + $0x4b0] sm:$0xf0] }
 0x187   :  { %v5816_v34 = vor.u32 %v7733_v26, %v5813_v27  ;;  %v5781_v60 = vld [vmem:[#allocation4 + $0x470] sm:$0xf0]  ;;  %v7717_v26 = vld [vmem:[#allocation4 + $0x424] sm:$0xf] }
 0x188   :  { %3903 = vmatpush.bf16.msrb.mxu0 %v5304_v53  ;;  %3916 = vmatpush.bf16.msrb.mxu1 %v5432_v32  ;;  %v5365_v53 = vld [vmem:[#allocation4 + $0x130] sm:$0xf0]  ;;  %v7669_v32 = vld [vmem:[#allocation4 + $0x2a4] sm:$0xf] }
 0x189   :  { %3881 = vmatpush.bf16.msra.mxu2 %v7028_v22  ;;  %3894 = vmatpush.bf16.msra.mxu3 %v7156_v56  ;;  %v5368_v39 = vor.u32 %v7621_v31, %v5365_v53  ;;  %v7585_v22 = vld [vmem:[#allocation4 + $0x4] sm:$0xf]  ;;  %v5221_v56 = vld [vmem:[#allocation4 + $0x10] sm:$0xf0]  ;;  %v5560_v41 = vor.u32 %v7669_v32, %v5557_v33  ;;  %v5512_v31 = vor.u32 %v7657_v15, %v5509_v16 }
 0x18a   :  { %v5224_v61 = vor.u32 %v7585_v22, %v5221_v56  ;;  %v7653_v32 = vld [vmem:[#allocation4 + $0x224] sm:$0xf]  ;;  %v5493_v33 = vld [vmem:[#allocation4 + $0x230] sm:$0xf0] }
 0x18b   :  { %v7729_v22 = vld [vmem:[#allocation4 + $0x484] sm:$0xf]  ;;  %v5797_v56 = vld [vmem:[#allocation4 + $0x490] sm:$0xf0] }
 0x18c   :  { %3904 = vmatpush.bf16.msrb.mxu0 %v5288_v40  ;;  %3917 = vmatpush.bf16.msrb.mxu1 %v5416_v49  ;;  %v7617_v40 = vld [vmem:[#allocation4 + $0x104] sm:$0xf]  ;;  %v5765_v11 = vld [vmem:[#allocation4 + $0x450] sm:$0xf0] }
 0x18d   :  { %3882 = vmatpush.bf16.msra.mxu2 %v7012_v3  ;;  %3895 = vmatpush.bf16.msra.mxu3 %v7140_v5  ;;  %v7697_v49 = vld [vmem:[#allocation4 + $0x384] sm:$0xf]  ;;  %v5352_v62 = vor.u32 %v7617_v40, %v5349_v43  ;;  %v5525_v5 = vld [vmem:[#allocation4 + $0x270] sm:$0xf0] }
 0x18e   :  { %v5672_v2 = vor.u32 %v7697_v49, %v5669_v50  ;;  %v7661_v3 = vld [vmem:[#allocation4 + $0x264] sm:$0xf]  ;;  %v5800_v50 = vor.u32 %v7729_v22, %v5797_v56  ;;  %v6085_v16 = vld [vmem:[#allocation4 + $0x6d0] sm:$0xf0] }
 0x18f   :  { %v5528_v13 = vor.u32 %v7661_v3, %v5525_v5  ;;  %v7761_v40 = vld [vmem:[#allocation4 + $0x584] sm:$0xf]  ;;  %v6229_v5 = vld [vmem:[#allocation4 + $0x7f0] sm:$0xf0] }
 0x190   :  { %3905 = vmatpush.bf16.msrb.mxu0 %v5272_v48  ;;  %3918 = vmatpush.bf16.msrb.mxu1 %v5400_v9  ;;  %v7693_v48 = vld [vmem:[#allocation4 + $0x364] sm:$0xf]  ;;  %v5653_v9 = vld [vmem:[#allocation4 + $0x370] sm:$0xf0] }
 0x191   :  { %3927 = vmatpush.bf16.msrb.mxu2 %v5592_v12  ;;  %3940 = vmatpush.bf16.msrb.mxu3 %v5720_v20  ;;  %v7769_v12 = vld [vmem:[#allocation4 + $0x5c4] sm:$0xf]  ;;  %v5957_v20 = vld [vmem:[#allocation4 + $0x5d0] sm:$0xf0]  ;;  %v5656_v14 = vor.u32 %v7693_v48, %v5653_v9  ;;  %v5784_v48 = vor.u32 %v7725_v59, %v5781_v60 }
 0x192   :  { %3883 = vmatmul.bf16.vlgmr.msra.gmra.mxu2 %v8562_v21  ;;  %3896 = vmatmul.bf16.vlgmr.msra.gmra.mxu3 %v8564_v24  ;;  %v5960_v18 = vor.u32 %v7769_v12, %v5957_v20  ;;  %v7681_v49 = vld [vmem:[#allocation4 + $0x304] sm:$0xf]  ;;  %v5749_v27 = vld [vmem:[#allocation4 + $0x430] sm:$0xf0] }
 0x193   :  { %v7837_v3 = vld [vmem:[#allocation4 + $0x7e4] sm:$0xf]  ;;  %v5733_v56 = vld [vmem:[#allocation4 + $0x410] sm:$0xf0] }
 0x194   :  { %3906 = vmatpush.bf16.msrb.mxu0 %v5256_v19  ;;  %3919 = vmatpush.bf16.msrb.mxu1 %v5384_v25  ;;  %v7689_v19 = vld [vmem:[#allocation4 + $0x344] sm:$0xf]  ;;  %v5637_v25 = vld [vmem:[#allocation4 + $0x350] sm:$0xf0]  ;;  %v6232_v20 = vor.u32 %v7837_v3, %v6229_v5 }
 0x195   :  { %3928 = vmatpush.bf16.msrb.mxu2 %v5576_v30  ;;  %3941 = vmatpush.bf16.msrb.mxu3 %v5704_v52  ;;  %v7765_v30 = vld [vmem:[#allocation4 + $0x5a4] sm:$0xf]  ;;  %v5941_v52 = vld [vmem:[#allocation4 + $0x5b0] sm:$0xf0]  ;;  %v5640_v53 = vor.u32 %v7689_v19, %v5637_v25  ;;  %v5768_v19 = vor.u32 %v7721_v10, %v5765_v11 }
 0x196   :  { %v5944_v35 = vor.u32 %v7765_v30, %v5941_v52  ;;  %v7801_v15 = vld [vmem:[#allocation4 + $0x6c4] sm:$0xf]  ;;  %v6485_v60 = vld [vmem:[#allocation4 + $0x9f0] sm:$0xf0] }
 0x197   :  { %v6088_v30 = vor.u32 %v7801_v15, %v6085_v16  ;;  %v7713_v22 = vld [vmem:[#allocation4 + $0x404] sm:$0xf]  ;;  %v6037_v5 = vld [vmem:[#allocation4 + $0x670] sm:$0xf0] }
 0x198   :  { %3907 = vmatpush.bf16.msrb.mxu0 %v5240_v36  ;;  %3920 = vmatpush.bf16.msrb.mxu1 %v5368_v39  ;;  %v7685_v36 = vld [vmem:[#allocation4 + $0x324] sm:$0xf]  ;;  %v5621_v39 = vld [vmem:[#allocation4 + $0x330] sm:$0xf0] }
 0x199   :  { %3929 = vmatpush.bf16.msrb.mxu2 %v5560_v41  ;;  %3942 = vmatpush.bf16.msrb.mxu3 %v5688_v42  ;;  %v5925_v41 = vld [vmem:[#allocation4 + $0x590] sm:$0xf0]  ;;  %v5496_v42 = vor.u32 %v7653_v32, %v5493_v33  ;;  %v5624_v43 = vor.u32 %v7685_v36, %v5621_v39  ;;  %v7797_v32 = vld [vmem:[#allocation4 + $0x6a4] sm:$0xf]  ;;  %v5752_v36 = vor.u32 %v7717_v26, %v5749_v27 }
 0x19a   :  { %v5928_v51 = vor.u32 %v7761_v40, %v5925_v41  ;;  %v6069_v33 = vld [vmem:[#allocation4 + $0x6b0] sm:$0xf0]  ;;  %v7745_v40 = vld [vmem:[#allocation4 + $0x504] sm:$0xf] }
 0x19b   :  { %v6072_v41 = vor.u32 %v7797_v32, %v6069_v33  ;;  %v7901_v59 = vld [vmem:[#allocation4 + $0x9e4] sm:$0xf]  ;;  %v6341_v11 = vld [vmem:[#allocation4 + $0x8d0] sm:$0xf0] }
 0x19c   :  { %3908 = vmatpush.bf16.msrb.mxu0 %v5224_v61  ;;  %3921 = vmatpush.bf16.msrb.mxu1 %v5352_v62  ;;  %v7757_v61 = vld [vmem:[#allocation4 + $0x564] sm:$0xf]  ;;  %v5909_v62 = vld [vmem:[#allocation4 + $0x570] sm:$0xf0] }
 0x19d   :  { %3930 = vmatpush.bf16.msrb.mxu2 %v5544_v1  ;;  %3943 = vmatpush.bf16.msrb.mxu3 %v5672_v2  ;;  %v7805_v1 = vld [vmem:[#allocation4 + $0x6e4] sm:$0xf]  ;;  %v6101_v2 = vld [vmem:[#allocation4 + $0x6f0] sm:$0xf0]  ;;  %v5912_v9 = vor.u32 %v7757_v61, %v5909_v62  ;;  %v5736_v61 = vor.u32 %v7713_v22, %v5733_v56 }
 0x19e   :  { %v6104_v12 = vor.u32 %v7805_v1, %v6101_v2  ;;  %v7789_v3 = vld [vmem:[#allocation4 + $0x664] sm:$0xf]  ;;  %v6149_v26 = vld [vmem:[#allocation4 + $0x750] sm:$0xf0] }
 0x19f   :  { %3909 = vmatmul.bf16.vlgmr.msrb.gmra.mxu0 %v8486_v37  ;;  %3922 = vmatmul.bf16.vlgmr.msrb.gmra.mxu1 %v8488_v38  ;;  %v7865_v10 = vld [vmem:[#allocation4 + $0x8c4] sm:$0xf] }
 0x1a0   :  { %3953 = vmatpush.bf16.msra.mxu0 %v5848_v8  ;;  %3966 = vmatpush.bf16.msra.mxu1 %v5976_v4  ;;  %v5480_v8 = vor.u32 %v7649_v44, %v5477_v47  ;;  %v5608_v4 = vor.u32 %v7681_v49, %v5605_v57  ;;  %v7793_v44 = vld [vmem:[#allocation4 + $0x684] sm:$0xf]  ;;  %v6053_v47 = vld [vmem:[#allocation4 + $0x690] sm:$0xf0] }
 0x1a1   :  { %3931 = vmatpush.bf16.msrb.mxu2 %v5528_v13  ;;  %3944 = vmatpush.bf16.msrb.mxu3 %v5656_v14  ;;  %v7753_v13 = vld [vmem:[#allocation4 + $0x544] sm:$0xf]  ;;  %v5893_v14 = vld [vmem:[#allocation4 + $0x550] sm:$0xf0]  ;;  %v6056_v1 = vor.u32 %v7793_v44, %v6053_v47 }
 0x1a2   :  { %v5896_v25 = vor.u32 %v7753_v13, %v5893_v14  ;;  %v7825_v49 = vld [vmem:[#allocation4 + $0x784] sm:$0xf]  ;;  %v6357_v57 = vld [vmem:[#allocation4 + $0x8f0] sm:$0xf0]  ;;  %v8572_v13 = vld [vmem:[#allocation9 + $0x10] sm:$0xf]  ;;  %v6040_v14 = vor.u32 %v7789_v3, %v6037_v5 }
 0x1a3   :  { %v7785_v16 = vld [vmem:[#allocation4 + $0x644] sm:$0xf]  ;;  %v6309_v44 = vld [vmem:[#allocation4 + $0x890] sm:$0xf0] }
 0x1a4   :  { %3954 = vmatpush.bf16.msra.mxu0 %v5832_v17  ;;  %3967 = vmatpush.bf16.msra.mxu1 %v5960_v18  ;;  %v7833_v17 = vld [vmem:[#allocation4 + $0x7c4] sm:$0xf]  ;;  %v6213_v18 = vld [vmem:[#allocation4 + $0x7d0] sm:$0xf0] }
 0x1a5   :  { %3932 = vmatpush.bf16.msrb.mxu2 %v5512_v31  ;;  %3945 = vmatpush.bf16.msrb.mxu3 %v5640_v53  ;;  %v6216_v52 = vor.u32 %v7833_v17, %v6213_v18  ;;  %v7749_v31 = vld [vmem:[#allocation4 + $0x524] sm:$0xf]  ;;  %v5877_v53 = vld [vmem:[#allocation4 + $0x530] sm:$0xf0] }
 0x1a6   :  { %v5880_v39 = vor.u32 %v7749_v31, %v5877_v53  ;;  %v6021_v17 = vld [vmem:[#allocation4 + $0x650] sm:$0xf0]  ;;  %v7817_v18 = vld [vmem:[#allocation4 + $0x744] sm:$0xf] }
 0x1a7   :  { %v7861_v27 = vld [vmem:[#allocation4 + $0x8a4] sm:$0xf]  ;;  %v6453_v53 = vld [vmem:[#allocation4 + $0x9b0] sm:$0xf0]  ;;  %v6024_v32 = vor.u32 %v7785_v16, %v6021_v17  ;;  %v6152_v33 = vor.u32 %v7817_v18, %v6149_v26 }
 0x1a8   :  { %3955 = vmatpush.bf16.msra.mxu0 %v5816_v34  ;;  %3968 = vmatpush.bf16.msra.mxu1 %v5944_v35  ;;  %v7829_v34 = vld [vmem:[#allocation4 + $0x7a4] sm:$0xf]  ;;  %v6197_v35 = vld [vmem:[#allocation4 + $0x7b0] sm:$0xf0] }
 0x1a9   :  { %3933 = vmatpush.bf16.msrb.mxu2 %v5496_v42  ;;  %3946 = vmatpush.bf16.msrb.mxu3 %v5624_v43  ;;  %v6200_v42 = vor.u32 %v7829_v34, %v6197_v35  ;;  %v5861_v43 = vld [vmem:[#allocation4 + $0x510] sm:$0xf0]  ;;  %v7893_v31 = vld [vmem:[#allocation4 + $0x9a4] sm:$0xf] }
 0x1aa   :  { %v5864_v62 = vor.u32 %v7745_v40, %v5861_v43  ;;  %v6456_v56 = vor.u32 %v7893_v31, %v6453_v53  ;;  %v7857_v43 = vld [vmem:[#allocation4 + $0x884] sm:$0xf]  ;;  %v6293_v5 = vld [vmem:[#allocation4 + $0x870] sm:$0xf0] }
 0x1ab   :  { %v7889_v47 = vld [vmem:[#allocation4 + $0x984] sm:$0xf]  ;;  %v6597_v31 = vld [vmem:[#allocation4 + $0xad0] sm:$0xf0] }
 0x1ac   :  { %3956 = vmatpush.bf16.msra.mxu0 %v5800_v50  ;;  %3969 = vmatpush.bf16.msra.mxu1 %v5928_v51  ;;  %v6181_v50 = vld [vmem:[#allocation4 + $0x790] sm:$0xf0]  ;;  %v7869_v51 = vld [vmem:[#allocation4 + $0x8e4] sm:$0xf] }
 0x1ad   :  { %3934 = vmatpush.bf16.msrb.mxu2 %v5480_v8  ;;  %3947 = vmatpush.bf16.msrb.mxu3 %v5608_v4  ;;  %v6184_v2 = vor.u32 %v7825_v49, %v6181_v50  ;;  %v7821_v8 = vld [vmem:[#allocation4 + $0x764] sm:$0xf]  ;;  %v6360_v4 = vor.u32 %v7869_v51, %v6357_v57  ;;  %v6437_v49 = vld [vmem:[#allocation4 + $0x990] sm:$0xf0] }
 0x1ae   :  { %v7853_v3 = vld [vmem:[#allocation4 + $0x864] sm:$0xf] }
 0x1af   :  { %v6296_v16 = vor.u32 %v7853_v3, %v6293_v5  ;;  %v7849_v18 = vld [vmem:[#allocation4 + $0x844] sm:$0xf]  ;;  %v6565_v5 = vld [vmem:[#allocation4 + $0xa90] sm:$0xf0] }
 0x1b0   :  { %3957 = vmatpush.bf16.msra.mxu0 %v5784_v48  ;;  %3970 = vmatpush.bf16.msra.mxu1 %v5912_v9  ;;  %v6488_v48 = vor.u32 %v7901_v59, %v6485_v60  ;;  %v6165_v9 = vld [vmem:[#allocation4 + $0x770] sm:$0xf0]  ;;  %v7777_v59 = vld [vmem:[#allocation4 + $0x604] sm:$0xf] }
 0x1b1   :  { %3979 = vmatpush.bf16.msra.mxu2 %v6104_v12  ;;  %3992 = vmatpush.bf16.msra.mxu3 %v6232_v20  ;;  %v7897_v12 = vld [vmem:[#allocation4 + $0x9c4] sm:$0xf]  ;;  %v6469_v20 = vld [vmem:[#allocation4 + $0x9d0] sm:$0xf0]  ;;  %v6168_v15 = vor.u32 %v7821_v8, %v6165_v9 }
 0x1b2   :  { %3935 = vmatmul.bf16.vlgmr.msrb.gmra.mxu2 %v8502_v23  ;;  %3948 = vmatmul.bf16.vlgmr.msrb.gmra.mxu3 %v8504_v58  ;;  %v5989_v60 = vld [vmem:[#allocation4 + $0x610] sm:$0xf0]  ;;  %v7885_v8 = vld [vmem:[#allocation4 + $0x964] sm:$0xf] }
 0x1b3   :  { %v6613_v9 = vld [vmem:[#allocation4 + $0xaf0] sm:$0xf0]  ;;  %v7961_v53 = vld [vmem:[#allocation4 + $0xbc4] sm:$0xf] }
 0x1b4   :  { %3958 = vmatpush.bf16.msra.mxu0 %v5768_v19  ;;  %3971 = vmatpush.bf16.msra.mxu1 %v5896_v25  ;;  %v6344_v19 = vor.u32 %v7865_v10, %v6341_v11  ;;  %v6472_v25 = vor.u32 %v7897_v12, %v6469_v20  ;;  %v7965_v10 = vld [vmem:[#allocation4 + $0xbe4] sm:$0xf]  ;;  %v6741_v11 = vld [vmem:[#allocation4 + $0xbf0] sm:$0xf0]  ;;  %v5992_v12 = vor.u32 %v7777_v59, %v5989_v60 }
 0x1b5   :  { %3980 = vmatpush.bf16.msra.mxu2 %v6088_v30  ;;  %3993 = vmatpush.bf16.msra.mxu3 %v6216_v52  ;;  %v1125_v30 = vperm.slane %v8572_v13, 0  ;;  %v6325_v52 = vld [vmem:[#allocation4 + $0x8b0] sm:$0xf0]  ;;  %v6744_v26 = vor.u32 %v7965_v10, %v6741_v11  ;;  %v7841_v59 = vld [vmem:[#allocation4 + $0x804] sm:$0xf] }
 0x1b6   :  { %v6328_v22 = vor.u32 %v7861_v27, %v6325_v52  ;;  %v7881_v27 = vld [vmem:[#allocation4 + $0x944] sm:$0xf]  ;;  %v6245_v60 = vld [vmem:[#allocation4 + $0x810] sm:$0xf0] }
 0x1b7   :  { %v7929_v52 = vld [vmem:[#allocation4 + $0xac4] sm:$0xf]  ;;  %v6997_v11 = vld [vmem:[#allocation4 + $0xdf0] sm:$0xf0] }
 0x1b8   :  { %3959 = vmatpush.bf16.msra.mxu0 %v5752_v36  ;;  %3972 = vmatpush.bf16.msra.mxu1 %v5880_v39  ;;  %v7781_v36 = vld [vmem:[#allocation4 + $0x624] sm:$0xf]  ;;  %v6005_v39 = vld [vmem:[#allocation4 + $0x630] sm:$0xf0] }
 0x1b9   :  { %3981 = vmatpush.bf16.msra.mxu2 %v6072_v41  ;;  %3994 = vmatpush.bf16.msra.mxu3 %v6200_v42  ;;  %v7813_v41 = vld [vmem:[#allocation4 + $0x724] sm:$0xf]  ;;  %v6133_v42 = vld [vmem:[#allocation4 + $0x730] sm:$0xf0]  ;;  %v6008_v51 = vor.u32 %v7781_v36, %v6005_v39  ;;  %v6600_v39 = vor.u32 %v7929_v52, %v6597_v31 }
 0x1ba   :  { %v6136_v57 = vor.u32 %v7813_v41, %v6133_v42  ;;  %v6261_v36 = vld [vmem:[#allocation4 + $0x830] sm:$0xf0]  ;;  %v7925_v41 = vld [vmem:[#allocation4 + $0xaa4] sm:$0xf] }
 0x1bb   :  { %v3702_v34 = vpop.f32.mrf.mxu0  ;;  %v3715_v35 = vpop.f32.mrf.mxu1  ;;  %v6581_v42 = vld [vmem:[#allocation4 + $0xab0] sm:$0xf0]  ;;  %v7921_v3 = vld [vmem:[#allocation4 + $0xa84] sm:$0xf] }
 0x1bc   :  { %3960 = vmatpush.bf16.msra.mxu0 %v5736_v61  ;;  %3973 = vmatpush.bf16.msra.mxu1 %v5864_v62  ;;  %v3703_v40 = vadd.f32 %v3702_v34, %v1125_v30  ;;  %v7809_v61 = vld [vmem:[#allocation4 + $0x704] sm:$0xf]  ;;  %v6312_v62 = vor.u32 %v7857_v43, %v6309_v44  ;;  %v6405_v30 = vld [vmem:[#allocation4 + $0x950] sm:$0xf0] }
 0x1bd   :  { %3982 = vmatpush.bf16.msra.mxu2 %v6056_v1  ;;  %3995 = vmatpush.bf16.msra.mxu3 %v6184_v2  ;;  %v6440_v1 = vor.u32 %v7889_v47, %v6437_v49  ;;  %v6117_v2 = vld [vmem:[#allocation4 + $0x710] sm:$0xf0]  ;;  %v6408_v34 = vor.u32 %v7881_v27, %v6405_v30  ;;  %v7957_v43 = vld [vmem:[#allocation4 + $0xba4] sm:$0xf] }
 0x1be   :  { %v8577_v50 = vadd.f32 %v3715_v35, %v3703_v40  ;;  %v6120_v20 = vor.u32 %v7809_v61, %v6117_v2  ;;  %v7845_v35 = vld [vmem:[#allocation4 + $0x824] sm:$0xf]  ;;  %v6389_v40 = vld [vmem:[#allocation4 + $0x930] sm:$0xf0] }
 0x1bf   :  { %3961 = vmatmul.bf16.vlgmr.msra.gmra.mxu0 %v8506_v28  ;;  %3974 = vmatmul.bf16.vlgmr.msra.gmra.mxu1 %v8508_v29  ;;  %v6709_v44 = vld [vmem:[#allocation4 + $0xbb0] sm:$0xf0]  ;;  %v6264_v47 = vor.u32 %v7845_v35, %v6261_v36  ;;  %v7873_v61 = vld [vmem:[#allocation4 + $0x904] sm:$0xf] }
 0x1c0   :  { %4005 = vmatpush.bf16.msrb.mxu0 %v6360_v4  ;;  %4018 = vmatpush.bf16.msrb.mxu1 %v6488_v48  ;;  %v6421_v4 = vld [vmem:[#allocation4 + $0x970] sm:$0xf0]  ;;  %v7933_v48 = vld [vmem:[#allocation4 + $0xae4] sm:$0xf] }
 0x1c1   :  { %3983 = vmatpush.bf16.msra.mxu2 %v6040_v14  ;;  %3996 = vmatpush.bf16.msra.mxu3 %v6168_v15  ;;  %v6424_v17 = vor.u32 %v7885_v8, %v6421_v4  ;;  %v6373_v2 = vld [vmem:[#allocation4 + $0x910] sm:$0xf0]  ;;  %v7953_v8 = vld [vmem:[#allocation4 + $0xb84] sm:$0xf] }
 0x1c2   :  { %v6693_v4 = vld [vmem:[#allocation4 + $0xb90] sm:$0xf0]  ;;  %v8029_v10 = vld [vmem:[#allocation4 + $0xde4] sm:$0xf] }
 0x1c3   :  { %v3704_v14 = vpop.f32.mrf.mxu0  ;;  %v3717_v15 = vpop.f32.mrf.mxu1  ;;  %v7949_v30 = vld [vmem:[#allocation4 + $0xb64] sm:$0xf]  ;;  %v6677_v52 = vld [vmem:[#allocation4 + $0xb70] sm:$0xf0] }
 0x1c4   :  { %4006 = vmatpush.bf16.msrb.mxu0 %v6344_v19  ;;  %4019 = vmatpush.bf16.msrb.mxu1 %v6472_v25  ;;  %v6277_v19 = vld [vmem:[#allocation4 + $0x850] sm:$0xf0]  ;;  %v6616_v25 = vor.u32 %v7933_v48, %v6613_v9  ;;  %v7997_v48 = vld [vmem:[#allocation4 + $0xce4] sm:$0xf]  ;;  %v6568_v14 = vor.u32 %v7921_v3, %v6565_v5  ;;  %v6696_v15 = vor.u32 %v7953_v8, %v6693_v4 }
 0x1c5   :  { %3984 = vmatpush.bf16.msra.mxu2 %v6024_v32  ;;  %3997 = vmatpush.bf16.msra.mxu3 %v6152_v33  ;;  %v6725_v32 = vld [vmem:[#allocation4 + $0xbd0] sm:$0xf0]  ;;  %v6280_v33 = vor.u32 %v7849_v18, %v6277_v19  ;;  %v7917_v18 = vld [vmem:[#allocation4 + $0xa64] sm:$0xf] }
 0x1c6   :  { %v6869_v9 = vld [vmem:[#allocation4 + $0xcf0] sm:$0xf0]  ;;  %v7993_v31 = vld [vmem:[#allocation4 + $0xcc4] sm:$0xf] }
 0x1c7   :  { %v6549_v19 = vld [vmem:[#allocation4 + $0xa70] sm:$0xf0] }
 0x1c8   :  { %4007 = vmatpush.bf16.msrb.mxu0 %v6328_v22  ;;  %4020 = vmatpush.bf16.msrb.mxu1 %v6456_v56  ;;  %v6728_v22 = vor.u32 %v7961_v53, %v6725_v32  ;;  %v7877_v56 = vld [vmem:[#allocation4 + $0x924] sm:$0xf]  ;;  %v6853_v53 = vld [vmem:[#allocation4 + $0xcd0] sm:$0xf0] }
 0x1c9   :  { %3985 = vmatpush.bf16.msra.mxu2 %v6008_v51  ;;  %3998 = vmatpush.bf16.msra.mxu3 %v6136_v57  ;;  %v6392_v49 = vor.u32 %v7877_v56, %v6389_v40  ;;  %v8025_v32 = vld [vmem:[#allocation4 + $0xdc4] sm:$0xf]  ;;  %v6533_v40 = vld [vmem:[#allocation4 + $0xa50] sm:$0xf0] }
 0x1ca   :  { %v7913_v56 = vld [vmem:[#allocation4 + $0xa44] sm:$0xf]  ;;  %v6517_v5 = vld [vmem:[#allocation4 + $0xa30] sm:$0xf0] }
 0x1cc   :  { %4008 = vmatpush.bf16.msrb.mxu0 %v6312_v62  ;;  %4021 = vmatpush.bf16.msrb.mxu1 %v6440_v1  ;;  %v3754_v51 = vpop.f32.mrf.mxu0  ;;  %v3767_v57 = vpop.f32.mrf.mxu1  ;;  %v6584_v62 = vor.u32 %v7925_v41, %v6581_v42  ;;  %v6712_v1 = vor.u32 %v7957_v43, %v6709_v44  ;;  %v6856_v41 = vor.u32 %v7993_v31, %v6853_v53  ;;  %v7945_v43 = vld [vmem:[#allocation4 + $0xb44] sm:$0xf]  ;;  %v6661_v44 = vld [vmem:[#allocation4 + $0xb50] sm:$0xf0] }
 0x1cd   :  { %3986 = vmatpush.bf16.msra.mxu2 %v5992_v12  ;;  %3999 = vmatpush.bf16.msra.mxu3 %v6120_v20  ;;  %v6248_v12 = vor.u32 %v7841_v59, %v6245_v60  ;;  %v6376_v20 = vor.u32 %v7873_v61, %v6373_v2  ;;  %v8021_v59 = vld [vmem:[#allocation4 + $0xda4] sm:$0xf]  ;;  %v6965_v60 = vld [vmem:[#allocation4 + $0xdb0] sm:$0xf0] }
 0x1ce   :  { %v6968_v4 = vor.u32 %v8021_v59, %v6965_v60  ;;  %v8013_v31 = vld [vmem:[#allocation4 + $0xd64] sm:$0xf]  ;;  %v6933_v53 = vld [vmem:[#allocation4 + $0xd70] sm:$0xf0] }
 0x1cf   :  { %v6917_v59 = vld [vmem:[#allocation4 + $0xd50] sm:$0xf0]  ;;  %v8057_v60 = vld [vmem:[#allocation4 + $0xec4] sm:$0xf] }
 0x1d0   :  { %4009 = vmatpush.bf16.msrb.mxu0 %v6296_v16  ;;  %4022 = vmatpush.bf16.msrb.mxu1 %v6424_v17 }
 0x1d1   :  { %4031 = vmatpush.bf16.msrb.mxu2 %v6616_v25  ;;  %4044 = vmatpush.bf16.msrb.mxu3 %v6744_v26  ;;  %v3728_v16 = vpop.f32.mrf.mxu2  ;;  %v3741_v17 = vpop.f32.mrf.mxu3  ;;  %v6872_v25 = vor.u32 %v7997_v48, %v6869_v9  ;;  %v7000_v26 = vor.u32 %v8029_v10, %v6997_v11  ;;  %v7941_v48 = vld [vmem:[#allocation4 + $0xb24] sm:$0xf]  ;;  %v6645_v9 = vld [vmem:[#allocation4 + $0xb30] sm:$0xf0] }
 0x1d2   :  { %3987 = vmatmul.bf16.vlgmr.msra.gmra.mxu2 %v8524_v45  ;;  %4000 = vmatmul.bf16.vlgmr.msra.gmra.mxu3 %v8526_v46  ;;  %v3729_v27 = vadd.f32 %v3728_v16, %v8577_v50  ;;  %v7985_v10 = vld [vmem:[#allocation4 + $0xc84] sm:$0xf]  ;;  %v6821_v11 = vld [vmem:[#allocation4 + $0xc90] sm:$0xf0] }
 0x1d4   :  { %4010 = vmatpush.bf16.msrb.mxu0 %v6280_v33  ;;  %4023 = vmatpush.bf16.msrb.mxu1 %v6408_v34  ;;  %v6981_v33 = vld [vmem:[#allocation4 + $0xdd0] sm:$0xf0]  ;;  %v3742_v34 = vadd.f32 %v3741_v17, %v3729_v27  ;;  %v3756_v35 = vpop.f32.mrf.mxu0  ;;  %v3769_v36 = vpop.f32.mrf.mxu1  ;;  %v7905_v17 = vld [vmem:[#allocation4 + $0xa04] sm:$0xf] }
 0x1d5   :  { %4032 = vmatpush.bf16.msrb.mxu2 %v6600_v39  ;;  %4045 = vmatpush.bf16.msrb.mxu3 %v6728_v22  ;;  %v6552_v39 = vor.u32 %v7917_v18, %v6549_v19  ;;  %v6680_v22 = vor.u32 %v7949_v30, %v6677_v52  ;;  %v6984_v42 = vor.u32 %v8025_v32, %v6981_v33  ;;  %v6501_v18 = vld [vmem:[#allocation4 + $0xa10] sm:$0xf0]  ;;  %v7937_v19 = vld [vmem:[#allocation4 + $0xb04] sm:$0xf] }
 0x1d6   :  { %v3755_v50 = vadd.f32 %v3754_v51, %v3742_v34  ;;  %v7909_v51 = vld [vmem:[#allocation4 + $0xa24] sm:$0xf]  ;;  %v6629_v27 = vld [vmem:[#allocation4 + $0xb10] sm:$0xf0]  ;;  %v6504_v36 = vor.u32 %v7905_v17, %v6501_v18 }
 0x1d7   :  { %v7981_v30 = vld [vmem:[#allocation4 + $0xc64] sm:$0xf]  ;;  %v6805_v52 = vld [vmem:[#allocation4 + $0xc70] sm:$0xf0] }
 0x1d8   :  { %4011 = vmatpush.bf16.msrb.mxu0 %v6264_v47  ;;  %4024 = vmatpush.bf16.msrb.mxu1 %v6392_v49  ;;  %v7989_v47 = vld [vmem:[#allocation4 + $0xca4] sm:$0xf]  ;;  %v6837_v49 = vld [vmem:[#allocation4 + $0xcb0] sm:$0xf0]  ;;  %v3768_v61 = vadd.f32 %v3767_v57, %v3755_v50  ;;  %v6520_v57 = vor.u32 %v7909_v51, %v6517_v5 }
 0x1d9   :  { %4033 = vmatpush.bf16.msrb.mxu2 %v6584_v62  ;;  %4046 = vmatpush.bf16.msrb.mxu3 %v6712_v1  ;;  %v6536_v62 = vor.u32 %v7913_v56, %v6533_v40  ;;  %v6664_v1 = vor.u32 %v7945_v43, %v6661_v44  ;;  %v3730_v2 = vpop.f32.mrf.mxu2  ;;  %v3743_v3 = vpop.f32.mrf.mxu3  ;;  %v6840_v8 = vor.u32 %v7989_v47, %v6837_v49  ;;  %v8061_v32 = vld [vmem:[#allocation4 + $0xee4] sm:$0xf]  ;;  %v7125_v33 = vld [vmem:[#allocation4 + $0xef0] sm:$0xf0] }
 0x1da   :  { %v8093_v34 = vld [vmem:[#allocation4 + $0xfe4] sm:$0xf]  ;;  %v7253_v35 = vld [vmem:[#allocation4 + $0xff0] sm:$0xf0]  ;;  %v6936_v56 = vor.u32 %v8013_v31, %v6933_v53  ;;  %v7128_v43 = vor.u32 %v8061_v32, %v7125_v33 }
 0x1db   :  { %v7256_v44 = vor.u32 %v8093_v34, %v7253_v35  ;;  %v8009_v49 = vld [vmem:[#allocation4 + $0xd44] sm:$0xf]  ;;  %v7237_v2 = vld [vmem:[#allocation4 + $0xfd0] sm:$0xf0] }
 0x1dc   :  { %4012 = vmatpush.bf16.msrb.mxu0 %v6248_v12  ;;  %4025 = vmatpush.bf16.msrb.mxu1 %v6376_v20  ;;  %v8017_v12 = vld [vmem:[#allocation4 + $0xd84] sm:$0xf]  ;;  %v6949_v20 = vld [vmem:[#allocation4 + $0xd90] sm:$0xf0]  ;;  %v3819_v16 = vpop.f32.mrf.mxu1 }
 0x1dd   :  { %4034 = vmatpush.bf16.msrb.mxu2 %v6568_v14  ;;  %4047 = vmatpush.bf16.msrb.mxu3 %v6696_v15  ;;  %v6648_v14 = vor.u32 %v7941_v48, %v6645_v9  ;;  %v3806_v15 = vpop.f32.mrf.mxu0  ;;  %v7973_v48 = vld [vmem:[#allocation4 + $0xc24] sm:$0xf]  ;;  %v6773_v9 = vld [vmem:[#allocation4 + $0xc30] sm:$0xf0] }
 0x1de   :  { %v8085_v17 = vld [vmem:[#allocation4 + $0xfa4] sm:$0xf]  ;;  %v7221_v18 = vld [vmem:[#allocation4 + $0xfb0] sm:$0xf0] }
 0x1df   :  { %4013 = vmatmul.bf16.vlgmr.msrb.gmra.mxu0 %v8528_v54  ;;  %4026 = vmatmul.bf16.vlgmr.msrb.gmra.mxu1 %v8530_v55  ;;  %v8001_v31 = vld [vmem:[#allocation4 + $0xd04] sm:$0xf]  ;;  %v7224_v32 = vor.u32 %v8085_v17, %v7221_v18  ;;  %v6885_v33 = vld [vmem:[#allocation4 + $0xd10] sm:$0xf0]  ;;  %v7608_v17 = vld [vmem:[#allocation4 + $0xb4] sm:$0xf0] }
 0x1e0   :  { %4057 = vmatpush.bf16.msra.mxu0 %v6872_v25  ;;  %4070 = vmatpush.bf16.msra.mxu1 %v7000_v26  ;;  %v6824_v25 = vor.u32 %v7985_v10, %v6821_v11  ;;  %v6952_v26 = vor.u32 %v8017_v12, %v6949_v20  ;;  %v8005_v12 = vld [vmem:[#allocation4 + $0xd24] sm:$0xf]  ;;  %v6901_v20 = vld [vmem:[#allocation4 + $0xd30] sm:$0xf0]  ;;  %v5435_v18 = vld [vmem:[#allocation4 + $0x1a8] sm:$0xf] }
 0x1e1   :  { %4035 = vmatpush.bf16.msrb.mxu2 %v6552_v39  ;;  %4048 = vmatpush.bf16.msrb.mxu3 %v6680_v22  ;;  %v6632_v39 = vor.u32 %v7937_v19, %v6629_v27  ;;  %v6808_v22 = vor.u32 %v7981_v30, %v6805_v52  ;;  %v3780_v40 = vpop.f32.mrf.mxu2  ;;  %v3793_v50 = vpop.f32.mrf.mxu3  ;;  %v6757_v52 = vld [vmem:[#allocation4 + $0xc10] sm:$0xf0]  ;;  %v8049_v34 = vld [vmem:[#allocation4 + $0xe84] sm:$0xf] }
 0x1e2   :  { %v3781_v47 = vadd.f32 %v3780_v40, %v3768_v61  ;;  %v7077_v35 = vld [vmem:[#allocation4 + $0xe90] sm:$0xf0]  ;;  %v7648_v40 = vld [vmem:[#allocation4 + $0x1f4] sm:$0xf0] }
 0x1e4   :  { %4058 = vmatpush.bf16.msra.mxu0 %v6856_v41  ;;  %4071 = vmatpush.bf16.msra.mxu1 %v6984_v42  ;;  %v7977_v41 = vld [vmem:[#allocation4 + $0xc44] sm:$0xf]  ;;  %v6789_v42 = vld [vmem:[#allocation4 + $0xc50] sm:$0xf0]  ;;  %v3794_v3 = vadd.f32 %v3793_v50, %v3781_v47  ;;  %v3821_v5 = vpop.f32.mrf.mxu1 }
 0x1e5   :  { %4036 = vmatpush.bf16.msrb.mxu2 %v6536_v62  ;;  %4049 = vmatpush.bf16.msrb.mxu3 %v6664_v1  ;;  %v7109_v62 = vld [vmem:[#allocation4 + $0xed0] sm:$0xf0]  ;;  %v8089_v1 = vld [vmem:[#allocation4 + $0xfc4] sm:$0xf]  ;;  %v3808_v51 = vpop.f32.mrf.mxu0 }
 0x1e6   :  { %v3807_v61 = vadd.f32 %v3806_v15, %v3794_v3  ;;  %v7112_v10 = vor.u32 %v8057_v60, %v7109_v62  ;;  %v7240_v11 = vor.u32 %v8089_v1, %v7237_v2  ;;  %v7969_v15 = vld [vmem:[#allocation4 + $0xc04] sm:$0xf]  ;;  %v7061_v47 = vld [vmem:[#allocation4 + $0xe70] sm:$0xf0]  ;;  %v5323_v1 = vld [vmem:[#allocation4 + $0xc8] sm:$0xf] }
 0x1e7   :  { %v6760_v50 = vor.u32 %v7969_v15, %v6757_v52  ;;  %v8077_v60 = vld [vmem:[#allocation4 + $0xf64] sm:$0xf]  ;;  %v7189_v62 = vld [vmem:[#allocation4 + $0xf70] sm:$0xf0]  ;;  %v7612_v2 = vld [vmem:[#allocation4 + $0xd4] sm:$0xf0] }
 0x1e8   :  { %4059 = vmatpush.bf16.msra.mxu0 %v6840_v8  ;;  %4072 = vmatpush.bf16.msra.mxu1 %v6968_v4  ;;  %v6792_v8 = vor.u32 %v7977_v41, %v6789_v42  ;;  %v6920_v4 = vor.u32 %v8009_v49, %v6917_v59  ;;  %v3820_v19 = vadd.f32 %v3819_v16, %v3807_v61  ;;  %v7616_v16 = vld [vmem:[#allocation4 + $0xf4] sm:$0xf0]  ;;  %v5451_v3 = vld [vmem:[#allocation4 + $0x1c8] sm:$0xf]  ;;  %v7045_v61 = vld [vmem:[#allocation4 + $0xe50] sm:$0xf0] }
 0x1e9   :  { %4037 = vmatpush.bf16.msrb.mxu2 %v6520_v57  ;;  %4050 = vmatpush.bf16.msrb.mxu3 %v6648_v14  ;;  %v8053_v57 = vld [vmem:[#allocation4 + $0xea4] sm:$0xf]  ;;  %v7093_v14 = vld [vmem:[#allocation4 + $0xeb0] sm:$0xf0]  ;;  %v3782_v27 = vpop.f32.mrf.mxu2  ;;  %v3795_v30 = vpop.f32.mrf.mxu3  ;;  %v6888_v41 = vor.u32 %v8001_v31, %v6885_v33  ;;  %v7080_v42 = vor.u32 %v8049_v34, %v7077_v35  ;;  %v7644_v51 = vld [vmem:[#allocation4 + $0x1d4] sm:$0xf0] }
 0x1ea   :  { %v7096_v53 = vor.u32 %v8053_v57, %v7093_v14  ;;  %v7173_v57 = vld [vmem:[#allocation4 + $0xf50] sm:$0xf0]  ;;  %v5307_v14 = vld [vmem:[#allocation4 + $0xa8] sm:$0xf]  ;;  %v8037_v15 = vld [vmem:[#allocation4 + $0xe24] sm:$0xf] }
 0x1eb   :  { %v7029_v52 = vld [vmem:[#allocation4 + $0xe30] sm:$0xf0]  ;;  %v5291_v33 = vld [vmem:[#allocation4 + $0x88] sm:$0xf]  ;;  %v7604_v34 = vld [vmem:[#allocation4 + $0x94] sm:$0xf0] }
 0x1ec   :  { %4060 = vmatpush.bf16.msra.mxu0 %v6824_v25  ;;  %4073 = vmatpush.bf16.msra.mxu1 %v6952_v26  ;;  %v6776_v25 = vor.u32 %v7973_v48, %v6773_v9  ;;  %v6904_v26 = vor.u32 %v8005_v12, %v6901_v20  ;;  %v8041_v9 = vld [vmem:[#allocation4 + $0xe44] sm:$0xf]  ;;  %v5419_v35 = vld [vmem:[#allocation4 + $0x188] sm:$0xf] }
 0x1ed   :  { %4038 = vmatpush.bf16.msrb.mxu2 %v6504_v36  ;;  %4051 = vmatpush.bf16.msrb.mxu3 %v6632_v39  ;;  %v8081_v36 = vld [vmem:[#allocation4 + $0xf84] sm:$0xf]  ;;  %v7205_v39 = vld [vmem:[#allocation4 + $0xf90] sm:$0xf0]  ;;  %v7048_v27 = vor.u32 %v8041_v9, %v7045_v61 }
 0x1ee   :  { %v8073_v20 = vld [vmem:[#allocation4 + $0xf44] sm:$0xf] }
 0x1ef   :  { %v7176_v30 = vor.u32 %v8073_v20, %v7173_v57 }
 0x1f0   :  { %4061 = vmatpush.bf16.msra.mxu0 %v6808_v22  ;;  %4074 = vmatpush.bf16.msra.mxu1 %v6936_v56  ;;  %v5339_v22 = vld [vmem:[#allocation4 + $0xe8] sm:$0xf] }
 0x1f1   :  { %4083 = vmatpush.bf16.msra.mxu2 %v7128_v43  ;;  %4096 = vmatpush.bf16.msra.mxu3 %v7256_v44  ;;  %v5467_v56 = vld [vmem:[#allocation4 + $0x1e8] sm:$0xf]  ;;  %v7208_v43 = vor.u32 %v8081_v36, %v7205_v39  ;;  %v8045_v44 = vld [vmem:[#allocation4 + $0xe64] sm:$0xf]  ;;  %v5340_v49 = vor.u32 %v7616_v16, %v5339_v22  ;;  %v7636_v36 = vld [vmem:[#allocation4 + $0x194] sm:$0xf0] }
 0x1f2   :  { %4039 = vmatmul.bf16.vlgmr.msrb.gmra.mxu2 %v8538_v63  ;;  %4052 = vmatmul.bf16.vlgmr.msrb.gmra.mxu3 %v8540_v0  ;;  %v5468_v59 = vor.u32 %v7648_v40, %v5467_v56  ;;  %v7064_v5 = vor.u32 %v8045_v44, %v7061_v47  ;;  %v7032_v56 = vor.u32 %v8037_v15, %v7029_v52  ;;  %v8065_v44 = vld [vmem:[#allocation4 + $0xf04] sm:$0xf]  ;;  %v7708_v15 = vld [vmem:[#allocation4 + $0x3d4] sm:$0xf0] }
 0x1f3   :  { %v5292_v47 = vor.u32 %v7604_v34, %v5291_v33  ;;  %v5371_v34 = vld [vmem:[#allocation4 + $0x128] sm:$0xf] }
 0x1f4   :  { %4062 = vmatpush.bf16.msra.mxu0 %v6792_v8  ;;  %4075 = vmatpush.bf16.msra.mxu1 %v6920_v4  ;;  %v7192_v8 = vor.u32 %v8077_v60, %v7189_v62  ;;  %v5275_v60 = vld [vmem:[#allocation4 + $0x68] sm:$0xf]  ;;  %v7600_v62 = vld [vmem:[#allocation4 + $0x74] sm:$0xf0] }
 0x1f5   :  { %4084 = vmatpush.bf16.msra.mxu2 %v7112_v10  ;;  %4097 = vmatpush.bf16.msra.mxu3 %v7240_v11  ;;  %v3832_v4 = vpop.f32.mrf.mxu2  ;;  %v3845_v48 = vpop.f32.mrf.mxu3  ;;  %v5324_v10 = vor.u32 %v7612_v2, %v5323_v1  ;;  %v5452_v11 = vor.u32 %v7644_v51, %v5451_v3  ;;  %v5403_v2 = vld [vmem:[#allocation4 + $0x168] sm:$0xf]  ;;  %v7632_v3 = vld [vmem:[#allocation4 + $0x174] sm:$0xf0]  ;;  %v5276_v61 = vor.u32 %v7600_v62, %v5275_v60 }
 0x1f6   :  { %v3833_v12 = vadd.f32 %v3832_v4, %v3820_v19  ;;  %v5308_v19 = vor.u32 %v7608_v17, %v5307_v14  ;;  %v5595_v51 = vld [vmem:[#allocation4 + $0x2e8] sm:$0xf]  ;;  %v7712_v4 = vld [vmem:[#allocation4 + $0x3f4] sm:$0xf0] }
 0x1f7   :  { %v5387_v14 = vld [vmem:[#allocation4 + $0x148] sm:$0xf]  ;;  %v7628_v17 = vld [vmem:[#allocation4 + $0x154] sm:$0xf0] }
 0x1f8   :  { %4063 = vmatpush.bf16.msra.mxu0 %v6776_v25  ;;  %4076 = vmatpush.bf16.msra.mxu1 %v6904_v26  ;;  %v7640_v25 = vld [vmem:[#allocation4 + $0x1b4] sm:$0xf0]  ;;  %v3846_v26 = vadd.f32 %v3845_v48, %v3833_v12  ;;  %v5675_v60 = vld [vmem:[#allocation4 + $0x388] sm:$0xf] }
 0x1f9   :  { %4085 = vmatpush.bf16.msra.mxu2 %v7096_v53  ;;  %4098 = vmatpush.bf16.msra.mxu3 %v7224_v32  ;;  %v5436_v31 = vor.u32 %v7640_v25, %v5435_v18  ;;  %v8069_v53 = vld [vmem:[#allocation4 + $0xf24] sm:$0xf]  ;;  %v7157_v32 = vld [vmem:[#allocation4 + $0xf30] sm:$0xf0]  ;;  %v7596_v12 = vld [vmem:[#allocation4 + $0x54] sm:$0xf0] }
 0x1fa   :  { %v7160_v40 = vor.u32 %v8069_v53, %v7157_v32  ;;  %v5579_v18 = vld [vmem:[#allocation4 + $0x2c8] sm:$0xf]  ;;  %v7592_v53 = vld [vmem:[#allocation4 + $0x34] sm:$0xf0] }
 0x1fb   :  { %v7700_v62 = vld [vmem:[#allocation4 + $0x394] sm:$0xf0] }
 0x1fc   :  { %4064 = vmatpush.bf16.msra.mxu0 %v6760_v50  ;;  %4077 = vmatpush.bf16.msra.mxu1 %v6888_v41  ;;  %v3858_v39 = vpop.f32.mrf.mxu0  ;;  %v3871_v22 = vpop.f32.mrf.mxu1 }
 0x1fd   :  { %4086 = vmatpush.bf16.msra.mxu2 %v7080_v42  ;;  %4099 = vmatpush.bf16.msra.mxu3 %v7208_v43  ;;  %v3859_v16 = vadd.f32 %v3858_v39, %v3846_v26  ;;  %v3834_v50 = vpop.f32.mrf.mxu2  ;;  %v3847_v41 = vpop.f32.mrf.mxu3  ;;  %v8033_v42 = vld [vmem:[#allocation4 + $0xe04] sm:$0xf]  ;;  %v7013_v43 = vld [vmem:[#allocation4 + $0xe10] sm:$0xf0]  ;;  %v7672_v39 = vld [vmem:[#allocation4 + $0x2b4] sm:$0xf0] }
 0x1fe   :  { %v7016_v48 = vor.u32 %v8033_v42, %v7013_v43  ;;  %v5227_v50 = vld [vmem:[#allocation4 + $0x8] sm:$0xf]  ;;  %v7588_v41 = vld [vmem:[#allocation4 + $0x14] sm:$0xf0] }
 0x1ff   :  { %4065 = vmatmul.bf16.vlgmr.msra.gmra.mxu0 %v8552_v6  ;;  %4078 = vmatmul.bf16.vlgmr.msra.gmra.mxu1 %v8554_v7  ;;  %v8588_v1 = vadd.f32 %v3871_v22, %v3859_v16  ;;  %v5691_v22 = vld [vmem:[#allocation4 + $0x3a8] sm:$0xf]  ;;  %v7704_v16 = vld [vmem:[#allocation4 + $0x3b4] sm:$0xf0] }
 0x200   :  { %4109 = vmatpush.bf16.msrb.mxu0 %v5340_v49  ;;  %4122 = vmatpush.bf16.msrb.mxu1 %v5468_v59  ;;  %v5420_v49 = vor.u32 %v7636_v36, %v5419_v35  ;;  %v7141_v59 = vld [vmem:[#allocation4 + $0xf10] sm:$0xf0]  ;;  %v7624_v35 = vld [vmem:[#allocation4 + $0x134] sm:$0xf0]  ;;  %v5563_v36 = vld [vmem:[#allocation4 + $0x2a8] sm:$0xf] }
 0x201   :  { %4087 = vmatpush.bf16.msra.mxu2 %v7064_v5  ;;  %4100 = vmatpush.bf16.msra.mxu3 %v7192_v8  ;;  %v7680_v5 = vld [vmem:[#allocation4 + $0x2f4] sm:$0xf0]  ;;  %v5723_v8 = vld [vmem:[#allocation4 + $0x3e8] sm:$0xf]  ;;  %v7144_v9 = vor.u32 %v8065_v44, %v7141_v59  ;;  %v5564_v43 = vor.u32 %v7672_v39, %v5563_v36  ;;  %v5692_v44 = vor.u32 %v7704_v16, %v5691_v22 }
 0x202   :  { %v5596_v20 = vor.u32 %v7680_v5, %v5595_v51  ;;  %v5724_v57 = vor.u32 %v7712_v4, %v5723_v8  ;;  %v5355_v42 = vld [vmem:[#allocation4 + $0x108] sm:$0xf]  ;;  %v7668_v59 = vld [vmem:[#allocation4 + $0x294] sm:$0xf0]  ;;  %v5228_v8 = vor.u32 %v7588_v41, %v5227_v50 }
 0x203   :  { %v5979_v51 = vld [vmem:[#allocation4 + $0x5e8] sm:$0xf]  ;;  %v7776_v5 = vld [vmem:[#allocation4 + $0x5f4] sm:$0xf0] }
 0x204   :  { %4110 = vmatpush.bf16.msrb.mxu0 %v5324_v10  ;;  %4123 = vmatpush.bf16.msrb.mxu1 %v5452_v11  ;;  %v5404_v10 = vor.u32 %v7632_v3, %v5403_v2  ;;  %v5259_v11 = vld [vmem:[#allocation4 + $0x48] sm:$0xf]  ;;  %v3860_v25 = vpop.f32.mrf.mxu0  ;;  %v3873_v26 = vpop.f32.mrf.mxu1  ;;  %v7744_v3 = vld [vmem:[#allocation4 + $0x4f4] sm:$0xf0] }
 0x205   :  { %4088 = vmatpush.bf16.msra.mxu2 %v7048_v27  ;;  %4101 = vmatpush.bf16.msra.mxu3 %v7176_v30  ;;  %v7676_v27 = vld [vmem:[#allocation4 + $0x2d4] sm:$0xf0]  ;;  %v5707_v30 = vld [vmem:[#allocation4 + $0x3c8] sm:$0xf]  ;;  %v5260_v52 = vor.u32 %v7596_v12, %v5259_v11  ;;  %v5980_v12 = vor.u32 %v7776_v5, %v5979_v51 }
 0x206   :  { %v5580_v32 = vor.u32 %v7676_v27, %v5579_v18  ;;  %v5708_v33 = vor.u32 %v7708_v15, %v5707_v30  ;;  %v5851_v2 = vld [vmem:[#allocation4 + $0x4e8] sm:$0xf]  ;;  %v7772_v25 = vld [vmem:[#allocation4 + $0x5d4] sm:$0xf0] }
 0x207   :  { %v5852_v11 = vor.u32 %v7744_v3, %v5851_v2  ;;  %v5963_v18 = vld [vmem:[#allocation4 + $0x5c8] sm:$0xf]  ;;  %v7736_v36 = vld [vmem:[#allocation4 + $0x4b4] sm:$0xf0] }
 0x208   :  { %4111 = vmatpush.bf16.msrb.mxu0 %v5308_v19  ;;  %4124 = vmatpush.bf16.msrb.mxu1 %v5436_v31  ;;  %v5388_v19 = vor.u32 %v7628_v17, %v5387_v14  ;;  %v5243_v31 = vld [vmem:[#allocation4 + $0x28] sm:$0xf]  ;;  %v7740_v17 = vld [vmem:[#allocation4 + $0x4d4] sm:$0xf0] }
 0x209   :  { %4089 = vmatpush.bf16.msra.mxu2 %v7032_v56  ;;  %4102 = vmatpush.bf16.msra.mxu3 %v7160_v40  ;;  %v5244_v56 = vor.u32 %v7592_v53, %v5243_v31  ;;  %v5372_v40 = vor.u32 %v7624_v35, %v5371_v34  ;;  %v5835_v14 = vld [vmem:[#allocation4 + $0x4c8] sm:$0xf]  ;;  %v7692_v34 = vld [vmem:[#allocation4 + $0x354] sm:$0xf0] }
 0x20a   :  { %v5836_v53 = vor.u32 %v7740_v17, %v5835_v14  ;;  %v5819_v35 = vld [vmem:[#allocation4 + $0x4a8] sm:$0xf]  ;;  %v7768_v22 = vld [vmem:[#allocation4 + $0x5b4] sm:$0xf0] }
 0x20b   :  { %v5947_v39 = vld [vmem:[#allocation4 + $0x5a8] sm:$0xf]  ;;  %v7656_v41 = vld [vmem:[#allocation4 + $0x234] sm:$0xf0] }
 0x20c   :  { %4112 = vmatpush.bf16.msrb.mxu0 %v5292_v47  ;;  %4125 = vmatpush.bf16.msrb.mxu1 %v5420_v49  ;;  %v7620_v47 = vld [vmem:[#allocation4 + $0x114] sm:$0xf0]  ;;  %v5547_v49 = vld [vmem:[#allocation4 + $0x288] sm:$0xf] }
 0x20d   :  { %4090 = vmatpush.bf16.msra.mxu2 %v7016_v48  ;;  %4103 = vmatpush.bf16.msra.mxu3 %v7144_v9  ;;  %v5356_v4 = vor.u32 %v7620_v47, %v5355_v42  ;;  %v5548_v48 = vor.u32 %v7668_v59, %v5547_v49  ;;  %v5676_v9 = vor.u32 %v7700_v62, %v5675_v60  ;;  %v5499_v50 = vld [vmem:[#allocation4 + $0x228] sm:$0xf]  ;;  %v7688_v47 = vld [vmem:[#allocation4 + $0x334] sm:$0xf0] }
 0x20e   :  { %v5820_v42 = vor.u32 %v7736_v36, %v5819_v35  ;;  %v5803_v49 = vld [vmem:[#allocation4 + $0x488] sm:$0xf]  ;;  %v7732_v59 = vld [vmem:[#allocation4 + $0x494] sm:$0xf0]  ;;  %v5500_v5 = vor.u32 %v7656_v41, %v5499_v50 }
 0x20f   :  { %v5931_v60 = vld [vmem:[#allocation4 + $0x588] sm:$0xf]  ;;  %v7764_v62 = vld [vmem:[#allocation4 + $0x594] sm:$0xf0] }
 0x210   :  { %4113 = vmatpush.bf16.msrb.mxu0 %v5276_v61  ;;  %4126 = vmatpush.bf16.msrb.mxu1 %v5404_v10  ;;  %v5531_v61 = vld [vmem:[#allocation4 + $0x268] sm:$0xf]  ;;  %v7664_v10 = vld [vmem:[#allocation4 + $0x274] sm:$0xf0] }
 0x211   :  { %4135 = vmatpush.bf16.msrb.mxu2 %v5596_v20  ;;  %4148 = vmatpush.bf16.msrb.mxu3 %v5724_v57  ;;  %v5659_v20 = vld [vmem:[#allocation4 + $0x368] sm:$0xf]  ;;  %v7696_v57 = vld [vmem:[#allocation4 + $0x374] sm:$0xf0]  ;;  %v5532_v26 = vor.u32 %v7664_v10, %v5531_v61  ;;  %v5804_v10 = vor.u32 %v7732_v59, %v5803_v49 }
 0x212   :  { %4091 = vmatmul.bf16.vlgmr.msra.gmra.mxu2 %v8562_v21  ;;  %4104 = vmatmul.bf16.vlgmr.msra.gmra.mxu3 %v8564_v24  ;;  %v5660_v27 = vor.u32 %v7696_v57, %v5659_v20  ;;  %v5611_v61 = vld [vmem:[#allocation4 + $0x308] sm:$0xf]  ;;  %v7728_v57 = vld [vmem:[#allocation4 + $0x474] sm:$0xf0] }
 0x213   :  { %v5787_v20 = vld [vmem:[#allocation4 + $0x468] sm:$0xf]  ;;  %v7756_v36 = vld [vmem:[#allocation4 + $0x554] sm:$0xf0] }
 0x214   :  { %4114 = vmatpush.bf16.msrb.mxu0 %v5260_v52  ;;  %4127 = vmatpush.bf16.msrb.mxu1 %v5388_v19  ;;  %v5515_v52 = vld [vmem:[#allocation4 + $0x248] sm:$0xf]  ;;  %v7660_v19 = vld [vmem:[#allocation4 + $0x254] sm:$0xf0] }
 0x215   :  { %4136 = vmatpush.bf16.msrb.mxu2 %v5580_v32  ;;  %4149 = vmatpush.bf16.msrb.mxu3 %v5708_v33  ;;  %v3884_v30 = vpop.f32.mrf.mxu2  ;;  %v3897_v15 = vpop.f32.mrf.mxu3  ;;  %v5964_v32 = vor.u32 %v7772_v25, %v5963_v18  ;;  %v5643_v33 = vld [vmem:[#allocation4 + $0x348] sm:$0xf]  ;;  %v7760_v18 = vld [vmem:[#allocation4 + $0x574] sm:$0xf0] }
 0x216   :  { %v3885_v31 = vadd.f32 %v3884_v30, %v8588_v1  ;;  %v1126_v1 = vperm.slane %v8572_v13, 1  ;;  %v5915_v17 = vld [vmem:[#allocation4 + $0x568] sm:$0xf]  ;;  %v7840_v30 = vld [vmem:[#allocation4 + $0x7f4] sm:$0xf0] }
 0x217   :  { %v6107_v25 = vld [vmem:[#allocation4 + $0x6e8] sm:$0xf]  ;;  %v7836_v50 = vld [vmem:[#allocation4 + $0x7d4] sm:$0xf0] }
 0x218   :  { %4115 = vmatpush.bf16.msrb.mxu0 %v5244_v56  ;;  %4128 = vmatpush.bf16.msrb.mxu1 %v5372_v40  ;;  %v8595_v16 = vadd.f32 %v3897_v15, %v3885_v31  ;;  %v5516_v56 = vor.u32 %v7660_v19, %v5515_v52  ;;  %v5644_v40 = vor.u32 %v7692_v34, %v5643_v33  ;;  %v5899_v35 = vld [vmem:[#allocation4 + $0x548] sm:$0xf] }
 0x219   :  { %4137 = vmatpush.bf16.msrb.mxu2 %v5564_v43  ;;  %4150 = vmatpush.bf16.msrb.mxu3 %v5692_v44  ;;  %v5948_v43 = vor.u32 %v7768_v22, %v5947_v39  ;;  %v5627_v44 = vld [vmem:[#allocation4 + $0x328] sm:$0xf]  ;;  %v5788_v19 = vor.u32 %v7728_v57, %v5787_v20  ;;  %v5916_v31 = vor.u32 %v7760_v18, %v5915_v17  ;;  %v7828_v57 = vld [vmem:[#allocation4 + $0x794] sm:$0xf0] }
 0x21a   :  { %v6091_v39 = vld [vmem:[#allocation4 + $0x6c8] sm:$0xf]  ;;  %v7872_v18 = vld [vmem:[#allocation4 + $0x8f4] sm:$0xf0] }
 0x21b   :  { %v5883_v59 = vld [vmem:[#allocation4 + $0x528] sm:$0xf] }
 0x21c   :  { %4116 = vmatpush.bf16.msrb.mxu0 %v5228_v8  ;;  %4129 = vmatpush.bf16.msrb.mxu1 %v5356_v4  ;;  %v3910_v2 = vpop.f32.mrf.mxu0  ;;  %v3923_v3 = vpop.f32.mrf.mxu1  ;;  %v5628_v8 = vor.u32 %v7688_v47, %v5627_v44  ;;  %v7720_v44 = vld [vmem:[#allocation4 + $0x434] sm:$0xf0]  ;;  %v6187_v20 = vld [vmem:[#allocation4 + $0x788] sm:$0xf] }
 0x21d   :  { %4138 = vmatpush.bf16.msrb.mxu2 %v5548_v48  ;;  %4151 = vmatpush.bf16.msrb.mxu3 %v5676_v9  ;;  %v3911_v51 = vadd.f32 %v3910_v2, %v1126_v1  ;;  %v3886_v13 = vpop.f32.mrf.mxu2  ;;  %v3899_v4 = vpop.f32.mrf.mxu3  ;;  %v5483_v48 = vld [vmem:[#allocation4 + $0x208] sm:$0xf]  ;;  %v7652_v9 = vld [vmem:[#allocation4 + $0x214] sm:$0xf0] }
 0x21e   :  { %v5484_v15 = vor.u32 %v7652_v9, %v5483_v48  ;;  %v6219_v1 = vld [vmem:[#allocation4 + $0x7c8] sm:$0xf]  ;;  %v7800_v2 = vld [vmem:[#allocation4 + $0x6b4] sm:$0xf0] }
 0x21f   :  { %4117 = vmatmul.bf16.vlgmr.msrb.gmra.mxu0 %v8486_v37  ;;  %4130 = vmatmul.bf16.vlgmr.msrb.gmra.mxu1 %v8488_v38  ;;  %v8598_v14 = vadd.f32 %v3923_v3, %v3911_v51  ;;  %v6220_v49 = vor.u32 %v7836_v50, %v6219_v1  ;;  %v6203_v3 = vld [vmem:[#allocation4 + $0x7a8] sm:$0xf]  ;;  %v7832_v51 = vld [vmem:[#allocation4 + $0x7b4] sm:$0xf0] }
 0x220   :  { %4161 = vmatpush.bf16.msra.mxu0 %v5852_v11  ;;  %4174 = vmatpush.bf16.msra.mxu1 %v5980_v12  ;;  %v5932_v11 = vor.u32 %v7764_v62, %v5931_v60  ;;  %v7684_v12 = vld [vmem:[#allocation4 + $0x314] sm:$0xf0]  ;;  %v6075_v62 = vld [vmem:[#allocation4 + $0x6a8] sm:$0xf] }
 0x221   :  { %4139 = vmatpush.bf16.msrb.mxu2 %v5532_v26  ;;  %4152 = vmatpush.bf16.msrb.mxu3 %v5660_v27  ;;  %v7808_v26 = vld [vmem:[#allocation4 + $0x6f4] sm:$0xf0]  ;;  %v6235_v27 = vld [vmem:[#allocation4 + $0x7e8] sm:$0xf]  ;;  %v5612_v52 = vor.u32 %v7684_v12, %v5611_v61  ;;  %v6076_v9 = vor.u32 %v7800_v2, %v6075_v62  ;;  %v6204_v61 = vor.u32 %v7832_v51, %v6203_v3 }
 0x222   :  { %v6108_v33 = vor.u32 %v7808_v26, %v6107_v25  ;;  %v6236_v34 = vor.u32 %v7840_v30, %v6235_v27  ;;  %v7752_v60 = vld [vmem:[#allocation4 + $0x534] sm:$0xf0]  ;;  %v5739_v13 = vld [vmem:[#allocation4 + $0x408] sm:$0xf] }
 0x223   :  { %v7716_v4 = vld [vmem:[#allocation4 + $0x414] sm:$0xf0]  ;;  %v5867_v48 = vld [vmem:[#allocation4 + $0x508] sm:$0xf] }
 0x224   :  { %4162 = vmatpush.bf16.msra.mxu0 %v5836_v53  ;;  %4175 = vmatpush.bf16.msra.mxu1 %v5964_v32  ;;  %v5771_v53 = vld [vmem:[#allocation4 + $0x448] sm:$0xf]  ;;  %v7724_v32 = vld [vmem:[#allocation4 + $0x454] sm:$0xf0]  ;;  %v3912_v22 = vpop.f32.mrf.mxu0  ;;  %v5740_v27 = vor.u32 %v7716_v4, %v5739_v13 }
 0x225   :  { %4140 = vmatpush.bf16.msrb.mxu2 %v5516_v56  ;;  %4153 = vmatpush.bf16.msrb.mxu3 %v5644_v40  ;;  %v3925_v56 = vpop.f32.mrf.mxu1  ;;  %v7804_v40 = vld [vmem:[#allocation4 + $0x6d4] sm:$0xf0]  ;;  %v5772_v41 = vor.u32 %v7724_v32, %v5771_v53  ;;  %v6363_v17 = vld [vmem:[#allocation4 + $0x8e8] sm:$0xf] }
 0x226   :  { %v6092_v47 = vor.u32 %v7804_v40, %v6091_v39  ;;  %v7796_v12 = vld [vmem:[#allocation4 + $0x694] sm:$0xf0]  ;;  %v6491_v25 = vld [vmem:[#allocation4 + $0x9e8] sm:$0xf]  ;;  %v6364_v53 = vor.u32 %v7872_v18, %v6363_v17 }
 0x227   :  { %v7904_v26 = vld [vmem:[#allocation4 + $0x9f4] sm:$0xf0]  ;;  %v6475_v39 = vld [vmem:[#allocation4 + $0x9c8] sm:$0xf] }
 0x228   :  { %4163 = vmatpush.bf16.msra.mxu0 %v5820_v42  ;;  %4176 = vmatpush.bf16.msra.mxu1 %v5948_v43  ;;  %v5900_v42 = vor.u32 %v7756_v36, %v5899_v35  ;;  %v5755_v43 = vld [vmem:[#allocation4 + $0x428] sm:$0xf]  ;;  %v6492_v32 = vor.u32 %v7904_v26, %v6491_v25  ;;  %v7868_v36 = vld [vmem:[#allocation4 + $0x8d4] sm:$0xf0] }
 0x229   :  { %4141 = vmatpush.bf16.msrb.mxu2 %v5500_v5  ;;  %4154 = vmatpush.bf16.msrb.mxu3 %v5628_v8  ;;  %v5756_v5 = vor.u32 %v7720_v44, %v5755_v43  ;;  %v5884_v8 = vor.u32 %v7752_v60, %v5883_v59  ;;  %v6347_v35 = vld [vmem:[#allocation4 + $0x8c8] sm:$0xf]  ;;  %v7900_v22 = vld [vmem:[#allocation4 + $0x9d4] sm:$0xf0] }
 0x22a   :  { %v6348_v44 = vor.u32 %v7868_v36, %v6347_v35  ;;  %v7820_v59 = vld [vmem:[#allocation4 + $0x754] sm:$0xf0]  ;;  %v6331_v60 = vld [vmem:[#allocation4 + $0x8a8] sm:$0xf] }
 0x22b   :  { %v7864_v62 = vld [vmem:[#allocation4 + $0x8b4] sm:$0xf0]  ;;  %v6459_v2 = vld [vmem:[#allocation4 + $0x9a8] sm:$0xf] }
 0x22c   :  { %4164 = vmatpush.bf16.msra.mxu0 %v5804_v10  ;;  %4177 = vmatpush.bf16.msra.mxu1 %v5932_v11  ;;  %v7748_v10 = vld [vmem:[#allocation4 + $0x514] sm:$0xf0]  ;;  %v6059_v11 = vld [vmem:[#allocation4 + $0x688] sm:$0xf] }
 0x22d   :  { %4142 = vmatpush.bf16.msrb.mxu2 %v5484_v15  ;;  %4155 = vmatpush.bf16.msrb.mxu3 %v5612_v52  ;;  %v5868_v30 = vor.u32 %v7748_v10, %v5867_v48  ;;  %v6060_v15 = vor.u32 %v7796_v12, %v6059_v11  ;;  %v6188_v52 = vor.u32 %v7828_v57, %v6187_v20  ;;  %v7896_v3 = vld [vmem:[#allocation4 + $0x9b4] sm:$0xf0]  ;;  %v6011_v13 = vld [vmem:[#allocation4 + $0x628] sm:$0xf] }
 0x22e   :  { %v7784_v4 = vld [vmem:[#allocation4 + $0x634] sm:$0xf0]  ;;  %v6460_v48 = vor.u32 %v7896_v3, %v6459_v2  ;;  %v6315_v10 = vld [vmem:[#allocation4 + $0x888] sm:$0xf] }
 0x22f   :  { %v7860_v11 = vld [vmem:[#allocation4 + $0x894] sm:$0xf0]  ;;  %v6443_v12 = vld [vmem:[#allocation4 + $0x988] sm:$0xf]  ;;  %v6012_v25 = vor.u32 %v7784_v4, %v6011_v13 }
 0x230   :  { %4165 = vmatpush.bf16.msra.mxu0 %v5788_v19  ;;  %4178 = vmatpush.bf16.msra.mxu1 %v5916_v31  ;;  %v6043_v19 = vld [vmem:[#allocation4 + $0x668] sm:$0xf]  ;;  %v7792_v31 = vld [vmem:[#allocation4 + $0x674] sm:$0xf0] }
 0x231   :  { %4187 = vmatpush.bf16.msra.mxu2 %v6108_v33  ;;  %4200 = vmatpush.bf16.msra.mxu3 %v6236_v34  ;;  %v6171_v33 = vld [vmem:[#allocation4 + $0x768] sm:$0xf]  ;;  %v7824_v34 = vld [vmem:[#allocation4 + $0x774] sm:$0xf0]  ;;  %v6044_v56 = vor.u32 %v7792_v31, %v6043_v19  ;;  %v6316_v31 = vor.u32 %v7860_v11, %v6315_v10 }
 0x232   :  { %4143 = vmatmul.bf16.vlgmr.msrb.gmra.mxu2 %v8502_v23  ;;  %4156 = vmatmul.bf16.vlgmr.msrb.gmra.mxu3 %v8504_v58  ;;  %v6172_v40 = vor.u32 %v7824_v34, %v6171_v33  ;;  %v7892_v20 = vld [vmem:[#allocation4 + $0x994] sm:$0xf0]  ;;  %v6123_v19 = vld [vmem:[#allocation4 + $0x708] sm:$0xf] }
 0x233   :  { %v6299_v33 = vld [vmem:[#allocation4 + $0x868] sm:$0xf]  ;;  %v7856_v34 = vld [vmem:[#allocation4 + $0x874] sm:$0xf0] }
 0x234   :  { %4166 = vmatpush.bf16.msra.mxu0 %v5772_v41  ;;  %4179 = vmatpush.bf16.msra.mxu1 %v5900_v42  ;;  %v6027_v41 = vld [vmem:[#allocation4 + $0x648] sm:$0xf]  ;;  %v7788_v42 = vld [vmem:[#allocation4 + $0x654] sm:$0xf0] }
 0x235   :  { %4188 = vmatpush.bf16.msra.mxu2 %v6092_v47  ;;  %4201 = vmatpush.bf16.msra.mxu3 %v6220_v49  ;;  %v3936_v1 = vpop.f32.mrf.mxu2  ;;  %v3949_v50 = vpop.f32.mrf.mxu3  ;;  %v6476_v47 = vor.u32 %v7900_v22, %v6475_v39  ;;  %v6155_v49 = vld [vmem:[#allocation4 + $0x748] sm:$0xf]  ;;  %v7888_v39 = vld [vmem:[#allocation4 + $0x974] sm:$0xf0] }
 0x236   :  { %v3937_v43 = vadd.f32 %v3936_v1, %v8598_v14  ;;  %v6332_v14 = vor.u32 %v7864_v62, %v6331_v60  ;;  %v6427_v36 = vld [vmem:[#allocation4 + $0x968] sm:$0xf]  ;;  %v7968_v1 = vld [vmem:[#allocation4 + $0xbf4] sm:$0xf0] }
 0x237   :  { %v6619_v22 = vld [vmem:[#allocation4 + $0xae8] sm:$0xf]  ;;  %v7884_v62 = vld [vmem:[#allocation4 + $0x954] sm:$0xf0] }
 0x238   :  { %4167 = vmatpush.bf16.msra.mxu0 %v5756_v5  ;;  %4180 = vmatpush.bf16.msra.mxu1 %v5884_v8  ;;  %v3950_v51 = vadd.f32 %v3949_v50, %v3937_v43  ;;  %v6028_v5 = vor.u32 %v7788_v42, %v6027_v41  ;;  %v6156_v8 = vor.u32 %v7820_v59, %v6155_v49  ;;  %v6411_v60 = vld [vmem:[#allocation4 + $0x948] sm:$0xf]  ;;  %v7964_v13 = vld [vmem:[#allocation4 + $0xbd4] sm:$0xf0] }
 0x239   :  { %4189 = vmatpush.bf16.msra.mxu2 %v6076_v9  ;;  %4202 = vmatpush.bf16.msra.mxu3 %v6204_v61  ;;  %v6139_v9 = vld [vmem:[#allocation4 + $0x728] sm:$0xf]  ;;  %v7816_v61 = vld [vmem:[#allocation4 + $0x734] sm:$0xf0]  ;;  %v6300_v42 = vor.u32 %v7856_v34, %v6299_v33  ;;  %v6428_v43 = vor.u32 %v7888_v39, %v6427_v36 }
 0x23a   :  { %v6140_v26 = vor.u32 %v7816_v61, %v6139_v9  ;;  %v6603_v2 = vld [vmem:[#allocation4 + $0xac8] sm:$0xf]  ;;  %v7848_v9 = vld [vmem:[#allocation4 + $0x834] sm:$0xf0] }
 0x23b   :  { %v6395_v11 = vld [vmem:[#allocation4 + $0x928] sm:$0xf]  ;;  %v7956_v34 = vld [vmem:[#allocation4 + $0xb94] sm:$0xf0] }
 0x23c   :  { %4168 = vmatpush.bf16.msra.mxu0 %v5740_v27  ;;  %4181 = vmatpush.bf16.msra.mxu1 %v5868_v30  ;;  %v3962_v57 = vpop.f32.mrf.mxu0  ;;  %v3975_v17 = vpop.f32.mrf.mxu1  ;;  %v6699_v33 = vld [vmem:[#allocation4 + $0xb88] sm:$0xf]  ;;  %v8000_v39 = vld [vmem:[#allocation4 + $0xcf4] sm:$0xf0] }
 0x23d   :  { %4190 = vmatpush.bf16.msra.mxu2 %v6060_v15  ;;  %4203 = vmatpush.bf16.msra.mxu3 %v6188_v52  ;;  %v3963_v18 = vadd.f32 %v3962_v57, %v3950_v51  ;;  %v3938_v27 = vpop.f32.mrf.mxu2  ;;  %v3951_v30 = vpop.f32.mrf.mxu3  ;;  %v5995_v15 = vld [vmem:[#allocation4 + $0x608] sm:$0xf]  ;;  %v7780_v52 = vld [vmem:[#allocation4 + $0x614] sm:$0xf0] }
 0x23e   :  { %v5996_v50 = vor.u32 %v7780_v52, %v5995_v15  ;;  %v7928_v57 = vld [vmem:[#allocation4 + $0xab4] sm:$0xf0]  ;;  %v6251_v27 = vld [vmem:[#allocation4 + $0x808] sm:$0xf] }
 0x23f   :  { %4169 = vmatmul.bf16.vlgmr.msra.gmra.mxu0 %v8506_v28  ;;  %4182 = vmatmul.bf16.vlgmr.msra.gmra.mxu1 %v8508_v29  ;;  %v8605_v35 = vadd.f32 %v3975_v17, %v3963_v18  ;;  %v6715_v17 = vld [vmem:[#allocation4 + $0xba8] sm:$0xf]  ;;  %v7960_v18 = vld [vmem:[#allocation4 + $0xbb4] sm:$0xf0] }
 0x240   :  { %4213 = vmatpush.bf16.msrb.mxu0 %v6364_v53  ;;  %4226 = vmatpush.bf16.msrb.mxu1 %v6492_v32  ;;  %v6444_v53 = vor.u32 %v7892_v20, %v6443_v12  ;;  %v7812_v32 = vld [vmem:[#allocation4 + $0x714] sm:$0xf0]  ;;  %v6587_v20 = vld [vmem:[#allocation4 + $0xaa8] sm:$0xf] }
 0x241   :  { %4191 = vmatpush.bf16.msra.mxu2 %v6044_v56  ;;  %4204 = vmatpush.bf16.msra.mxu3 %v6172_v40  ;;  %v7936_v56 = vld [vmem:[#allocation4 + $0xaf4] sm:$0xf0]  ;;  %v6747_v40 = vld [vmem:[#allocation4 + $0xbe8] sm:$0xf]  ;;  %v6124_v41 = vor.u32 %v7812_v32, %v6123_v19  ;;  %v6588_v52 = vor.u32 %v7928_v57, %v6587_v20  ;;  %v6716_v19 = vor.u32 %v7960_v18, %v6715_v17 }
 0x242   :  { %v6620_v49 = vor.u32 %v7936_v56, %v6619_v22  ;;  %v6748_v59 = vor.u32 %v7968_v1, %v6747_v40  ;;  %v7880_v12 = vld [vmem:[#allocation4 + $0x934] sm:$0xf0]  ;;  %v6379_v15 = vld [vmem:[#allocation4 + $0x908] sm:$0xf] }
 0x243   :  { %v7844_v30 = vld [vmem:[#allocation4 + $0x814] sm:$0xf0]  ;;  %v6875_v36 = vld [vmem:[#allocation4 + $0xce8] sm:$0xf] }
 0x244   :  { %4214 = vmatpush.bf16.msrb.mxu0 %v6348_v44  ;;  %4227 = vmatpush.bf16.msrb.mxu1 %v6476_v47  ;;  %v6283_v44 = vld [vmem:[#allocation4 + $0x848] sm:$0xf]  ;;  %v7852_v47 = vld [vmem:[#allocation4 + $0x854] sm:$0xf0]  ;;  %v3964_v3 = vpop.f32.mrf.mxu0  ;;  %v3977_v51 = vpop.f32.mrf.mxu1  ;;  %v6252_v40 = vor.u32 %v7844_v30, %v6251_v27 }
 0x245   :  { %4192 = vmatpush.bf16.msra.mxu2 %v6028_v5  ;;  %4205 = vmatpush.bf16.msra.mxu3 %v6156_v8  ;;  %v7932_v5 = vld [vmem:[#allocation4 + $0xad4] sm:$0xf0]  ;;  %v6731_v8 = vld [vmem:[#allocation4 + $0xbc8] sm:$0xf]  ;;  %v6284_v4 = vor.u32 %v7852_v47, %v6283_v44  ;;  %v6876_v44 = vor.u32 %v8000_v39, %v6875_v36 }
 0x246   :  { %v6604_v61 = vor.u32 %v7932_v5, %v6603_v2  ;;  %v6732_v10 = vor.u32 %v7964_v13, %v6731_v8  ;;  %v7924_v32 = vld [vmem:[#allocation4 + $0xa94] sm:$0xf0]  ;;  %v7003_v22 = vld [vmem:[#allocation4 + $0xde8] sm:$0xf] }
 0x247   :  { %v8032_v56 = vld [vmem:[#allocation4 + $0xdf4] sm:$0xf0]  ;;  %v6987_v2 = vld [vmem:[#allocation4 + $0xdc8] sm:$0xf] }
 0x248   :  { %4215 = vmatpush.bf16.msrb.mxu0 %v6332_v14  ;;  %4228 = vmatpush.bf16.msrb.mxu1 %v6460_v48  ;;  %v6412_v14 = vor.u32 %v7884_v62, %v6411_v60  ;;  %v6267_v48 = vld [vmem:[#allocation4 + $0x828] sm:$0xf]  ;;  %v7004_v47 = vor.u32 %v8032_v56, %v7003_v22  ;;  %v7996_v62 = vld [vmem:[#allocation4 + $0xcd4] sm:$0xf0] }
 0x249   :  { %4193 = vmatpush.bf16.msra.mxu2 %v6012_v25  ;;  %4206 = vmatpush.bf16.msra.mxu3 %v6140_v26  ;;  %v6268_v25 = vor.u32 %v7848_v9, %v6267_v48  ;;  %v6396_v26 = vor.u32 %v7880_v12, %v6395_v11  ;;  %v6859_v60 = vld [vmem:[#allocation4 + $0xcc8] sm:$0xf]  ;;  %v8028_v3 = vld [vmem:[#allocation4 + $0xdd4] sm:$0xf0] }
 0x24a   :  { %v6860_v9 = vor.u32 %v7996_v62, %v6859_v60  ;;  %v7948_v11 = vld [vmem:[#allocation4 + $0xb54] sm:$0xf0]  ;;  %v6843_v12 = vld [vmem:[#allocation4 + $0xca8] sm:$0xf] }
 0x24b   :  { %v7992_v20 = vld [vmem:[#allocation4 + $0xcb4] sm:$0xf0]  ;;  %v6971_v57 = vld [vmem:[#allocation4 + $0xda8] sm:$0xf] }
 0x24c   :  { %4216 = vmatpush.bf16.msrb.mxu0 %v6316_v31  ;;  %4229 = vmatpush.bf16.msrb.mxu1 %v6444_v53  ;;  %v7876_v31 = vld [vmem:[#allocation4 + $0x914] sm:$0xf0]  ;;  %v6571_v53 = vld [vmem:[#allocation4 + $0xa88] sm:$0xf] }
 0x24d   :  { %4194 = vmatpush.bf16.msra.mxu2 %v5996_v50  ;;  %4207 = vmatpush.bf16.msra.mxu3 %v6124_v41  ;;  %v6380_v1 = vor.u32 %v7876_v31, %v6379_v15  ;;  %v6572_v50 = vor.u32 %v7924_v32, %v6571_v53  ;;  %v6700_v41 = vor.u32 %v7956_v34, %v6699_v33  ;;  %v8024_v17 = vld [vmem:[#allocation4 + $0xdb4] sm:$0xf0]  ;;  %v6523_v27 = vld [vmem:[#allocation4 + $0xa28] sm:$0xf] }
 0x24e   :  { %v7912_v30 = vld [vmem:[#allocation4 + $0xa34] sm:$0xf0]  ;;  %v6972_v15 = vor.u32 %v8024_v17, %v6971_v57  ;;  %v6827_v31 = vld [vmem:[#allocation4 + $0xc88] sm:$0xf] }
 0x24f   :  { %v7988_v53 = vld [vmem:[#allocation4 + $0xc94] sm:$0xf0]  ;;  %v6955_v32 = vld [vmem:[#allocation4 + $0xd88] sm:$0xf]  ;;  %v6524_v22 = vor.u32 %v7912_v30, %v6523_v27 }
 0x250   :  { %4217 = vmatpush.bf16.msrb.mxu0 %v6300_v42  ;;  %4230 = vmatpush.bf16.msrb.mxu1 %v6428_v43  ;;  %v6555_v42 = vld [vmem:[#allocation4 + $0xa68] sm:$0xf]  ;;  %v7920_v43 = vld [vmem:[#allocation4 + $0xa74] sm:$0xf0] }
 0x251   :  { %4239 = vmatpush.bf16.msrb.mxu2 %v6620_v49  ;;  %4252 = vmatpush.bf16.msrb.mxu3 %v6748_v59  ;;  %v6683_v49 = vld [vmem:[#allocation4 + $0xb68] sm:$0xf]  ;;  %v7952_v59 = vld [vmem:[#allocation4 + $0xb74] sm:$0xf0]  ;;  %v6556_v51 = vor.u32 %v7920_v43, %v6555_v42  ;;  %v6828_v43 = vor.u32 %v7988_v53, %v6827_v31 }
 0x252   :  { %4195 = vmatmul.bf16.vlgmr.msra.gmra.mxu2 %v8524_v45  ;;  %4208 = vmatmul.bf16.vlgmr.msra.gmra.mxu3 %v8526_v46  ;;  %v6684_v5 = vor.u32 %v7952_v59, %v6683_v49  ;;  %v8020_v33 = vld [vmem:[#allocation4 + $0xd94] sm:$0xf0]  ;;  %v6635_v42 = vld [vmem:[#allocation4 + $0xb08] sm:$0xf] }
 0x253   :  { %v6811_v49 = vld [vmem:[#allocation4 + $0xc68] sm:$0xf]  ;;  %v7984_v59 = vld [vmem:[#allocation4 + $0xc74] sm:$0xf0] }
 0x254   :  { %4218 = vmatpush.bf16.msrb.mxu0 %v6284_v4  ;;  %4231 = vmatpush.bf16.msrb.mxu1 %v6412_v14  ;;  %v6539_v4 = vld [vmem:[#allocation4 + $0xa48] sm:$0xf]  ;;  %v7916_v14 = vld [vmem:[#allocation4 + $0xa54] sm:$0xf0] }
 0x255   :  { %4240 = vmatpush.bf16.msrb.mxu2 %v6604_v61  ;;  %4253 = vmatpush.bf16.msrb.mxu3 %v6732_v10  ;;  %v3988_v8 = vpop.f32.mrf.mxu2  ;;  %v4001_v13 = vpop.f32.mrf.mxu3  ;;  %v6988_v61 = vor.u32 %v8028_v3, %v6987_v2  ;;  %v6667_v10 = vld [vmem:[#allocation4 + $0xb48] sm:$0xf]  ;;  %v8016_v2 = vld [vmem:[#allocation4 + $0xd74] sm:$0xf0] }
 0x256   :  { %v3989_v48 = vadd.f32 %v3988_v8, %v8605_v35  ;;  %v6844_v35 = vor.u32 %v7992_v20, %v6843_v12  ;;  %v6939_v62 = vld [vmem:[#allocation4 + $0xd68] sm:$0xf]  ;;  %v8096_v8 = vld [vmem:[#allocation4 + $0xff4] sm:$0xf0] }
 0x257   :  { %v7131_v3 = vld [vmem:[#allocation4 + $0xee8] sm:$0xf]  ;;  %v8012_v20 = vld [vmem:[#allocation4 + $0xd54] sm:$0xf0] }
 0x258   :  { %4219 = vmatpush.bf16.msrb.mxu0 %v6268_v25  ;;  %4232 = vmatpush.bf16.msrb.mxu1 %v6396_v26  ;;  %v4002_v18 = vadd.f32 %v4001_v13, %v3989_v48  ;;  %v6540_v25 = vor.u32 %v7916_v14, %v6539_v4  ;;  %v6668_v26 = vor.u32 %v7948_v11, %v6667_v10  ;;  %v6923_v12 = vld [vmem:[#allocation4 + $0xd48] sm:$0xf]  ;;  %v8092_v27 = vld [vmem:[#allocation4 + $0xfd4] sm:$0xf0] }
 0x259   :  { %4241 = vmatpush.bf16.msrb.mxu2 %v6588_v52  ;;  %4254 = vmatpush.bf16.msrb.mxu3 %v6716_v19  ;;  %v6651_v52 = vld [vmem:[#allocation4 + $0xb28] sm:$0xf]  ;;  %v7944_v19 = vld [vmem:[#allocation4 + $0xb34] sm:$0xf0]  ;;  %v6812_v14 = vor.u32 %v7984_v59, %v6811_v49  ;;  %v6940_v48 = vor.u32 %v8016_v2, %v6939_v62  ;;  %v7614_v62 = vld [vmem:[#allocation4 + $0xec] sm:$0xf] }
 0x25a   :  { %v6652_v56 = vor.u32 %v7944_v19, %v6651_v52  ;;  %v7115_v57 = vld [vmem:[#allocation4 + $0xec8] sm:$0xf]  ;;  %v7976_v52 = vld [vmem:[#allocation4 + $0xc34] sm:$0xf0]  ;;  %v5341_v2 = vld [vmem:[#allocation4 + $0xf8] sm:$0xf0] }
 0x25b   :  { %v6907_v53 = vld [vmem:[#allocation4 + $0xd28] sm:$0xf]  ;;  %v8084_v59 = vld [vmem:[#allocation4 + $0xf94] sm:$0xf0] }
 0x25c   :  { %4220 = vmatpush.bf16.msrb.mxu0 %v6252_v40  ;;  %4233 = vmatpush.bf16.msrb.mxu1 %v6380_v1  ;;  %v4014_v34 = vpop.f32.mrf.mxu0  ;;  %v4027_v36 = vpop.f32.mrf.mxu1  ;;  %v7211_v49 = vld [vmem:[#allocation4 + $0xf88] sm:$0xf] }
 0x25d   :  { %4242 = vmatpush.bf16.msrb.mxu2 %v6572_v50  ;;  %4255 = vmatpush.bf16.msrb.mxu3 %v6700_v41  ;;  %v4015_v39 = vadd.f32 %v4014_v34, %v4002_v18  ;;  %v3990_v40 = vpop.f32.mrf.mxu2  ;;  %v4003_v1 = vpop.f32.mrf.mxu3  ;;  %v6507_v50 = vld [vmem:[#allocation4 + $0xa08] sm:$0xf]  ;;  %v7908_v41 = vld [vmem:[#allocation4 + $0xa14] sm:$0xf0] }
 0x25e   :  { %v6508_v13 = vor.u32 %v7908_v41, %v6507_v50  ;;  %v8056_v34 = vld [vmem:[#allocation4 + $0xeb4] sm:$0xf0]  ;;  %v6763_v40 = vld [vmem:[#allocation4 + $0xc08] sm:$0xf] }
 0x25f   :  { %4221 = vmatmul.bf16.vlgmr.msrb.gmra.mxu0 %v8528_v54  ;;  %4234 = vmatmul.bf16.vlgmr.msrb.gmra.mxu1 %v8530_v55  ;;  %v8612_v60 = vadd.f32 %v4027_v36, %v4015_v39  ;;  %v7227_v36 = vld [vmem:[#allocation4 + $0xfa8] sm:$0xf]  ;;  %v8088_v39 = vld [vmem:[#allocation4 + $0xfb4] sm:$0xf0] }
 0x260   :  { %4265 = vmatpush.bf16.msra.mxu0 %v6876_v44  ;;  %4278 = vmatpush.bf16.msra.mxu1 %v7004_v47  ;;  %v6956_v44 = vor.u32 %v8020_v33, %v6955_v32  ;;  %v7940_v47 = vld [vmem:[#allocation4 + $0xb14] sm:$0xf0]  ;;  %v7099_v33 = vld [vmem:[#allocation4 + $0xea8] sm:$0xf] }
 0x261   :  { %4243 = vmatpush.bf16.msrb.mxu2 %v6556_v51  ;;  %4256 = vmatpush.bf16.msrb.mxu3 %v6684_v5  ;;  %v8064_v51 = vld [vmem:[#allocation4 + $0xef4] sm:$0xf0]  ;;  %v7259_v5 = vld [vmem:[#allocation4 + $0xfe8] sm:$0xf]  ;;  %v6636_v4 = vor.u32 %v7940_v47, %v6635_v42  ;;  %v7100_v41 = vor.u32 %v8056_v34, %v7099_v33  ;;  %v7228_v42 = vor.u32 %v8088_v39, %v7227_v36  ;;  %v5309_v33 = vld [vmem:[#allocation4 + $0xb8] sm:$0xf0] }
 0x262   :  { %v7132_v10 = vor.u32 %v8064_v51, %v7131_v3  ;;  %v7260_v11 = vor.u32 %v8096_v8, %v7259_v5  ;;  %v8008_v32 = vld [vmem:[#allocation4 + $0xd34] sm:$0xf0]  ;;  %v6891_v50 = vld [vmem:[#allocation4 + $0xd08] sm:$0xf]  ;;  %v7646_v3 = vld [vmem:[#allocation4 + $0x1ec] sm:$0xf] }
 0x263   :  { %v7972_v1 = vld [vmem:[#allocation4 + $0xc14] sm:$0xf0]  ;;  %v5469_v51 = vld [vmem:[#allocation4 + $0x1f8] sm:$0xf0]  ;;  %v7638_v34 = vld [vmem:[#allocation4 + $0x1ac] sm:$0xf] }
 0x264   :  { %4266 = vmatpush.bf16.msra.mxu0 %v6860_v9  ;;  %4279 = vmatpush.bf16.msra.mxu1 %v6988_v61  ;;  %v6795_v9 = vld [vmem:[#allocation4 + $0xc48] sm:$0xf]  ;;  %v7980_v61 = vld [vmem:[#allocation4 + $0xc54] sm:$0xf0]  ;;  %v4016_v17 = vpop.f32.mrf.mxu0  ;;  %v4029_v18 = vpop.f32.mrf.mxu1  ;;  %v6764_v5 = vor.u32 %v7972_v1, %v6763_v40  ;;  %v5437_v36 = vld [vmem:[#allocation4 + $0x1b8] sm:$0xf0] }
 0x265   :  { %4244 = vmatpush.bf16.msrb.mxu2 %v6540_v25  ;;  %4257 = vmatpush.bf16.msrb.mxu3 %v6668_v26  ;;  %v8060_v25 = vld [vmem:[#allocation4 + $0xed4] sm:$0xf0]  ;;  %v7243_v26 = vld [vmem:[#allocation4 + $0xfc8] sm:$0xf]  ;;  %v6796_v30 = vor.u32 %v7980_v61, %v6795_v9  ;;  %v5344_v9 = vor.u32 %v7614_v62, %v5341_v2  ;;  %v5472_v61 = vor.u32 %v7646_v3, %v5469_v51  ;;  %v5453_v17 = vld [vmem:[#allocation4 + $0x1d8] sm:$0xf0] }
 0x266   :  { %v7116_v19 = vor.u32 %v8060_v25, %v7115_v57  ;;  %v7244_v31 = vor.u32 %v8092_v27, %v7243_v26  ;;  %v8052_v47 = vld [vmem:[#allocation4 + $0xe94] sm:$0xf0]  ;;  %v7642_v57 = vld [vmem:[#allocation4 + $0x1cc] sm:$0xf]  ;;  %v7035_v40 = vld [vmem:[#allocation4 + $0xe28] sm:$0xf] }
 0x267   :  { %v8040_v1 = vld [vmem:[#allocation4 + $0xe34] sm:$0xf0] }
 0x268   :  { %4267 = vmatpush.bf16.msra.mxu0 %v6844_v35  ;;  %4280 = vmatpush.bf16.msra.mxu1 %v6972_v15  ;;  %v6924_v35 = vor.u32 %v8012_v20, %v6923_v12  ;;  %v6779_v15 = vld [vmem:[#allocation4 + $0xc28] sm:$0xf]  ;;  %v7610_v12 = vld [vmem:[#allocation4 + $0xcc] sm:$0xf]  ;;  %v5325_v20 = vld [vmem:[#allocation4 + $0xd8] sm:$0xf0]  ;;  %v7036_v3 = vor.u32 %v8040_v1, %v7035_v40 }
 0x269   :  { %4245 = vmatpush.bf16.msrb.mxu2 %v6524_v22  ;;  %4258 = vmatpush.bf16.msrb.mxu3 %v6652_v56  ;;  %v6780_v22 = vor.u32 %v7976_v52, %v6779_v15  ;;  %v6908_v56 = vor.u32 %v8008_v32, %v6907_v53  ;;  %v5328_v52 = vor.u32 %v7610_v12, %v5325_v20  ;;  %v8076_v53 = vld [vmem:[#allocation4 + $0xf54] sm:$0xf0]  ;;  %v7606_v32 = vld [vmem:[#allocation4 + $0xac] sm:$0xf]  ;;  %v5709_v40 = vld [vmem:[#allocation4 + $0x3d8] sm:$0xf0] }
 0x26a   :  { %v7630_v20 = vld [vmem:[#allocation4 + $0x16c] sm:$0xf] }
 0x26c   :  { %4268 = vmatpush.bf16.msra.mxu0 %v6828_v43  ;;  %4281 = vmatpush.bf16.msra.mxu1 %v6956_v44  ;;  %v8004_v43 = vld [vmem:[#allocation4 + $0xd14] sm:$0xf0]  ;;  %v7083_v44 = vld [vmem:[#allocation4 + $0xe88] sm:$0xf] }
 0x26d   :  { %4246 = vmatpush.bf16.msrb.mxu2 %v6508_v13  ;;  %4259 = vmatpush.bf16.msrb.mxu3 %v6636_v4  ;;  %v6892_v8 = vor.u32 %v8004_v43, %v6891_v50  ;;  %v7084_v13 = vor.u32 %v8052_v47, %v7083_v44  ;;  %v7212_v4 = vor.u32 %v8084_v59, %v7211_v49  ;;  %v7602_v43 = vld [vmem:[#allocation4 + $0x8c] sm:$0xf]  ;;  %v5293_v44 = vld [vmem:[#allocation4 + $0x98] sm:$0xf0] }
 0x26e   :  { %v5440_v50 = vor.u32 %v7638_v34, %v5437_v36  ;;  %v7634_v47 = vld [vmem:[#allocation4 + $0x18c] sm:$0xf]  ;;  %v5421_v49 = vld [vmem:[#allocation4 + $0x198] sm:$0xf0] }
 0x26f   :  { %v7674_v34 = vld [vmem:[#allocation4 + $0x2cc] sm:$0xf] }
 0x270   :  { %4269 = vmatpush.bf16.msra.mxu0 %v6812_v14  ;;  %4282 = vmatpush.bf16.msra.mxu1 %v6940_v48  ;;  %v7067_v14 = vld [vmem:[#allocation4 + $0xe68] sm:$0xf]  ;;  %v8048_v48 = vld [vmem:[#allocation4 + $0xe74] sm:$0xf0] }
 0x271   :  { %4291 = vmatpush.bf16.msra.mxu2 %v7132_v10  ;;  %4304 = vmatpush.bf16.msra.mxu3 %v7260_v11  ;;  %v7195_v10 = vld [vmem:[#allocation4 + $0xf68] sm:$0xf]  ;;  %v8080_v11 = vld [vmem:[#allocation4 + $0xf74] sm:$0xf0]  ;;  %v7068_v18 = vor.u32 %v8048_v48, %v7067_v14  ;;  %v5296_v48 = vor.u32 %v7602_v43, %v5293_v44  ;;  %v7622_v44 = vld [vmem:[#allocation4 + $0x12c] sm:$0xf] }
 0x272   :  { %4247 = vmatmul.bf16.vlgmr.msrb.gmra.mxu2 %v8538_v63  ;;  %4260 = vmatmul.bf16.vlgmr.msrb.gmra.mxu3 %v8540_v0  ;;  %v7196_v25 = vor.u32 %v8080_v11, %v7195_v10  ;;  %v7147_v14 = vld [vmem:[#allocation4 + $0xf08] sm:$0xf]  ;;  %v7598_v10 = vld [vmem:[#allocation4 + $0x6c] sm:$0xf]  ;;  %v5277_v11 = vld [vmem:[#allocation4 + $0x78] sm:$0xf0] }
 0x274   :  { %4270 = vmatpush.bf16.msra.mxu0 %v6796_v30  ;;  %4283 = vmatpush.bf16.msra.mxu1 %v6924_v35  ;;  %v7051_v30 = vld [vmem:[#allocation4 + $0xe48] sm:$0xf]  ;;  %v8044_v35 = vld [vmem:[#allocation4 + $0xe54] sm:$0xf0] }
 0x275   :  { %4292 = vmatpush.bf16.msra.mxu2 %v7116_v19  ;;  %4305 = vmatpush.bf16.msra.mxu3 %v7244_v31  ;;  %v4040_v26 = vpop.f32.mrf.mxu2  ;;  %v4053_v27 = vpop.f32.mrf.mxu3  ;;  %v5456_v19 = vor.u32 %v7642_v57, %v5453_v17  ;;  %v7179_v31 = vld [vmem:[#allocation4 + $0xf48] sm:$0xf]  ;;  %v5405_v57 = vld [vmem:[#allocation4 + $0x178] sm:$0xf0]  ;;  %v7678_v17 = vld [vmem:[#allocation4 + $0x2ec] sm:$0xf] }
 0x276   :  { %v4041_v15 = vadd.f32 %v4040_v26, %v8612_v60  ;;  %v5312_v60 = vor.u32 %v7606_v32, %v5309_v33  ;;  %v5725_v26 = vld [vmem:[#allocation4 + $0x3f8] sm:$0xf0]  ;;  %v7626_v32 = vld [vmem:[#allocation4 + $0x14c] sm:$0xf] }
 0x277   :  { %v5389_v33 = vld [vmem:[#allocation4 + $0x158] sm:$0xf0] }
 0x278   :  { %4271 = vmatpush.bf16.msra.mxu0 %v6780_v22  ;;  %4284 = vmatpush.bf16.msra.mxu1 %v6908_v56  ;;  %v4054_v39 = vadd.f32 %v4053_v27, %v4041_v15  ;;  %v7052_v22 = vor.u32 %v8044_v35, %v7051_v30  ;;  %v7180_v56 = vor.u32 %v8076_v53, %v7179_v31 }
 0x279   :  { %4293 = vmatpush.bf16.msra.mxu2 %v7100_v41  ;;  %4306 = vmatpush.bf16.msra.mxu3 %v7228_v42  ;;  %v7163_v41 = vld [vmem:[#allocation4 + $0xf28] sm:$0xf]  ;;  %v8072_v42 = vld [vmem:[#allocation4 + $0xf34] sm:$0xf0]  ;;  %v5280_v35 = vor.u32 %v7598_v10, %v5277_v11  ;;  %v5408_v15 = vor.u32 %v7630_v20, %v5405_v57  ;;  %v7698_v10 = vld [vmem:[#allocation4 + $0x38c] sm:$0xf] }
 0x27a   :  { %v7164_v51 = vor.u32 %v8072_v42, %v7163_v41  ;;  %v5245_v41 = vld [vmem:[#allocation4 + $0x38] sm:$0xf0]  ;;  %v7742_v20 = vld [vmem:[#allocation4 + $0x4ec] sm:$0xf] }
 0x27b   :  { %v5677_v11 = vld [vmem:[#allocation4 + $0x398] sm:$0xf0] }
 0x27c   :  { %4272 = vmatpush.bf16.msra.mxu0 %v6764_v5  ;;  %4285 = vmatpush.bf16.msra.mxu1 %v6892_v8  ;;  %v4066_v59 = vpop.f32.mrf.mxu0  ;;  %v4079_v62 = vpop.f32.mrf.mxu1  ;;  %v5853_v57 = vld [vmem:[#allocation4 + $0x4f8] sm:$0xf0] }
 0x27d   :  { %4294 = vmatpush.bf16.msra.mxu2 %v7084_v13  ;;  %4307 = vmatpush.bf16.msra.mxu3 %v7212_v4  ;;  %v4067_v2 = vadd.f32 %v4066_v59, %v4054_v39  ;;  %v4042_v5 = vpop.f32.mrf.mxu2  ;;  %v4055_v8 = vpop.f32.mrf.mxu3  ;;  %v7019_v13 = vld [vmem:[#allocation4 + $0xe08] sm:$0xf]  ;;  %v8036_v4 = vld [vmem:[#allocation4 + $0xe14] sm:$0xf0]  ;;  %v5565_v59 = vld [vmem:[#allocation4 + $0x2b8] sm:$0xf0] }
 0x27e   :  { %v7020_v27 = vor.u32 %v8036_v4, %v7019_v13  ;;  %v7586_v5 = vld [vmem:[#allocation4 + $0xc] sm:$0xf]  ;;  %v5229_v8 = vld [vmem:[#allocation4 + $0x18] sm:$0xf0] }
 0x27f   :  { %4273 = vmatmul.bf16.vlgmr.msra.gmra.mxu0 %v8552_v6  ;;  %4286 = vmatmul.bf16.vlgmr.msra.gmra.mxu1 %v8554_v7  ;;  %v8619_v12 = vadd.f32 %v4079_v62, %v4067_v2  ;;  %v7702_v62 = vld [vmem:[#allocation4 + $0x3ac] sm:$0xf]  ;;  %v5693_v2 = vld [vmem:[#allocation4 + $0x3b8] sm:$0xf0] }
 0x280   :  { %4317 = vmatpush.bf16.msrb.mxu0 %v5344_v9  ;;  %4330 = vmatpush.bf16.msrb.mxu1 %v5472_v61  ;;  %v5424_v9 = vor.u32 %v7634_v47, %v5421_v49  ;;  %v8068_v61 = vld [vmem:[#allocation4 + $0xf14] sm:$0xf0]  ;;  %v5373_v47 = vld [vmem:[#allocation4 + $0x138] sm:$0xf0]  ;;  %v7670_v49 = vld [vmem:[#allocation4 + $0x2ac] sm:$0xf] }
 0x281   :  { %4295 = vmatpush.bf16.msra.mxu2 %v7068_v18  ;;  %4308 = vmatpush.bf16.msra.mxu3 %v7196_v25  ;;  %v5597_v18 = vld [vmem:[#allocation4 + $0x2f8] sm:$0xf0]  ;;  %v7710_v25 = vld [vmem:[#allocation4 + $0x3ec] sm:$0xf]  ;;  %v7148_v30 = vor.u32 %v8068_v61, %v7147_v14  ;;  %v5568_v4 = vor.u32 %v7670_v49, %v5565_v59  ;;  %v5696_v14 = vor.u32 %v7702_v62, %v5693_v2 }
 0x282   :  { %v5600_v31 = vor.u32 %v7678_v17, %v5597_v18  ;;  %v5728_v53 = vor.u32 %v7710_v25, %v5725_v26  ;;  %v7618_v13 = vld [vmem:[#allocation4 + $0x10c] sm:$0xf]  ;;  %v5549_v61 = vld [vmem:[#allocation4 + $0x298] sm:$0xf0]  ;;  %v5232_v25 = vor.u32 %v7586_v5, %v5229_v8  ;;  %v8193_v5 = vld [vmem:[#allocation9 + $0x10] sm:$0xf] }
 0x283   :  { %v7774_v17 = vld [vmem:[#allocation4 + $0x5ec] sm:$0xf]  ;;  %v5981_v18 = vld [vmem:[#allocation4 + $0x5f8] sm:$0xf0] }
 0x284   :  { %4318 = vmatpush.bf16.msrb.mxu0 %v5328_v52  ;;  %4331 = vmatpush.bf16.msrb.mxu1 %v5456_v19  ;;  %v7594_v52 = vld [vmem:[#allocation4 + $0x4c] sm:$0xf]  ;;  %v5261_v19 = vld [vmem:[#allocation4 + $0x58] sm:$0xf0]  ;;  %v4068_v36 = vpop.f32.mrf.mxu0  ;;  %v4081_v39 = vpop.f32.mrf.mxu1 }
 0x285   :  { %4296 = vmatpush.bf16.msra.mxu2 %v7052_v22  ;;  %4309 = vmatpush.bf16.msra.mxu3 %v7180_v56  ;;  %v5581_v22 = vld [vmem:[#allocation4 + $0x2d8] sm:$0xf0]  ;;  %v7706_v56 = vld [vmem:[#allocation4 + $0x3cc] sm:$0xf]  ;;  %v5264_v1 = vor.u32 %v7594_v52, %v5261_v19  ;;  %v5856_v52 = vor.u32 %v7742_v20, %v5853_v57  ;;  %v5984_v19 = vor.u32 %v7774_v17, %v5981_v18 }
 0x286   :  { %v5584_v42 = vor.u32 %v7674_v34, %v5581_v22  ;;  %v5712_v43 = vor.u32 %v7706_v56, %v5709_v40  ;;  %v7770_v34 = vld [vmem:[#allocation4 + $0x5cc] sm:$0xf]  ;;  %v5965_v36 = vld [vmem:[#allocation4 + $0x5d8] sm:$0xf0] }
 0x287   :  { %v5821_v49 = vld [vmem:[#allocation4 + $0x4b8] sm:$0xf0]  ;;  %v7766_v59 = vld [vmem:[#allocation4 + $0x5ac] sm:$0xf] }
 0x288   :  { %4319 = vmatpush.bf16.msrb.mxu0 %v5312_v60  ;;  %4332 = vmatpush.bf16.msrb.mxu1 %v5440_v50  ;;  %v5392_v60 = vor.u32 %v7626_v32, %v5389_v33  ;;  %v7590_v50 = vld [vmem:[#allocation4 + $0x2c] sm:$0xf]  ;;  %v5837_v33 = vld [vmem:[#allocation4 + $0x4d8] sm:$0xf0] }
 0x289   :  { %4297 = vmatpush.bf16.msra.mxu2 %v7036_v3  ;;  %4310 = vmatpush.bf16.msra.mxu3 %v7164_v51  ;;  %v5248_v3 = vor.u32 %v7590_v50, %v5245_v41  ;;  %v5376_v51 = vor.u32 %v7622_v44, %v5373_v47  ;;  %v7738_v32 = vld [vmem:[#allocation4 + $0x4cc] sm:$0xf]  ;;  %v5645_v44 = vld [vmem:[#allocation4 + $0x358] sm:$0xf0] }
 0x28a   :  { %v5840_v41 = vor.u32 %v7738_v32, %v5837_v33  ;;  %v7734_v47 = vld [vmem:[#allocation4 + $0x4ac] sm:$0xf]  ;;  %v5949_v62 = vld [vmem:[#allocation4 + $0x5b8] sm:$0xf0] }
 0x28b   :  { %v7654_v8 = vld [vmem:[#allocation4 + $0x22c] sm:$0xf] }
 0x28c   :  { %4320 = vmatpush.bf16.msrb.mxu0 %v5296_v48  ;;  %4333 = vmatpush.bf16.msrb.mxu1 %v5424_v9  ;;  %v5357_v48 = vld [vmem:[#allocation4 + $0x118] sm:$0xf0]  ;;  %v7666_v9 = vld [vmem:[#allocation4 + $0x28c] sm:$0xf] }
 0x28d   :  { %4298 = vmatpush.bf16.msra.mxu2 %v7020_v27  ;;  %4311 = vmatpush.bf16.msra.mxu3 %v7148_v30  ;;  %v5360_v26 = vor.u32 %v7618_v13, %v5357_v48  ;;  %v5552_v27 = vor.u32 %v7666_v9, %v5549_v61  ;;  %v5680_v30 = vor.u32 %v7698_v10, %v5677_v11  ;;  %v5501_v13 = vld [vmem:[#allocation4 + $0x238] sm:$0xf0]  ;;  %v7762_v61 = vld [vmem:[#allocation4 + $0x58c] sm:$0xf] }
 0x28e   :  { %v5629_v48 = vld [vmem:[#allocation4 + $0x338] sm:$0xf0]  ;;  %v5504_v17 = vor.u32 %v7654_v8, %v5501_v13  ;;  %v7758_v33 = vld [vmem:[#allocation4 + $0x56c] sm:$0xf] }
 0x28f   :  { %v5805_v9 = vld [vmem:[#allocation4 + $0x498] sm:$0xf0] }
 0x290   :  { %4321 = vmatpush.bf16.msrb.mxu0 %v5280_v35  ;;  %4334 = vmatpush.bf16.msrb.mxu1 %v5408_v15  ;;  %v7662_v35 = vld [vmem:[#allocation4 + $0x26c] sm:$0xf]  ;;  %v5533_v15 = vld [vmem:[#allocation4 + $0x278] sm:$0xf0] }
 0x291   :  { %4343 = vmatpush.bf16.msrb.mxu2 %v5600_v31  ;;  %4356 = vmatpush.bf16.msrb.mxu3 %v5728_v53  ;;  %v7694_v31 = vld [vmem:[#allocation4 + $0x36c] sm:$0xf]  ;;  %v5661_v53 = vld [vmem:[#allocation4 + $0x378] sm:$0xf0]  ;;  %v5536_v39 = vor.u32 %v7662_v35, %v5533_v15 }
 0x292   :  { %4299 = vmatmul.bf16.vlgmr.msra.gmra.mxu2 %v8562_v21  ;;  %4312 = vmatmul.bf16.vlgmr.msra.gmra.mxu3 %v8564_v24  ;;  %v5664_v22 = vor.u32 %v7694_v31, %v5661_v53  ;;  %v5933_v10 = vld [vmem:[#allocation4 + $0x598] sm:$0xf0]  ;;  %v7682_v35 = vld [vmem:[#allocation4 + $0x30c] sm:$0xf] }
 0x293   :  { %v7726_v31 = vld [vmem:[#allocation4 + $0x46c] sm:$0xf]  ;;  %v5789_v53 = vld [vmem:[#allocation4 + $0x478] sm:$0xf0] }
 0x294   :  { %4322 = vmatpush.bf16.msrb.mxu0 %v5264_v1  ;;  %4335 = vmatpush.bf16.msrb.mxu1 %v5392_v60  ;;  %v7658_v1 = vld [vmem:[#allocation4 + $0x24c] sm:$0xf]  ;;  %v5517_v60 = vld [vmem:[#allocation4 + $0x258] sm:$0xf0] }
 0x295   :  { %4344 = vmatpush.bf16.msrb.mxu2 %v5584_v42  ;;  %4357 = vmatpush.bf16.msrb.mxu3 %v5712_v43  ;;  %v4092_v56 = vpop.f32.mrf.mxu2  ;;  %v4105_v40 = vpop.f32.mrf.mxu3  ;;  %v5968_v42 = vor.u32 %v7770_v34, %v5965_v36  ;;  %v7690_v43 = vld [vmem:[#allocation4 + $0x34c] sm:$0xf]  ;;  %v5917_v34 = vld [vmem:[#allocation4 + $0x578] sm:$0xf0] }
 0x296   :  { %v4093_v50 = vadd.f32 %v4092_v56, %v8619_v12  ;;  %v1127_v12 = vperm.slane %v8193_v5, 2  ;;  %v7806_v36 = vld [vmem:[#allocation4 + $0x6ec] sm:$0xf]  ;;  %v6237_v56 = vld [vmem:[#allocation4 + $0x7f8] sm:$0xf0] }
 0x297   :  { %v7834_v5 = vld [vmem:[#allocation4 + $0x7cc] sm:$0xf] }
 0x298   :  { %4323 = vmatpush.bf16.msrb.mxu0 %v5248_v3  ;;  %4336 = vmatpush.bf16.msrb.mxu1 %v5376_v51  ;;  %v8626_v2 = vadd.f32 %v4105_v40, %v4093_v50  ;;  %v5520_v3 = vor.u32 %v7658_v1, %v5517_v60  ;;  %v5648_v51 = vor.u32 %v7690_v43, %v5645_v44 }
 0x299   :  { %4345 = vmatpush.bf16.msrb.mxu2 %v5568_v4  ;;  %4358 = vmatpush.bf16.msrb.mxu3 %v5696_v14  ;;  %v5824_v4 = vor.u32 %v7734_v47, %v5821_v49  ;;  %v5952_v14 = vor.u32 %v7766_v59, %v5949_v62  ;;  %v5792_v60 = vor.u32 %v7726_v31, %v5789_v53  ;;  %v7754_v47 = vld [vmem:[#allocation4 + $0x54c] sm:$0xf]  ;;  %v5901_v49 = vld [vmem:[#allocation4 + $0x558] sm:$0xf0] }
 0x29a   :  { %v5920_v50 = vor.u32 %v7758_v33, %v5917_v34  ;;  %v7802_v59 = vld [vmem:[#allocation4 + $0x6cc] sm:$0xf]  ;;  %v5904_v13 = vor.u32 %v7754_v47, %v5901_v49  ;;  %v6365_v31 = vld [vmem:[#allocation4 + $0x8f8] sm:$0xf0] }
 0x29b   :  { %v7902_v53 = vld [vmem:[#allocation4 + $0x9ec] sm:$0xf]  ;;  %v6493_v33 = vld [vmem:[#allocation4 + $0x9f8] sm:$0xf0] }
 0x29c   :  { %4324 = vmatpush.bf16.msrb.mxu0 %v5232_v25  ;;  %4337 = vmatpush.bf16.msrb.mxu1 %v5360_v26  ;;  %v4118_v11 = vpop.f32.mrf.mxu0  ;;  %v4131_v20 = vpop.f32.mrf.mxu1  ;;  %v6477_v47 = vld [vmem:[#allocation4 + $0x9d8] sm:$0xf0] }
 0x29d   :  { %4346 = vmatpush.bf16.msrb.mxu2 %v5552_v27  ;;  %4359 = vmatpush.bf16.msrb.mxu3 %v5680_v30  ;;  %v4119_v57 = vadd.f32 %v4118_v11, %v1127_v12  ;;  %v4094_v25 = vpop.f32.mrf.mxu2  ;;  %v4107_v26 = vpop.f32.mrf.mxu3  ;;  %v7650_v27 = vld [vmem:[#allocation4 + $0x20c] sm:$0xf]  ;;  %v5485_v30 = vld [vmem:[#allocation4 + $0x218] sm:$0xf0] }
 0x29e   :  { %v5488_v40 = vor.u32 %v7650_v27, %v5485_v30  ;;  %v6221_v12 = vld [vmem:[#allocation4 + $0x7d8] sm:$0xf0]  ;;  %v7830_v11 = vld [vmem:[#allocation4 + $0x7ac] sm:$0xf] }
 0x29f   :  { %4325 = vmatmul.bf16.vlgmr.msrb.gmra.mxu0 %v8486_v37  ;;  %4338 = vmatmul.bf16.vlgmr.msrb.gmra.mxu1 %v8488_v38  ;;  %v7686_v37 = vld [vmem:[#allocation4 + $0x32c] sm:$0xf]  ;;  %v8628_v32 = vadd.f32 %v4131_v20, %v4119_v57  ;;  %v6205_v20 = vld [vmem:[#allocation4 + $0x7b8] sm:$0xf0] }
 0x2a0   :  { %4369 = vmatpush.bf16.msra.mxu0 %v5856_v52  ;;  %4382 = vmatpush.bf16.msra.mxu1 %v5984_v19  ;;  %v7730_v38 = vld [vmem:[#allocation4 + $0x48c] sm:$0xf]  ;;  %v5632_v18 = vor.u32 %v7686_v37, %v5629_v48  ;;  %v5936_v52 = vor.u32 %v7762_v61, %v5933_v10  ;;  %v5613_v19 = vld [vmem:[#allocation4 + $0x318] sm:$0xf0]  ;;  %v6224_v48 = vor.u32 %v7834_v5, %v6221_v12 }
 0x2a1   :  { %4347 = vmatpush.bf16.msrb.mxu2 %v5536_v39  ;;  %4360 = vmatpush.bf16.msrb.mxu3 %v5664_v22  ;;  %v5808_v15 = vor.u32 %v7730_v38, %v5805_v9  ;;  %v6109_v39 = vld [vmem:[#allocation4 + $0x6f8] sm:$0xf0]  ;;  %v7838_v22 = vld [vmem:[#allocation4 + $0x7ec] sm:$0xf]  ;;  %v5616_v1 = vor.u32 %v7682_v35, %v5613_v19  ;;  %v6208_v30 = vor.u32 %v7830_v11, %v6205_v20 }
 0x2a2   :  { %v6112_v43 = vor.u32 %v7806_v36, %v6109_v39  ;;  %v6240_v44 = vor.u32 %v7838_v22, %v6237_v56  ;;  %v7750_v38 = vld [vmem:[#allocation4 + $0x52c] sm:$0xf]  ;;  %v5885_v9 = vld [vmem:[#allocation4 + $0x538] sm:$0xf0] }
 0x2a3   :  { %v7798_v61 = vld [vmem:[#allocation4 + $0x6ac] sm:$0xf]  ;;  %v6077_v10 = vld [vmem:[#allocation4 + $0x6b8] sm:$0xf0] }
 0x2a4   :  { %4370 = vmatpush.bf16.msra.mxu0 %v5840_v41  ;;  %4383 = vmatpush.bf16.msra.mxu1 %v5968_v42  ;;  %v7722_v41 = vld [vmem:[#allocation4 + $0x44c] sm:$0xf]  ;;  %v5773_v42 = vld [vmem:[#allocation4 + $0x458] sm:$0xf0]  ;;  %v4120_v62 = vpop.f32.mrf.mxu0  ;;  %v6080_v27 = vor.u32 %v7798_v61, %v6077_v10 }
 0x2a5   :  { %4348 = vmatpush.bf16.msrb.mxu2 %v5520_v3  ;;  %4361 = vmatpush.bf16.msrb.mxu3 %v5648_v51  ;;  %v4133_v3 = vpop.f32.mrf.mxu1  ;;  %v6093_v51 = vld [vmem:[#allocation4 + $0x6d8] sm:$0xf0]  ;;  %v5776_v8 = vor.u32 %v7722_v41, %v5773_v42  ;;  %v7746_v26 = vld [vmem:[#allocation4 + $0x50c] sm:$0xf] }
 0x2a6   :  { %v6096_v37 = vor.u32 %v7802_v59, %v6093_v51  ;;  %v5741_v25 = vld [vmem:[#allocation4 + $0x418] sm:$0xf0]  ;;  %v7790_v56 = vld [vmem:[#allocation4 + $0x66c] sm:$0xf] }
 0x2a7   :  { %v5869_v35 = vld [vmem:[#allocation4 + $0x518] sm:$0xf0]  ;;  %v7866_v42 = vld [vmem:[#allocation4 + $0x8cc] sm:$0xf] }
 0x2a8   :  { %4371 = vmatpush.bf16.msra.mxu0 %v5824_v4  ;;  %4384 = vmatpush.bf16.msra.mxu1 %v5952_v14  ;;  %v7718_v4 = vld [vmem:[#allocation4 + $0x42c] sm:$0xf]  ;;  %v5757_v14 = vld [vmem:[#allocation4 + $0x438] sm:$0xf0]  ;;  %v5872_v36 = vor.u32 %v7746_v26, %v5869_v35 }
 0x2a9   :  { %4349 = vmatpush.bf16.msrb.mxu2 %v5504_v17  ;;  %4362 = vmatpush.bf16.msrb.mxu3 %v5632_v18  ;;  %v5760_v57 = vor.u32 %v7718_v4, %v5757_v14  ;;  %v5888_v17 = vor.u32 %v7750_v38, %v5885_v9  ;;  %v7714_v18 = vld [vmem:[#allocation4 + $0x40c] sm:$0xf]  ;;  %v6189_v19 = vld [vmem:[#allocation4 + $0x798] sm:$0xf0] }
 0x2aa   :  { %v5744_v34 = vor.u32 %v7714_v18, %v5741_v25  ;;  %v6173_v41 = vld [vmem:[#allocation4 + $0x778] sm:$0xf0]  ;;  %v7786_v51 = vld [vmem:[#allocation4 + $0x64c] sm:$0xf] }
 0x2ab   :  { %v6029_v5 = vld [vmem:[#allocation4 + $0x658] sm:$0xf0]  ;;  %v7818_v4 = vld [vmem:[#allocation4 + $0x74c] sm:$0xf] }
 0x2ac   :  { %4372 = vmatpush.bf16.msra.mxu0 %v5808_v15  ;;  %4385 = vmatpush.bf16.msra.mxu1 %v5936_v52  ;;  %v7794_v15 = vld [vmem:[#allocation4 + $0x68c] sm:$0xf]  ;;  %v6061_v52 = vld [vmem:[#allocation4 + $0x698] sm:$0xf0]  ;;  %v6032_v10 = vor.u32 %v7786_v51, %v6029_v5 }
 0x2ad   :  { %4350 = vmatpush.bf16.msrb.mxu2 %v5488_v40  ;;  %4363 = vmatpush.bf16.msrb.mxu3 %v5616_v1  ;;  %v6064_v39 = vor.u32 %v7794_v15, %v6061_v52  ;;  %v6045_v40 = vld [vmem:[#allocation4 + $0x678] sm:$0xf0]  ;;  %v7894_v38 = vld [vmem:[#allocation4 + $0x9ac] sm:$0xf] }
 0x2ae   :  { %v6048_v49 = vor.u32 %v7790_v56, %v6045_v40  ;;  %v6157_v14 = vld [vmem:[#allocation4 + $0x758] sm:$0xf0]  ;;  %v7782_v20 = vld [vmem:[#allocation4 + $0x62c] sm:$0xf] }
 0x2af   :  { %v6461_v9 = vld [vmem:[#allocation4 + $0x9b8] sm:$0xf0]  ;;  %v6160_v11 = vor.u32 %v7818_v4, %v6157_v14  ;;  %v7814_v18 = vld [vmem:[#allocation4 + $0x72c] sm:$0xf] }
 0x2b0   :  { %4373 = vmatpush.bf16.msra.mxu0 %v5792_v60  ;;  %4386 = vmatpush.bf16.msra.mxu1 %v5920_v50  ;;  %v6496_v60 = vor.u32 %v7902_v53, %v6493_v33  ;;  %v7822_v50 = vld [vmem:[#allocation4 + $0x76c] sm:$0xf]  ;;  %v6141_v25 = vld [vmem:[#allocation4 + $0x738] sm:$0xf0] }
 0x2b1   :  { %4395 = vmatpush.bf16.msra.mxu2 %v6112_v43  ;;  %4408 = vmatpush.bf16.msra.mxu3 %v6240_v44  ;;  %v6349_v43 = vld [vmem:[#allocation4 + $0x8d8] sm:$0xf0]  ;;  %v7898_v44 = vld [vmem:[#allocation4 + $0x9cc] sm:$0xf]  ;;  %v6176_v59 = vor.u32 %v7822_v50, %v6173_v41 }
 0x2b2   :  { %4351 = vmatmul.bf16.vlgmr.msrb.gmra.mxu2 %v8502_v23  ;;  %4364 = vmatmul.bf16.vlgmr.msrb.gmra.mxu3 %v8504_v58  ;;  %v7826_v23 = vld [vmem:[#allocation4 + $0x78c] sm:$0xf]  ;;  %v5997_v53 = vld [vmem:[#allocation4 + $0x618] sm:$0xf0] }
 0x2b3   :  { %v7870_v58 = vld [vmem:[#allocation4 + $0x8ec] sm:$0xf]  ;;  %v6192_v22 = vor.u32 %v7826_v23, %v6189_v19  ;;  %v6144_v23 = vor.u32 %v7814_v18, %v6141_v25  ;;  %v6301_v56 = vld [vmem:[#allocation4 + $0x878] sm:$0xf0] }
 0x2b4   :  { %4374 = vmatpush.bf16.msra.mxu0 %v5776_v8  ;;  %4387 = vmatpush.bf16.msra.mxu1 %v5904_v13  ;;  %v6368_v1 = vor.u32 %v7870_v58, %v6365_v31  ;;  %v6352_v8 = vor.u32 %v7866_v42, %v6349_v43  ;;  %v6480_v13 = vor.u32 %v7898_v44, %v6477_v47  ;;  %v7858_v26 = vld [vmem:[#allocation4 + $0x88c] sm:$0xf]  ;;  %v6621_v41 = vld [vmem:[#allocation4 + $0xaf8] sm:$0xf0] }
 0x2b5   :  { %4396 = vmatpush.bf16.msra.mxu2 %v6096_v37  ;;  %4409 = vmatpush.bf16.msra.mxu3 %v6224_v48  ;;  %v4144_v62 = vpop.f32.mrf.mxu2  ;;  %v4157_v3 = vpop.f32.mrf.mxu3  ;;  %v7862_v37 = vld [vmem:[#allocation4 + $0x8ac] sm:$0xf]  ;;  %v6333_v48 = vld [vmem:[#allocation4 + $0x8b8] sm:$0xf0] }
 0x2b6   :  { %v4145_v12 = vadd.f32 %v4144_v62, %v8628_v32  ;;  %v6336_v32 = vor.u32 %v7862_v37, %v6333_v48  ;;  %v7778_v31 = vld [vmem:[#allocation4 + $0x60c] sm:$0xf]  ;;  %v6749_v43 = vld [vmem:[#allocation4 + $0xbf8] sm:$0xf0] }
 0x2b7   :  { %v7810_v33 = vld [vmem:[#allocation4 + $0x70c] sm:$0xf]  ;;  %v6000_v44 = vor.u32 %v7778_v31, %v5997_v53  ;;  %v6605_v37 = vld [vmem:[#allocation4 + $0xad8] sm:$0xf0] }
 0x2b8   :  { %4375 = vmatpush.bf16.msra.mxu0 %v5760_v57  ;;  %4388 = vmatpush.bf16.msra.mxu1 %v5888_v17  ;;  %v4158_v61 = vadd.f32 %v4157_v3, %v4145_v12  ;;  %v6013_v57 = vld [vmem:[#allocation4 + $0x638] sm:$0xf0]  ;;  %v6464_v17 = vor.u32 %v7894_v38, %v6461_v9  ;;  %v7934_v50 = vld [vmem:[#allocation4 + $0xaec] sm:$0xf] }
 0x2b9   :  { %4397 = vmatpush.bf16.msra.mxu2 %v6080_v27  ;;  %4410 = vmatpush.bf16.msra.mxu3 %v6208_v30  ;;  %v7890_v27 = vld [vmem:[#allocation4 + $0x98c] sm:$0xf]  ;;  %v6016_v52 = vor.u32 %v7782_v20, %v6013_v57  ;;  %v6285_v3 = vld [vmem:[#allocation4 + $0x858] sm:$0xf0]  ;;  %v6624_v51 = vor.u32 %v7934_v50, %v6621_v41 }
 0x2ba   :  { %v7966_v42 = vld [vmem:[#allocation4 + $0xbec] sm:$0xf]  ;;  %v6733_v38 = vld [vmem:[#allocation4 + $0xbd8] sm:$0xf0] }
 0x2bb   :  { %v7850_v62 = vld [vmem:[#allocation4 + $0x84c] sm:$0xf]  ;;  %v6752_v5 = vor.u32 %v7966_v42, %v6749_v43  ;;  %v6589_v25 = vld [vmem:[#allocation4 + $0xab8] sm:$0xf0] }
 0x2bc   :  { %4376 = vmatpush.bf16.msra.mxu0 %v5744_v34  ;;  %4389 = vmatpush.bf16.msra.mxu1 %v5872_v36  ;;  %v4170_v30 = vpop.f32.mrf.mxu0  ;;  %v4183_v35 = vpop.f32.mrf.mxu1  ;;  %v7882_v12 = vld [vmem:[#allocation4 + $0x94c] sm:$0xf]  ;;  %v6288_v9 = vor.u32 %v7850_v62, %v6285_v3  ;;  %v6573_v31 = vld [vmem:[#allocation4 + $0xa98] sm:$0xf0] }
 0x2bd   :  { %4398 = vmatpush.bf16.msra.mxu2 %v6064_v39  ;;  %4411 = vmatpush.bf16.msra.mxu3 %v6192_v22  ;;  %v4171_v15 = vadd.f32 %v4170_v30, %v4158_v61  ;;  %v4146_v19 = vpop.f32.mrf.mxu2  ;;  %v4159_v58 = vpop.f32.mrf.mxu3  ;;  %v6125_v39 = vld [vmem:[#allocation4 + $0x718] sm:$0xf0]  ;;  %v7854_v22 = vld [vmem:[#allocation4 + $0x86c] sm:$0xf] }
 0x2be   :  { %v6128_v47 = vor.u32 %v7810_v33, %v6125_v39  ;;  %v7962_v48 = vld [vmem:[#allocation4 + $0xbcc] sm:$0xf]  ;;  %v6381_v19 = vld [vmem:[#allocation4 + $0x918] sm:$0xf0] }
 0x2bf   :  { %4377 = vmatmul.bf16.vlgmr.msra.gmra.mxu0 %v8506_v28  ;;  %4390 = vmatmul.bf16.vlgmr.msra.gmra.mxu1 %v8508_v29  ;;  %v6317_v28 = vld [vmem:[#allocation4 + $0x898] sm:$0xf0]  ;;  %v8635_v40 = vadd.f32 %v4183_v35, %v4171_v15  ;;  %v6736_v57 = vor.u32 %v7962_v48, %v6733_v38  ;;  %v7926_v18 = vld [vmem:[#allocation4 + $0xaac] sm:$0xf] }
 0x2c0   :  { %4421 = vmatpush.bf16.msrb.mxu0 %v6368_v1  ;;  %4434 = vmatpush.bf16.msrb.mxu1 %v6496_v60  ;;  %v6445_v29 = vld [vmem:[#allocation4 + $0x998] sm:$0xf0]  ;;  %v6320_v34 = vor.u32 %v7858_v26, %v6317_v28  ;;  %v7886_v1 = vld [vmem:[#allocation4 + $0x96c] sm:$0xf] }
 0x2c1   :  { %4399 = vmatpush.bf16.msra.mxu2 %v6048_v49  ;;  %4412 = vmatpush.bf16.msra.mxu3 %v6176_v59  ;;  %v6448_v36 = vor.u32 %v7890_v27, %v6445_v29  ;;  %v6429_v60 = vld [vmem:[#allocation4 + $0x978] sm:$0xf0]  ;;  %v6304_v49 = vor.u32 %v7854_v22, %v6301_v56  ;;  %v7958_v26 = vld [vmem:[#allocation4 + $0xbac] sm:$0xf] }
 0x2c2   :  { %v6432_v59 = vor.u32 %v7886_v1, %v6429_v60  ;;  %v6717_v28 = vld [vmem:[#allocation4 + $0xbb8] sm:$0xf0]  ;;  %v7842_v30 = vld [vmem:[#allocation4 + $0x80c] sm:$0xf] }
 0x2c3   :  { %v6253_v35 = vld [vmem:[#allocation4 + $0x818] sm:$0xf0]  ;;  %v7874_v15 = vld [vmem:[#allocation4 + $0x90c] sm:$0xf] }
 0x2c4   :  { %4422 = vmatpush.bf16.msrb.mxu0 %v6352_v8  ;;  %4435 = vmatpush.bf16.msrb.mxu1 %v6480_v13  ;;  %v6413_v8 = vld [vmem:[#allocation4 + $0x958] sm:$0xf0]  ;;  %v7930_v13 = vld [vmem:[#allocation4 + $0xacc] sm:$0xf]  ;;  %v4172_v4 = vpop.f32.mrf.mxu0  ;;  %v4185_v14 = vpop.f32.mrf.mxu1  ;;  %v6256_v39 = vor.u32 %v7842_v30, %v6253_v35  ;;  %v6384_v22 = vor.u32 %v7874_v15, %v6381_v19 }
 0x2c5   :  { %4400 = vmatpush.bf16.msra.mxu2 %v6032_v10  ;;  %4413 = vmatpush.bf16.msra.mxu3 %v6160_v11  ;;  %v6416_v61 = vor.u32 %v7882_v12, %v6413_v8  ;;  %v7846_v10 = vld [vmem:[#allocation4 + $0x82c] sm:$0xf]  ;;  %v6269_v11 = vld [vmem:[#allocation4 + $0x838] sm:$0xf0]  ;;  %v6608_v20 = vor.u32 %v7930_v13, %v6605_v37 }
 0x2c6   :  { %v6272_v27 = vor.u32 %v7846_v10, %v6269_v11  ;;  %v7922_v58 = vld [vmem:[#allocation4 + $0xa8c] sm:$0xf]  ;;  %v6701_v53 = vld [vmem:[#allocation4 + $0xb98] sm:$0xf0] }
 0x2c7   :  { %v6877_v33 = vld [vmem:[#allocation4 + $0xcf8] sm:$0xf0]  ;;  %v6576_v56 = vor.u32 %v7922_v58, %v6573_v31  ;;  %v7918_v60 = vld [vmem:[#allocation4 + $0xa6c] sm:$0xf] }
 0x2c8   :  { %4423 = vmatpush.bf16.msrb.mxu0 %v6336_v32  ;;  %4436 = vmatpush.bf16.msrb.mxu1 %v6464_v17  ;;  %v7878_v32 = vld [vmem:[#allocation4 + $0x92c] sm:$0xf]  ;;  %v6397_v17 = vld [vmem:[#allocation4 + $0x938] sm:$0xf0] }
 0x2c9   :  { %4401 = vmatpush.bf16.msra.mxu2 %v6016_v52  ;;  %4414 = vmatpush.bf16.msra.mxu3 %v6144_v23  ;;  %v6400_v29 = vor.u32 %v7878_v32, %v6397_v17  ;;  %v6592_v52 = vor.u32 %v7926_v18, %v6589_v25  ;;  %v6720_v23 = vor.u32 %v7958_v26, %v6717_v28  ;;  %v6557_v50 = vld [vmem:[#allocation4 + $0xa78] sm:$0xf0]  ;;  %v7950_v43 = vld [vmem:[#allocation4 + $0xb6c] sm:$0xf] }
 0x2ca   :  { %v6989_v62 = vld [vmem:[#allocation4 + $0xdd8] sm:$0xf0]  ;;  %v6560_v3 = vor.u32 %v7918_v60, %v6557_v50  ;;  %v7914_v8 = vld [vmem:[#allocation4 + $0xa4c] sm:$0xf] }
 0x2cb   :  { %v6541_v13 = vld [vmem:[#allocation4 + $0xa58] sm:$0xf0]  ;;  %v7946_v37 = vld [vmem:[#allocation4 + $0xb4c] sm:$0xf] }
 0x2cc   :  { %4424 = vmatpush.bf16.msrb.mxu0 %v6320_v34  ;;  %4437 = vmatpush.bf16.msrb.mxu1 %v6448_v36  ;;  %v8030_v34 = vld [vmem:[#allocation4 + $0xdec] sm:$0xf]  ;;  %v7005_v36 = vld [vmem:[#allocation4 + $0xdf8] sm:$0xf0]  ;;  %v6544_v11 = vor.u32 %v7914_v8, %v6541_v13 }
 0x2cd   :  { %4402 = vmatpush.bf16.msra.mxu2 %v6000_v44  ;;  %4415 = vmatpush.bf16.msra.mxu3 %v6128_v47  ;;  %v7008_v42 = vor.u32 %v8030_v34, %v7005_v36  ;;  %v6685_v44 = vld [vmem:[#allocation4 + $0xb78] sm:$0xf0]  ;;  %v7994_v47 = vld [vmem:[#allocation4 + $0xccc] sm:$0xf] }
 0x2ce   :  { %v6669_v48 = vld [vmem:[#allocation4 + $0xb58] sm:$0xf0]  ;;  %v7990_v38 = vld [vmem:[#allocation4 + $0xcac] sm:$0xf] }
 0x2cf   :  { %v6973_v10 = vld [vmem:[#allocation4 + $0xdb8] sm:$0xf0]  ;;  %v7942_v25 = vld [vmem:[#allocation4 + $0xb2c] sm:$0xf] }
 0x2d0   :  { %4425 = vmatpush.bf16.msrb.mxu0 %v6304_v49  ;;  %4438 = vmatpush.bf16.msrb.mxu1 %v6432_v59  ;;  %v6861_v49 = vld [vmem:[#allocation4 + $0xcd8] sm:$0xf0]  ;;  %v8026_v59 = vld [vmem:[#allocation4 + $0xdcc] sm:$0xf] }
 0x2d1   :  { %4447 = vmatpush.bf16.msrb.mxu2 %v6624_v51  ;;  %4460 = vmatpush.bf16.msrb.mxu3 %v6752_v5  ;;  %v6688_v51 = vor.u32 %v7950_v43, %v6685_v44  ;;  %v6864_v4 = vor.u32 %v7994_v47, %v6861_v49  ;;  %v6992_v14 = vor.u32 %v8026_v59, %v6989_v62  ;;  %v6525_v32 = vld [vmem:[#allocation4 + $0xa38] sm:$0xf0]  ;;  %v7986_v28 = vld [vmem:[#allocation4 + $0xc8c] sm:$0xf] }
 0x2d2   :  { %4403 = vmatmul.bf16.vlgmr.msra.gmra.mxu2 %v8524_v45  ;;  %4416 = vmatmul.bf16.vlgmr.msra.gmra.mxu3 %v8526_v46  ;;  %v7954_v45 = vld [vmem:[#allocation4 + $0xb8c] sm:$0xf]  ;;  %v6653_v26 = vld [vmem:[#allocation4 + $0xb38] sm:$0xf0] }
 0x2d3   :  { %v7998_v46 = vld [vmem:[#allocation4 + $0xcec] sm:$0xf]  ;;  %v6704_v1 = vor.u32 %v7954_v45, %v6701_v53  ;;  %v6656_v15 = vor.u32 %v7942_v25, %v6653_v26  ;;  %v6509_v58 = vld [vmem:[#allocation4 + $0xa18] sm:$0xf0] }
 0x2d4   :  { %4426 = vmatpush.bf16.msrb.mxu0 %v6288_v9  ;;  %4439 = vmatpush.bf16.msrb.mxu1 %v6416_v61  ;;  %v6880_v41 = vor.u32 %v7998_v46, %v6877_v33  ;;  %v6845_v9 = vld [vmem:[#allocation4 + $0xcb8] sm:$0xf0]  ;;  %v8022_v61 = vld [vmem:[#allocation4 + $0xdac] sm:$0xf] }
 0x2d5   :  { %4448 = vmatpush.bf16.msrb.mxu2 %v6608_v20  ;;  %4461 = vmatpush.bf16.msrb.mxu3 %v6736_v57  ;;  %v8639_v5 = vpop.f32.mrf.mxu2  ;;  %v8641_v12 = vpop.f32.mrf.mxu3  ;;  %v6672_v20 = vor.u32 %v7946_v37, %v6669_v48  ;;  %v7910_v57 = vld [vmem:[#allocation4 + $0xa2c] sm:$0xf]  ;;  %v6848_v17 = vor.u32 %v7990_v38, %v6845_v9  ;;  %v6976_v18 = vor.u32 %v8022_v61, %v6973_v10  ;;  %v6637_v46 = vld [vmem:[#allocation4 + $0xb18] sm:$0xf0] }
 0x2d6   :  { %v6528_v35 = vor.u32 %v7910_v57, %v6525_v32  ;;  %v7906_v19 = vld [vmem:[#allocation4 + $0xa0c] sm:$0xf]  ;;  %v6813_v34 = vld [vmem:[#allocation4 + $0xc78] sm:$0xf0] }
 0x2d7   :  { %v7938_v31 = vld [vmem:[#allocation4 + $0xb0c] sm:$0xf]  ;;  %v7261_v60 = vld [vmem:[#allocation4 + $0xff8] sm:$0xf0]  ;;  %v6512_v50 = vor.u32 %v7906_v19, %v6509_v58 }
 0x2d8   :  { %4427 = vmatpush.bf16.msrb.mxu0 %v6272_v27  ;;  %4440 = vmatpush.bf16.msrb.mxu1 %v6400_v29  ;;  %v6829_v27 = vld [vmem:[#allocation4 + $0xc98] sm:$0xf0]  ;;  %v7982_v33 = vld [vmem:[#allocation4 + $0xc6c] sm:$0xf] }
 0x2d9   :  { %4449 = vmatpush.bf16.msrb.mxu2 %v6592_v52  ;;  %4462 = vmatpush.bf16.msrb.mxu3 %v6720_v23  ;;  %v6957_v29 = vld [vmem:[#allocation4 + $0xd98] sm:$0xf0]  ;;  %v6832_v45 = vor.u32 %v7986_v28, %v6829_v27  ;;  %v8014_v36 = vld [vmem:[#allocation4 + $0xd6c] sm:$0xf] }
 0x2da   :  { %v7978_v44 = vld [vmem:[#allocation4 + $0xc4c] sm:$0xf]  ;;  %v6797_v47 = vld [vmem:[#allocation4 + $0xc58] sm:$0xf0] }
 0x2db   :  { %v8010_v62 = vld [vmem:[#allocation4 + $0xd4c] sm:$0xf]  ;;  %v7245_v37 = vld [vmem:[#allocation4 + $0xfd8] sm:$0xf0]  ;;  %v6800_v48 = vor.u32 %v7978_v44, %v6797_v47  ;;  %v8126_v44 = vld [vmem:[#allocation6 + $0xe4] sm:$0xf0] }
 0x2dc   :  { %4428 = vmatpush.bf16.msrb.mxu0 %v6256_v39  ;;  %4441 = vmatpush.bf16.msrb.mxu1 %v6384_v22  ;;  %v8647_v30 = vpop.f32.mrf.mxu1  ;;  %v6941_v39 = vld [vmem:[#allocation4 + $0xd78] sm:$0xf0]  ;;  %v8062_v22 = vld [vmem:[#allocation4 + $0xeec] sm:$0xf] }
 0x2dd   :  { %4450 = vmatpush.bf16.msrb.mxu2 %v6576_v56  ;;  %4463 = vmatpush.bf16.msrb.mxu3 %v6704_v1  ;;  %v4198_v52 = vpop.f32.mrf.mxu2  ;;  %v4211_v23 = vpop.f32.mrf.mxu3  ;;  %v7133_v56 = vld [vmem:[#allocation4 + $0xef8] sm:$0xf0]  ;;  %v8094_v1 = vld [vmem:[#allocation4 + $0xfec] sm:$0xf]  ;;  %v6944_v43 = vor.u32 %v8014_v36, %v6941_v39 }
 0x2de   :  { %v7136_v49 = vor.u32 %v8062_v22, %v7133_v56  ;;  %v7264_v59 = vor.u32 %v8094_v1, %v7261_v60  ;;  %v7974_v9 = vld [vmem:[#allocation4 + $0xc2c] sm:$0xf]  ;;  %v6781_v61 = vld [vmem:[#allocation4 + $0xc38] sm:$0xf0] }
 0x2df   :  { %4429 = vmatmul.bf16.vlgmr.msrb.gmra.mxu0 %v8528_v54  ;;  %4442 = vmatmul.bf16.vlgmr.msrb.gmra.mxu1 %v8530_v55  ;;  %v8018_v54 = vld [vmem:[#allocation4 + $0xd8c] sm:$0xf]  ;;  %v8645_v55 = vpop.f32.mrf.mxu0  ;;  %v6909_v57 = vld [vmem:[#allocation4 + $0xd38] sm:$0xf0]  ;;  %v6784_v26 = vor.u32 %v7974_v9, %v6781_v61  ;;  %v8124_v9 = vld [vmem:[#allocation6 + $0xd4] sm:$0xf0] }
 0x2e0   :  { %4473 = vmatpush.bf16.msra.mxu0 %v6880_v41  ;;  %4486 = vmatpush.bf16.msra.mxu1 %v7008_v42  ;;  %v6960_v53 = vor.u32 %v8018_v54, %v6957_v29  ;;  %v6640_v41 = vor.u32 %v7938_v31, %v6637_v46  ;;  %v6816_v42 = vor.u32 %v7982_v33, %v6813_v34  ;;  %v8054_v32 = vld [vmem:[#allocation4 + $0xeac] sm:$0xf]  ;;  %v7229_v25 = vld [vmem:[#allocation4 + $0xfb8] sm:$0xf0]  ;;  %v8112_v31 = vld [vmem:[#allocation6 + $0x74] sm:$0xf0] }
 0x2e1   :  { %4451 = vmatpush.bf16.msrb.mxu2 %v6560_v3  ;;  %4464 = vmatpush.bf16.msrb.mxu3 %v6688_v51  ;;  %v6925_v3 = vld [vmem:[#allocation4 + $0xd58] sm:$0xf0]  ;;  %v8058_v51 = vld [vmem:[#allocation4 + $0xecc] sm:$0xf] }
 0x2e2   :  { %v6928_v38 = vor.u32 %v8010_v62, %v6925_v3  ;;  %v7970_v27 = vld [vmem:[#allocation4 + $0xc0c] sm:$0xf]  ;;  %v6765_v54 = vld [vmem:[#allocation4 + $0xc18] sm:$0xf0] }
 0x2e3   :  { %v8002_v29 = vld [vmem:[#allocation4 + $0xd0c] sm:$0xf]  ;;  %v6893_v52 = vld [vmem:[#allocation4 + $0xd18] sm:$0xf0]  ;;  %v6768_v46 = vor.u32 %v7970_v27, %v6765_v54 }
 0x2e4   :  { %4474 = vmatpush.bf16.msra.mxu0 %v6864_v4  ;;  %4487 = vmatpush.bf16.msra.mxu1 %v6992_v14  ;;  %v4237_v13 = vpop.f32.mrf.mxu1  ;;  %v7117_v4 = vld [vmem:[#allocation4 + $0xed8] sm:$0xf0]  ;;  %v8090_v14 = vld [vmem:[#allocation4 + $0xfcc] sm:$0xf]  ;;  %v6896_v33 = vor.u32 %v8002_v29, %v6893_v52 }
 0x2e5   :  { %4452 = vmatpush.bf16.msrb.mxu2 %v6544_v11  ;;  %4465 = vmatpush.bf16.msrb.mxu3 %v6672_v20  ;;  %v7120_v10 = vor.u32 %v8058_v51, %v7117_v4  ;;  %v7248_v11 = vor.u32 %v8090_v14, %v7245_v37  ;;  %v8006_v20 = vld [vmem:[#allocation4 + $0xd2c] sm:$0xf]  ;;  %v7085_v19 = vld [vmem:[#allocation4 + $0xe98] sm:$0xf0]  ;;  %v7307_v37 = vld [vmem:[#allocation6 + $0x50] sm:$0xf] }
 0x2e6   :  { %v6912_v28 = vor.u32 %v8006_v20, %v6909_v57  ;;  %v8050_v23 = vld [vmem:[#allocation4 + $0xe8c] sm:$0xf]  ;;  %v7213_v58 = vld [vmem:[#allocation4 + $0xf98] sm:$0xf0] }
 0x2e7   :  { %v4224_v8 = vpop.f32.mrf.mxu0  ;;  %v7088_v34 = vor.u32 %v8050_v23, %v7085_v19  ;;  %v8046_v39 = vld [vmem:[#allocation4 + $0xe6c] sm:$0xf]  ;;  %v7069_v22 = vld [vmem:[#allocation4 + $0xe78] sm:$0xf0] }
 0x2e8   :  { %4475 = vmatpush.bf16.msra.mxu0 %v6848_v17  ;;  %4488 = vmatpush.bf16.msra.mxu1 %v6976_v18  ;;  %v7101_v17 = vld [vmem:[#allocation4 + $0xeb8] sm:$0xf0]  ;;  %v8086_v18 = vld [vmem:[#allocation4 + $0xfac] sm:$0xf]  ;;  %v7072_v47 = vor.u32 %v8046_v39, %v7069_v22 }
 0x2e9   :  { %4453 = vmatpush.bf16.msrb.mxu2 %v6528_v35  ;;  %4466 = vmatpush.bf16.msrb.mxu3 %v6656_v15  ;;  %v7104_v35 = vor.u32 %v8054_v32, %v7101_v17  ;;  %v7232_v15 = vor.u32 %v8086_v18, %v7229_v25  ;;  %v8078_v60 = vld [vmem:[#allocation4 + $0xf6c] sm:$0xf]  ;;  %v7053_v51 = vld [vmem:[#allocation4 + $0xe58] sm:$0xf0]  ;;  %v7299_v25 = vld [vmem:[#allocation6 + $0x40] sm:$0xf] }
 0x2ea   :  { %v8042_v3 = vld [vmem:[#allocation4 + $0xe4c] sm:$0xf]  ;;  %v7181_v14 = vld [vmem:[#allocation4 + $0xf58] sm:$0xf0] }
 0x2eb   :  { %v8074_v4 = vld [vmem:[#allocation4 + $0xf4c] sm:$0xf]  ;;  %v7056_v61 = vor.u32 %v8042_v3, %v7053_v51  ;;  %v7037_v20 = vld [vmem:[#allocation4 + $0xe38] sm:$0xf0] }
 0x2ec   :  { %4476 = vmatpush.bf16.msra.mxu0 %v6832_v45  ;;  %4489 = vmatpush.bf16.msra.mxu1 %v6960_v53  ;;  %v7387_v45 = vld [vmem:[#allocation6 + $0xf0] sm:$0xf]  ;;  %v8128_v53 = vld [vmem:[#allocation6 + $0xf4] sm:$0xf0]  ;;  %v8070_v17 = vld [vmem:[#allocation4 + $0xf2c] sm:$0xf] }
 0x2ed   :  { %4454 = vmatpush.bf16.msrb.mxu2 %v6512_v50  ;;  %4467 = vmatpush.bf16.msrb.mxu3 %v6640_v41  ;;  %v7388_v1 = vor.u32 %v8128_v53, %v7387_v45  ;;  %v7197_v50 = vld [vmem:[#allocation4 + $0xf78] sm:$0xf0]  ;;  %v7315_v41 = vld [vmem:[#allocation6 + $0x60] sm:$0xf]  ;;  %v8034_v52 = vld [vmem:[#allocation4 + $0xe0c] sm:$0xf] }
 0x2ee   :  { %v7165_v18 = vld [vmem:[#allocation4 + $0xf38] sm:$0xf0]  ;;  %v8104_v45 = vld [vmem:[#allocation6 + $0x34] sm:$0xf0]  ;;  %v7355_v53 = vld [vmem:[#allocation6 + $0xb0] sm:$0xf] }
 0x2ef   :  { %v7168_v29 = vor.u32 %v8070_v17, %v7165_v18  ;;  %v7021_v23 = vld [vmem:[#allocation4 + $0xe18] sm:$0xf0]  ;;  %v7427_v17 = vld [vmem:[#allocation6 + $0x140] sm:$0xf] }
 0x2f0   :  { %4477 = vmatpush.bf16.msra.mxu0 %v6816_v42  ;;  %4490 = vmatpush.bf16.msra.mxu1 %v6944_v43  ;;  %v8110_v42 = vld [vmem:[#allocation6 + $0x64] sm:$0xf0]  ;;  %v7379_v43 = vld [vmem:[#allocation6 + $0xe0] sm:$0xf]  ;;  %v7024_v39 = vor.u32 %v8034_v52, %v7021_v23  ;;  %v7419_v52 = vld [vmem:[#allocation6 + $0x130] sm:$0xf] }
 0x2f1   :  { %4499 = vmatpush.bf16.msra.mxu2 %v7136_v49  ;;  %4512 = vmatpush.bf16.msra.mxu3 %v7264_v59  ;;  %v7200_v49 = vor.u32 %v8078_v60, %v7197_v50  ;;  %v7316_v8 = vor.u32 %v8110_v42, %v7315_v41  ;;  %v7380_v13 = vor.u32 %v8126_v44, %v7379_v43  ;;  %v7283_v60 = vld [vmem:[#allocation6 + $0x20] sm:$0xf]  ;;  %v8102_v41 = vld [vmem:[#allocation6 + $0x24] sm:$0xf0] }
 0x2f2   :  { %4455 = vmatmul.bf16.vlgmr.msrb.gmra.mxu2 %v8538_v63  ;;  %4468 = vmatmul.bf16.vlgmr.msrb.gmra.mxu3 %v8540_v0  ;;  %v8082_v63 = vld [vmem:[#allocation4 + $0xf8c] sm:$0xf]  ;;  %v7323_v0 = vld [vmem:[#allocation6 + $0x70] sm:$0xf]  ;;  %v7347_v42 = vld [vmem:[#allocation6 + $0xa0] sm:$0xf]  ;;  %v7284_v51 = vor.u32 %v8102_v41, %v7283_v60 }
 0x2f3   :  { %v7216_v36 = vor.u32 %v8082_v63, %v7213_v58  ;;  %v7324_v56 = vor.u32 %v8112_v31, %v7323_v0  ;;  %v8066_v58 = vld [vmem:[#allocation4 + $0xf0c] sm:$0xf]  ;;  %v7149_v0 = vld [vmem:[#allocation4 + $0xf18] sm:$0xf0]  ;;  %v7291_v31 = vld [vmem:[#allocation6 + $0x30] sm:$0xf] }
 0x2f4   :  { %4478 = vmatpush.bf16.msra.mxu0 %v6800_v48  ;;  %4491 = vmatpush.bf16.msra.mxu1 %v6928_v38  ;;  %v8108_v48 = vld [vmem:[#allocation6 + $0x54] sm:$0xf0]  ;;  %v7371_v38 = vld [vmem:[#allocation6 + $0xd0] sm:$0xf]  ;;  %v7152_v22 = vor.u32 %v8066_v58, %v7149_v0  ;;  %v8118_v43 = vld [vmem:[#allocation6 + $0xa4] sm:$0xf0] }
 0x2f5   :  { %4500 = vmatpush.bf16.msra.mxu2 %v7120_v10  ;;  %4513 = vmatpush.bf16.msra.mxu3 %v7248_v11  ;;  %v8651_v59 = vpop.f32.mrf.mxu2  ;;  %v8653_v62 = vpop.f32.mrf.mxu3  ;;  %v7184_v10 = vor.u32 %v8074_v4, %v7181_v14  ;;  %v8038_v11 = vld [vmem:[#allocation4 + $0xe2c] sm:$0xf]  ;;  %v7308_v57 = vor.u32 %v8108_v48, %v7307_v37  ;;  %v7372_v32 = vor.u32 %v8124_v9, %v7371_v38  ;;  %v8100_v14 = vld [vmem:[#allocation6 + $0x14] sm:$0xf0]  ;;  %v7339_v37 = vld [vmem:[#allocation6 + $0x90] sm:$0xf] }
 0x2f6   :  { %v7040_v54 = vor.u32 %v8038_v11, %v7037_v20  ;;  %v8116_v48 = vld [vmem:[#allocation6 + $0x94] sm:$0xf0]  ;;  %v8098_v11 = vld [vmem:[#allocation6 + $0x4] sm:$0xf0]  ;;  %v7317_v58 = vld [vmem:[#allocation6 + $0x68] sm:$0xf0] }
 0x2f7   :  { %v8140_v38 = vld [vmem:[#allocation6 + $0x154] sm:$0xf0]  ;;  %v8125_v0 = vld [vmem:[#allocation6 + $0xe4] sm:$0xf] }
 0x2f8   :  { %4479 = vmatpush.bf16.msra.mxu0 %v6784_v26  ;;  %4492 = vmatpush.bf16.msra.mxu1 %v6912_v28  ;;  %v8106_v26 = vld [vmem:[#allocation6 + $0x44] sm:$0xf0] }
 0x2f9   :  { %4501 = vmatpush.bf16.msra.mxu2 %v7104_v35  ;;  %4514 = vmatpush.bf16.msra.mxu3 %v7232_v15  ;;  %v8122_v28 = vld [vmem:[#allocation6 + $0xc4] sm:$0xf0]  ;;  %v7300_v19 = vor.u32 %v8106_v26, %v7299_v25  ;;  %v8111_v25 = vld [vmem:[#allocation6 + $0x74] sm:$0xf] }
 0x2fa   :  { %v8127_v26 = vld [vmem:[#allocation6 + $0xf4] sm:$0xf] }
 0x2fc   :  { %4480 = vmatpush.bf16.msra.mxu0 %v6768_v46  ;;  %4493 = vmatpush.bf16.msra.mxu1 %v6896_v33  ;;  %v8659_v27 = vpop.f32.mrf.mxu1  ;;  %v8120_v46 = vld [vmem:[#allocation6 + $0xb4] sm:$0xf0]  ;;  %v4197_v33 = vadd.f32 %v8639_v5, %v8635_v40  ;;  %v7443_v40 = vld [vmem:[#allocation6 + $0x160] sm:$0xf]  ;;  %v8142_v5 = vld [vmem:[#allocation6 + $0x164] sm:$0xf0] }
 0x2fd   :  { %4502 = vmatpush.bf16.msra.mxu2 %v7088_v34  ;;  %4515 = vmatpush.bf16.msra.mxu3 %v7216_v36  ;;  %v4250_v35 = vpop.f32.mrf.mxu2  ;;  %v4263_v15 = vpop.f32.mrf.mxu3  ;;  %v7451_v34 = vld [vmem:[#allocation6 + $0x170] sm:$0xf]  ;;  %v8144_v36 = vld [vmem:[#allocation6 + $0x174] sm:$0xf0]  ;;  %v7444_v4 = vor.u32 %v8142_v5, %v7443_v40  ;;  %v8105_v5 = vld [vmem:[#allocation6 + $0x44] sm:$0xf] }
 0x2fe   :  { %v7452_v50 = vor.u32 %v8144_v36, %v7451_v34  ;;  %v4210_v44 = vadd.f32 %v8641_v12, %v4197_v33  ;;  %v7435_v12 = vld [vmem:[#allocation6 + $0x150] sm:$0xf]  ;;  %v7411_v34 = vld [vmem:[#allocation6 + $0x120] sm:$0xf]  ;;  %v8132_v40 = vld [vmem:[#allocation6 + $0x114] sm:$0xf0] }
 0x2ff   :  { %4481 = vmatmul.bf16.vlgmr.msra.gmra.mxu0 %v8552_v6  ;;  %4494 = vmatmul.bf16.vlgmr.msra.gmra.mxu1 %v8554_v7  ;;  %v7363_v6 = vld [vmem:[#allocation6 + $0xc0] sm:$0xf]  ;;  %v8657_v7 = vpop.f32.mrf.mxu0  ;;  %v7436_v20 = vor.u32 %v8140_v38, %v7435_v12 }
 0x300   :  { %4922 = vmatpush.bf16.msrb.mxu0 %v7324_v56  ;;  %4935 = vmatpush.bf16.msrb.mxu1 %v7388_v1  ;;  %v7364_v63 = vor.u32 %v8122_v28, %v7363_v6  ;;  %v7292_v56 = vor.u32 %v8104_v45, %v7291_v31  ;;  %v7356_v1 = vor.u32 %v8120_v46, %v7355_v53  ;;  %v7389_v6 = vld [vmem:[#allocation6 + $0xf8] sm:$0xf0]  ;;  %v7381_v31 = vld [vmem:[#allocation6 + $0xe8] sm:$0xf0]  ;;  %v7395_v38 = vld [vmem:[#allocation6 + $0x100] sm:$0xf] }
 0x301   :  { %4503 = vmatpush.bf16.msra.mxu2 %v7072_v47  ;;  %4516 = vmatpush.bf16.msra.mxu3 %v7200_v49  ;;  %v4223_v3 = vadd.f32 %v8645_v55, %v4210_v44  ;;  %v7384_v36 = vor.u32 %v8125_v0, %v7381_v31  ;;  %v7403_v44 = vld [vmem:[#allocation6 + $0x110] sm:$0xf]  ;;  %v8099_v0 = vld [vmem:[#allocation6 + $0x14] sm:$0xf]  ;;  %v7277_v31 = vld [vmem:[#allocation6 + $0x18] sm:$0xf0] }
 0x303   :  { %v4236_v9 = vadd.f32 %v8647_v30, %v4223_v3  ;;  %v4525_v30 = vmax.f32 %v8595_v16, 0.0  ;;  %v7301_v3 = vld [vmem:[#allocation6 + $0x48] sm:$0xf0] }
 0x304   :  { %4923 = vmatpush.bf16.msrb.mxu0 %v7316_v8  ;;  %4936 = vmatpush.bf16.msrb.mxu1 %v7380_v13  ;;  %v4289_v49 = vpop.f32.mrf.mxu1  ;;  %v7348_v8 = vor.u32 %v8118_v43, %v7347_v42  ;;  %v7275_v13 = vld [vmem:[#allocation6 + $0x10] sm:$0xf]  ;;  %v7304_v12 = vor.u32 %v8105_v5, %v7301_v3  ;;  %v8133_v5 = vld [vmem:[#allocation6 + $0x124] sm:$0xf]  ;;  %v7413_v3 = vld [vmem:[#allocation6 + $0x128] sm:$0xf0] }
 0x305   :  { %4504 = vmatpush.bf16.msra.mxu2 %v7056_v61  ;;  %4517 = vmatpush.bf16.msra.mxu3 %v7184_v10  ;;  %v7276_v55 = vor.u32 %v8100_v14, %v7275_v13  ;;  %v7340_v61 = vor.u32 %v8116_v48, %v7339_v37  ;;  %v7267_v10 = vld [vmem:[#allocation6] sm:$0xf]  ;;  %v4249_v18 = vadd.f32 %v8651_v59, %v4236_v9  ;;  %v8194_v42 = vld [vmem:[#allocation9 + $0x10] sm:$0xf]  ;;  %v8130_v9 = vld [vmem:[#allocation6 + $0x104] sm:$0xf0] }
 0x306   :  { %v7268_v28 = vor.u32 %v8098_v11, %v7267_v10  ;;  %v7392_v59 = vor.u32 %v8127_v26, %v7389_v6  ;;  %v8672_v45 = vpack.c.bf16 %v4525_v30, %v4525_v30  ;;  %v1128_v43 = vperm.slane %v8194_v42, 3  ;;  %v8103_v10 = vld [vmem:[#allocation6 + $0x34] sm:$0xf]  ;;  %v7293_v11 = vld [vmem:[#allocation6 + $0x38] sm:$0xf0] }
 0x307   :  { %v4276_v47 = vpop.f32.mrf.mxu0  ;;  %v4262_v23 = vadd.f32 %v8653_v62, %v4249_v18  ;;  %v7404_v14 = vor.u32 %v8132_v40, %v7403_v44  ;;  %v7453_v18 = vld [vmem:[#allocation6 + $0x178] sm:$0xf0] }
 0x308   :  { %4924 = vmatpush.bf16.msrb.mxu0 %v7308_v57  ;;  %4937 = vmatpush.bf16.msrb.mxu1 %v7372_v32  ;;  %v7331_v57 = vld [vmem:[#allocation6 + $0x80] sm:$0xf]  ;;  %v8114_v32 = vld [vmem:[#allocation6 + $0x84] sm:$0xf0]  ;;  %v7421_v44 = vld [vmem:[#allocation6 + $0x138] sm:$0xf0] }
 0x309   :  { %4505 = vmatpush.bf16.msra.mxu2 %v7040_v54  ;;  %4518 = vmatpush.bf16.msra.mxu3 %v7168_v29  ;;  %v7332_v54 = vor.u32 %v8114_v32, %v7331_v57  ;;  %v4526_v29 = vmax.f32 %v8626_v2, 0.0  ;;  %v4275_v16 = vadd.f32 %v8657_v7, %v4262_v23  ;;  %v8123_v7 = vld [vmem:[#allocation6 + $0xd4] sm:$0xf]  ;;  %v7357_v32 = vld [vmem:[#allocation6 + $0xb8] sm:$0xf0] }
 0x30b   :  { %v8675_v53 = vpack.c.bf16 %v4526_v29, %v4526_v29  ;;  %v4288_v60 = vadd.f32 %v8659_v27, %v4275_v16  ;;  %v7349_v29 = vld [vmem:[#allocation6 + $0xa8] sm:$0xf0]  ;;  %v8115_v16 = vld [vmem:[#allocation6 + $0x94] sm:$0xf] }
 0x30c   :  { %4925 = vmatpush.bf16.msrb.mxu0 %v7300_v19  ;;  %4938 = vmatpush.bf16.msrb.mxu1 %v7364_v63  ;;  %v8136_v19 = vld [vmem:[#allocation6 + $0x134] sm:$0xf0]  ;;  %v8109_v63 = vld [vmem:[#allocation6 + $0x64] sm:$0xf] }
 0x30d   :  { %4506 = vmatpush.bf16.msra.mxu2 %v7024_v39  ;;  %4519 = vmatpush.bf16.msra.mxu3 %v7152_v22  ;;  %v7420_v2 = vor.u32 %v8136_v19, %v7419_v52  ;;  %v7320_v62 = vor.u32 %v8109_v63, %v7317_v58  ;;  %v8134_v39 = vld [vmem:[#allocation6 + $0x124] sm:$0xf0]  ;;  %v8107_v22 = vld [vmem:[#allocation6 + $0x54] sm:$0xf] }
 0x310   :  { %4926 = vmatpush.bf16.msrb.mxu0 %v7292_v56  ;;  %4939 = vmatpush.bf16.msrb.mxu1 %v7356_v1  ;;  %v7309_v56 = vld [vmem:[#allocation6 + $0x58] sm:$0xf0] }
 0x311   :  { %4948 = vmatpush.bf16.msrb.mxu2 %v7452_v50  ;;  %4520 = vmatmul.bf16.vlgmr.msra.gmra.mxu3 %v8564_v24  ;;  %v7325_v24 = vld [vmem:[#allocation6 + $0x78] sm:$0xf0]  ;;  %v7412_v50 = vor.u32 %v8134_v39, %v7411_v34  ;;  %v7312_v41 = vor.u32 %v8107_v22, %v7309_v56  ;;  %v8097_v39 = vld [vmem:[#allocation6 + $0x4] sm:$0xf]  ;;  %v7269_v22 = vld [vmem:[#allocation6 + $0x8] sm:$0xf0] }
 0x312   :  { %4507 = vmatmul.bf16.vlgmr.msra.gmra.mxu2 %v8562_v21  ;;  %v8138_v21 = vld [vmem:[#allocation6 + $0x144] sm:$0xf0]  ;;  %v7328_v15 = vor.u32 %v8111_v25, %v7325_v24  ;;  %v7373_v1 = vld [vmem:[#allocation6 + $0xd8] sm:$0xf0]  ;;  %v7296_v25 = vor.u32 %v8103_v10, %v7293_v11  ;;  %v8101_v24 = vld [vmem:[#allocation6 + $0x24] sm:$0xf] }
 0x313   :  { %v7428_v35 = vor.u32 %v8138_v21, %v7427_v17  ;;  %v7376_v49 = vor.u32 %v8123_v7, %v7373_v1  ;;  %v8143_v17 = vld [vmem:[#allocation6 + $0x174] sm:$0xf]  ;;  %v7396_v21 = vor.u32 %v8130_v9, %v7395_v38  ;;  %v8113_v56 = vld [vmem:[#allocation6 + $0x84] sm:$0xf]  ;;  %v7333_v7 = vld [vmem:[#allocation6 + $0x88] sm:$0xf0] }
 0x314   :  { %4927 = vmatpush.bf16.msrb.mxu0 %v7284_v51  ;;  %4940 = vmatpush.bf16.msrb.mxu1 %v7348_v8  ;;  %v8121_v51 = vld [vmem:[#allocation6 + $0xc4] sm:$0xf]  ;;  %v7365_v8 = vld [vmem:[#allocation6 + $0xc8] sm:$0xf0]  ;;  %v7456_v30 = vor.u32 %v8143_v17, %v7453_v18  ;;  %v7515_v11 = vld [vmem:[#allocation6 + $0x1f0] sm:$0xf] }
 0x315   :  { %4949 = vmatpush.bf16.msrb.mxu2 %v7444_v4  ;;  %v4300_v46 = vpop.f32.mrf.mxu2  ;;  %v4313_v33 = vpop.f32.mrf.mxu3  ;;  %v8137_v1 = vld [vmem:[#allocation6 + $0x144] sm:$0xf] }
 0x316   :  { %v4301_v47 = vadd.f32 %v4300_v46, %v4288_v60  ;;  %v8139_v46 = vld [vmem:[#allocation6 + $0x154] sm:$0xf]  ;;  %v7429_v60 = vld [vmem:[#allocation6 + $0x148] sm:$0xf0] }
 0x317   :  { %v7432_v42 = vor.u32 %v8137_v1, %v7429_v60  ;;  %v8157_v1 = vld [vmem:[#allocation6 + $0x1e4] sm:$0xf]  ;;  %v7509_v60 = vld [vmem:[#allocation6 + $0x1e8] sm:$0xf0] }
 0x318   :  { %4928 = vmatpush.bf16.msrb.mxu0 %v7276_v55  ;;  %4941 = vmatpush.bf16.msrb.mxu1 %v7340_v61  ;;  %v4314_v55 = vadd.f32 %v4313_v33, %v4301_v47  ;;  %v7368_v61 = vor.u32 %v8121_v51, %v7365_v8  ;;  %v7437_v33 = vld [vmem:[#allocation6 + $0x158] sm:$0xf0] }
 0x319   :  { %4950 = vmatpush.bf16.msrb.mxu2 %v7436_v20  ;;  %v8119_v20 = vld [vmem:[#allocation6 + $0xb4] sm:$0xf] }
 0x31a   :  { %v4527_v26 = vmax.f32 %v4314_v55, 0.0  ;;  %v7360_v6 = vor.u32 %v8119_v20, %v7357_v32  ;;  %v8129_v55 = vld [vmem:[#allocation6 + $0x104] sm:$0xf]  ;;  %v7507_v20 = vld [vmem:[#allocation6 + $0x1e0] sm:$0xf] }
 0x31b   :  { %v8158_v32 = vld [vmem:[#allocation6 + $0x1e4] sm:$0xf0] }
 0x31c   :  { %4929 = vmatpush.bf16.msrb.mxu0 %v7268_v28  ;;  %4942 = vmatpush.bf16.msrb.mxu1 %v7332_v54  ;;  %v4326_v13 = vpop.f32.mrf.mxu0  ;;  %v4339_v4 = vpop.f32.mrf.mxu1  ;;  %v7285_v28 = vld [vmem:[#allocation6 + $0x28] sm:$0xf0]  ;;  %v8117_v54 = vld [vmem:[#allocation6 + $0xa4] sm:$0xf]  ;;  %v8682_v19 = vpack.c.bf16 %v4527_v26, %v4527_v26 }
 0x31d   :  { %4951 = vmatpush.bf16.msrb.mxu2 %v7428_v35  ;;  %v4327_v27 = vadd.f32 %v4326_v13, %v1128_v43  ;;  %v4302_v37 = vpop.f32.mrf.mxu2  ;;  %v4315_v48 = vpop.f32.mrf.mxu3  ;;  %v8141_v35 = vld [vmem:[#allocation6 + $0x164] sm:$0xf]  ;;  %v7352_v63 = vor.u32 %v8117_v54, %v7349_v29  ;;  %v8135_v43 = vld [vmem:[#allocation6 + $0x134] sm:$0xf]  ;;  %v7416_v13 = vor.u32 %v8133_v5, %v7413_v3  ;;  %v8154_v54 = vld [vmem:[#allocation6 + $0x1c4] sm:$0xf0] }
 0x31e   :  { %v7424_v47 = vor.u32 %v8135_v43, %v7421_v44  ;;  %v8151_v3 = vld [vmem:[#allocation6 + $0x1b4] sm:$0xf] }
 0x31f   :  { %4930 = vmatmul.bf16.vlgmr.msrb.gmra.mxu0 %v8672_v45  ;;  %4943 = vmatmul.bf16.vlgmr.msrb.gmra.mxu1 %v8675_v53  ;;  %v8680_v57 = vadd.f32 %v4339_v4, %v4327_v27  ;;  %v8131_v4 = vld [vmem:[#allocation6 + $0x114] sm:$0xf]  ;;  %v7405_v27 = vld [vmem:[#allocation6 + $0x118] sm:$0xf0] }
 0x320   :  { %4974 = vmatpush.bf16.msra.mxu0 %v7328_v15  ;;  %4987 = vmatpush.bf16.msra.mxu1 %v7392_v59  ;;  %v7445_v15 = vld [vmem:[#allocation6 + $0x168] sm:$0xf0]  ;;  %v7288_v59 = vor.u32 %v8101_v24, %v7285_v28  ;;  %v7408_v48 = vor.u32 %v8131_v4, %v7405_v27  ;;  %v8156_v24 = vld [vmem:[#allocation6 + $0x1d4] sm:$0xf0]  ;;  %v7491_v28 = vld [vmem:[#allocation6 + $0x1c0] sm:$0xf] }
 0x321   :  { %4952 = vmatpush.bf16.msrb.mxu2 %v7420_v2  ;;  %v7448_v58 = vor.u32 %v8141_v35, %v7445_v15  ;;  %v7341_v2 = vld [vmem:[#allocation6 + $0x98] sm:$0xf0]  ;;  %v7492_v29 = vor.u32 %v8154_v54, %v7491_v28  ;;  %v218_v28 = vld [vmem:[#allocation9 + $0x14] sm:$0x3] }
 0x322   :  { %v7344_v34 = vor.u32 %v8115_v16, %v7341_v2  ;;  %v7467_v16 = vld [vmem:[#allocation6 + $0x190] sm:$0xf]  ;;  %v8148_v2 = vld [vmem:[#allocation6 + $0x194] sm:$0xf0] }
 0x324   :  { %4975 = vmatpush.bf16.msra.mxu0 %v7320_v62  ;;  %4988 = vmatpush.bf16.msra.mxu1 %v7384_v36  ;;  %v4328_v52 = vpop.f32.mrf.mxu0  ;;  %v4341_v23 = vpop.f32.mrf.mxu1  ;;  %v7280_v62 = vor.u32 %v8099_v0, %v7277_v31  ;;  %v7440_v36 = vor.u32 %v8139_v46, %v7437_v33  ;;  %v7475_v0 = vld [vmem:[#allocation6 + $0x1a0] sm:$0xf]  ;;  %v7468_v46 = vor.u32 %v8148_v2, %v7467_v16 }
 0x325   :  { %4953 = vmatpush.bf16.msrb.mxu2 %v7412_v50  ;;  %v7272_v50 = vor.u32 %v8097_v39, %v7269_v22  ;;  %v7483_v52 = vld [vmem:[#allocation6 + $0x1b0] sm:$0xf]  ;;  %v8152_v23 = vld [vmem:[#allocation6 + $0x1b4] sm:$0xf0]  ;;  %v8159_v39 = vld [vmem:[#allocation6 + $0x1f4] sm:$0xf] }
 0x326   :  { %v7517_v22 = vld [vmem:[#allocation6 + $0x1f8] sm:$0xf0] }
 0x328   :  { %4976 = vmatpush.bf16.msra.mxu0 %v7312_v41  ;;  %4989 = vmatpush.bf16.msra.mxu1 %v7376_v49  ;;  %v7336_v41 = vor.u32 %v8113_v56, %v7333_v7  ;;  %v7520_v7 = vor.u32 %v8159_v39, %v7517_v22  ;;  %v8167_v22 = vld [vmem:[#allocation7 + $0x30] sm:$0xff] }
 0x329   :  { %4954 = vmatpush.bf16.msrb.mxu2 %v7404_v14 }
 0x32c   :  { %4977 = vmatpush.bf16.msra.mxu0 %v7304_v12  ;;  %4990 = vmatpush.bf16.msra.mxu1 %v7368_v61  ;;  %v7397_v61 = vld [vmem:[#allocation6 + $0x108] sm:$0xf0] }
 0x32d   :  { %4955 = vmatpush.bf16.msrb.mxu2 %v7396_v21  ;;  %v7508_v21 = vor.u32 %v8158_v32, %v7507_v20  ;;  %v7461_v20 = vld [vmem:[#allocation6 + $0x188] sm:$0xf0] }
 0x330   :  { %4978 = vmatpush.bf16.msra.mxu0 %v7296_v25  ;;  %4991 = vmatpush.bf16.msra.mxu1 %v7360_v6  ;;  %v7499_v25 = vld [vmem:[#allocation6 + $0x1d0] sm:$0xf] }
 0x331   :  { %5000 = vmatpush.bf16.msra.mxu2 %v7456_v30  ;;  %v7500_v30 = vor.u32 %v8156_v24, %v7499_v25 }
 0x332   :  { %4956 = vmatmul.bf16.vlgmr.msrb.gmra.mxu2 %v8682_v19 }
 0x334   :  { %4979 = vmatpush.bf16.msra.mxu0 %v7288_v59  ;;  %4992 = vmatpush.bf16.msra.mxu1 %v7352_v63 }
 0x335   :  { %5001 = vmatpush.bf16.msra.mxu2 %v7448_v58  ;;  %v4352_v49 = vpop.f32.mrf.mxu2  ;;  %v4365_v40 = vpop.f32.mrf.mxu3  ;;  %v7484_v58 = vor.u32 %v8152_v23, %v7483_v52 }
 0x336   :  { %v4353_v51 = vadd.f32 %v4352_v49, %v8680_v57  ;;  %v8153_v49 = vld [vmem:[#allocation6 + $0x1c4] sm:$0xf] }
 0x338   :  { %4980 = vmatpush.bf16.msra.mxu0 %v7280_v62  ;;  %4993 = vmatpush.bf16.msra.mxu1 %v7344_v34  ;;  %v4366_v8 = vadd.f32 %v4365_v40, %v4353_v51  ;;  %v7459_v34 = vld [vmem:[#allocation6 + $0x180] sm:$0xf]  ;;  %v7493_v40 = vld [vmem:[#allocation6 + $0x1c8] sm:$0xf0]  ;;  %v7485_v51 = vld [vmem:[#allocation6 + $0x1b8] sm:$0xf0] }
 0x339   :  { %5002 = vmatpush.bf16.msra.mxu2 %v7440_v36  ;;  %v8146_v36 = vld [vmem:[#allocation6 + $0x184] sm:$0xf0]  ;;  %v7496_v5 = vor.u32 %v8153_v49, %v7493_v40  ;;  %v7488_v27 = vor.u32 %v8151_v3, %v7485_v51  ;;  %v8161_v51 = vld [vmem:[#allocation7] sm:$0xff] }
 0x33a   :  { %v7460_v56 = vor.u32 %v8146_v36, %v7459_v34  ;;  %v8176_v34 = vld [vmem:[#allocation7 + $0x78] sm:$0xff]  ;;  %v8174_v3 = vld [vmem:[#allocation7 + $0x68] sm:$0xff] }
 0x33c   :  { %4981 = vmatpush.bf16.msra.mxu0 %v7272_v50  ;;  %4994 = vmatpush.bf16.msra.mxu1 %v7336_v41  ;;  %v4378_v14 = vpop.f32.mrf.mxu0  ;;  %v4391_v37 = vpop.f32.mrf.mxu1  ;;  %v7512_v50 = vor.u32 %v8157_v1, %v7509_v60  ;;  %v8155_v41 = vld [vmem:[#allocation6 + $0x1d4] sm:$0xf]  ;;  %v8166_v60 = vld [vmem:[#allocation7 + $0x28] sm:$0xff] }
 0x33d   :  { %5003 = vmatpush.bf16.msra.mxu2 %v7432_v42  ;;  %v4379_v12 = vadd.f32 %v4378_v14, %v4366_v8  ;;  %v4354_v38 = vpop.f32.mrf.mxu2  ;;  %v4367_v9 = vpop.f32.mrf.mxu3  ;;  %v7501_v42 = vld [vmem:[#allocation6 + $0x1d8] sm:$0xf0] }
 0x33e   :  { %v7504_v43 = vor.u32 %v8155_v41, %v7501_v42  ;;  %v8165_v42 = vld [vmem:[#allocation7 + $0x20] sm:$0xff] }
 0x33f   :  { %4982 = vmatmul.bf16.vlgmr.msra.gmra.mxu0 %v8672_v45  ;;  %4995 = vmatmul.bf16.vlgmr.msra.gmra.mxu1 %v8675_v53  ;;  %v8688_v10 = vadd.f32 %v4391_v37, %v4379_v12  ;;  %v7400_v45 = vor.u32 %v8129_v55, %v7397_v61  ;;  %v8160_v53 = vld [vmem:[#allocation6 + $0x1f4] sm:$0xf0]  ;;  %v7477_v12 = vld [vmem:[#allocation6 + $0x1a8] sm:$0xf0]  ;;  %v8147_v61 = vld [vmem:[#allocation6 + $0x194] sm:$0xf] }
 0x340   :  { %v7516_v57 = vor.u32 %v8160_v53, %v7515_v11  ;;  %v8145_v53 = vld [vmem:[#allocation6 + $0x184] sm:$0xf]  ;;  %5174 = vmatpush.bf16.msrb.mxu1 %v8176_v34 }
 0x341   :  { %5004 = vmatpush.bf16.msra.mxu2 %v7424_v47 }
 0x342   :  { %4961 = vmatpush.bf16.msrb.mxu3 %v7516_v57 }
 0x344   :  { %v4380_v17 = vpop.f32.mrf.mxu0  ;;  %v4393_v18 = vpop.f32.mrf.mxu1 }
 0x345   :  { %5005 = vmatpush.bf16.msra.mxu2 %v7416_v13  ;;  %v7464_v17 = vor.u32 %v8145_v53, %v7461_v20 }
 0x346   :  { %4962 = vmatpush.bf16.msrb.mxu3 %v7508_v21 }
 0x349   :  { %5006 = vmatpush.bf16.msra.mxu2 %v7408_v48  ;;  %v8149_v48 = vld [vmem:[#allocation6 + $0x1a4] sm:$0xf] }
 0x34a   :  { %4963 = vmatpush.bf16.msrb.mxu3 %v7500_v30  ;;  %v7480_v38 = vor.u32 %v8149_v48, %v7477_v12 }
 0x34d   :  { %5007 = vmatpush.bf16.msra.mxu2 %v7400_v45  ;;  %v7469_v45 = vld [vmem:[#allocation6 + $0x198] sm:$0xf0] }
 0x34e   :  { %4964 = vmatpush.bf16.msrb.mxu3 %v7492_v29  ;;  %v7472_v11 = vor.u32 %v8147_v61, %v7469_v45  ;;  %v4598_v29 = vperm.slane %v218_v28, 0 }
 0x350   :  { %5008 = vmatmul.bf16.vlgmr.msra.gmra.mxu2 %v8682_v19  ;;  %v8150_v19 = vld [vmem:[#allocation6 + $0x1a4] sm:$0xf0] }
 0x351   :  { %v7476_v31 = vor.u32 %v8150_v19, %v7475_v0 }
 0x352   :  { %4965 = vmatpush.bf16.msrb.mxu3 %v7484_v58 }
 0x355   :  { %v4404_v26 = vpop.f32.mrf.mxu2  ;;  %v4417_v6 = vpop.f32.mrf.mxu3 }
 0x356   :  { %4966 = vmatpush.bf16.msrb.mxu3 %v7476_v31  ;;  %v4405_v8 = vadd.f32 %v4404_v26, %v8688_v10 }
 0x358   :  { %v4418_v9 = vadd.f32 %v4417_v6, %v4405_v8  ;;  %v8173_v8 = vld [vmem:[#allocation7 + $0x60] sm:$0xff] }
 0x35a   :  { %4967 = vmatpush.bf16.msrb.mxu3 %v7468_v46  ;;  %v4599_v46 = vperm.slane %v218_v28, 1 }
 0x35c   :  { %v4430_v35 = vpop.f32.mrf.mxu0  ;;  %v4443_v15 = vpop.f32.mrf.mxu1 }
 0x35d   :  { %v4406_v59 = vpop.f32.mrf.mxu2  ;;  %v4419_v63 = vpop.f32.mrf.mxu3  ;;  %v4431_v55 = vadd.f32 %v4430_v35, %v4418_v9 }
 0x35e   :  { %4968 = vmatpush.bf16.msrb.mxu3 %v7460_v56 }
 0x35f   :  { %v4444_v10 = vadd.f32 %v4443_v15, %v4431_v55 }
 0x362   :  { %5013 = vmatpush.bf16.msra.mxu3 %v7520_v7  ;;  %v8175_v7 = vld [vmem:[#allocation7 + $0x70] sm:$0xff] }
 0x363   :  { %5175 = vmatpush.bf16.msrb.mxu1 %v8175_v7 }
 0x364   :  { %v4432_v33 = vpop.f32.mrf.mxu0  ;;  %v4445_v62 = vpop.f32.mrf.mxu1 }
 0x365   :  { %v8168_v33 = vld [vmem:[#allocation7 + $0x38] sm:$0xff] }
 0x366   :  { %5014 = vmatpush.bf16.msra.mxu3 %v7512_v50  ;;  %5161 = vmatpush.bf16.msrb.mxu0 %v8168_v33 }
 0x367   :  { %5176 = vmatpush.bf16.msrb.mxu1 %v8174_v3 }
 0x36a   :  { %5015 = vmatpush.bf16.msra.mxu3 %v7504_v43  ;;  %5162 = vmatpush.bf16.msrb.mxu0 %v8167_v22  ;;  %v8164_v43 = vld [vmem:[#allocation7 + $0x18] sm:$0xff] }
 0x36b   :  { %5177 = vmatpush.bf16.msrb.mxu1 %v8173_v8 }
 0x36e   :  { %5016 = vmatpush.bf16.msra.mxu3 %v7496_v5  ;;  %5163 = vmatpush.bf16.msrb.mxu0 %v8166_v60  ;;  %v8162_v5 = vld [vmem:[#allocation7 + $0x8] sm:$0xff] }
 0x372   :  { %5017 = vmatpush.bf16.msra.mxu3 %v7488_v27  ;;  %5164 = vmatpush.bf16.msrb.mxu0 %v8165_v42  ;;  %v8170_v27 = vld [vmem:[#allocation7 + $0x48] sm:$0xff] }
 0x375   :  { %v4456_v44 = vpop.f32.mrf.mxu2  ;;  %v4469_v47 = vpop.f32.mrf.mxu3 }
 0x376   :  { %5018 = vmatpush.bf16.msra.mxu3 %v7480_v38  ;;  %v4457_v18 = vadd.f32 %v4456_v44, %v4444_v10  ;;  %5165 = vmatpush.bf16.msrb.mxu0 %v8164_v43  ;;  %v8163_v44 = vld [vmem:[#allocation7 + $0x10] sm:$0xff] }
 0x378   :  { %v4470_v21 = vadd.f32 %v4469_v47, %v4457_v18 }
 0x37a   :  { %5019 = vmatpush.bf16.msra.mxu3 %v7472_v11  ;;  %5166 = vmatpush.bf16.msrb.mxu0 %v8163_v44 }
 0x37c   :  { %v4482_v13 = vpop.f32.mrf.mxu0  ;;  %v4495_v4 = vpop.f32.mrf.mxu1 }
 0x37d   :  { %v4458_v14 = vpop.f32.mrf.mxu2  ;;  %v4471_v37 = vpop.f32.mrf.mxu3  ;;  %v4483_v25 = vadd.f32 %v4482_v13, %v4470_v21  ;;  %v8172_v13 = vld [vmem:[#allocation7 + $0x58] sm:$0xff] }
 0x37e   :  { %5020 = vmatpush.bf16.msra.mxu3 %v7464_v17  ;;  %5167 = vmatpush.bf16.msrb.mxu0 %v8162_v5  ;;  %v8169_v14 = vld [vmem:[#allocation7 + $0x40] sm:$0xff] }
 0x37f   :  { %v4496_v24 = vadd.f32 %v4495_v4, %v4483_v25  ;;  %5178 = vmatpush.bf16.msrb.mxu1 %v8172_v13  ;;  %v8171_v4 = vld [vmem:[#allocation7 + $0x50] sm:$0xff] }
 0x382   :  { %5168 = vmatpush.bf16.msrb.mxu0 %v8161_v51 }
 0x383   :  { %5179 = vmatpush.bf16.msrb.mxu1 %v8171_v4 }
 0x384   :  { %v4484_v57 = vpop.f32.mrf.mxu0  ;;  %v4497_v32 = vpop.f32.mrf.mxu1 }
 0x385   :  { %v8190_v32 = vld [vmem:[#allocation9 + $0x16] ss:$0 sm:$0xff] }
 0x387   :  { %5180 = vmatpush.bf16.msrb.mxu1 %v8170_v27 }
 0x38b   :  { %5181 = vmatpush.bf16.msrb.mxu1 %v8169_v14 }
 0x394   :  { %v4521_v30 = vpop.f32.mrf.mxu3 }
 0x395   :  { %v4508_v26 = vpop.f32.mrf.mxu2 }
 0x396   :  { %v4509_v6 = vadd.f32 %v4508_v26, %v4496_v24 }
 0x398   :  { %v4522_v54 = vadd.f32 %v4521_v30, %v4509_v6 }
 0x39a   :  { %v4528_v35 = vmax.f32 %v4522_v54, 0.0 }
 0x39c   :  { %v4532_v52 = vpack.c.bf16 %v4528_v35, %v4528_v35  ;;  %v4931_v23 = vpop.f32.mrf.mxu0  ;;  %v4944_v59 = vpop.f32.mrf.mxu1 }
 0x39d   :  { %v4932_v63 = vadd.f32 %v4931_v23, %v4598_v29  ;;  %v4510_v58 = vpop.f32.mrf.mxu2  ;;  %v4523_v15 = vpop.f32.mrf.mxu3 }
 0x39e   :  { %4969 = vmatmul.bf16.vlgmr.msrb.gmra.mxu3 %v4532_v52 }
 0x39f   :  { %v4945_v0 = vadd.f32 %v4944_v59, %v4932_v63 }
 0x3a4   :  { %v4933_v19 = vpop.f32.mrf.mxu0  ;;  %v4946_v31 = vpop.f32.mrf.mxu1 }
 0x3ae   :  { %5021 = vmatmul.bf16.vlgmr.msra.gmra.mxu3 %v4532_v52 }
 0x3b5   :  { %v4957_v16 = vpop.f32.mrf.mxu2 }
 0x3b6   :  { %v4958_v2 = vadd.f32 %v4957_v16, %v4945_v0 }
 0x3bc   :  { %v4983_v62 = vpop.f32.mrf.mxu0  ;;  %v4996_v39 = vpop.f32.mrf.mxu1 }
 0x3bd   :  { %v4984_v36 = vadd.f32 %v4983_v62, %v4599_v46  ;;  %v4959_v56 = vpop.f32.mrf.mxu2 }
 0x3bf   :  { %v4997_v1 = vadd.f32 %v4996_v39, %v4984_v36 }
 0x3c4   :  { %v4985_v50 = vpop.f32.mrf.mxu0  ;;  %v4998_v41 = vpop.f32.mrf.mxu1 }
 0x3d3   :  { %v5009_v47 = vpop.f32.mrf.mxu2 }
 0x3d4   :  { %v5010_v49 = vadd.f32 %v5009_v47, %v4997_v1 }
 0x3db   :  { %v5011_v40 = vpop.f32.mrf.mxu2 }
 0x421   :  { %v4970_v37 = vpop.f32.mrf.mxu3 }
 0x422   :  { %v4971_v48 = vadd.f32 %v4970_v37, %v4958_v2 }
 0x424   :  { %v5026_v12 = vmax.f32 %v4971_v48, 0.0  ;;  %5187 = vst [vmem:[%s8708_s7] sm:$0xff] %v4971_v48 }
 0x426   :  { %v5028_v38 = vpack.c.bf16 %v5026_v12, %v5026_v12 }
 0x428   :  { %5169 = vmatmul.bf16.vlgmr.msrb.gmra.mxu0 %v5028_v38 }
 0x429   :  { %v4972_v9 = vpop.f32.mrf.mxu3 }
 0x431   :  { %v5022_v55 = vpop.f32.mrf.mxu3 }
 0x432   :  { %v5023_v61 = vadd.f32 %v5022_v55, %v5010_v49 }
 0x434   :  { %v5027_v45 = vmax.f32 %v5023_v61, 0.0  ;;  %5188 = vst [vmem:[%s8708_s7 + $0x8] sm:$0xff] %v5023_v61 }
 0x436   :  { %v5029_v11 = vpack.c.bf16 %v5027_v45, %v5027_v45 }
 0x438   :  { %5182 = vmatmul.bf16.vlgmr.msrb.gmra.mxu1 %v5029_v11 }
 0x439   :  { %v5024_v53 = vpop.f32.mrf.mxu3 }
 0x4a5   :  { %v5170_v20 = vpop.f32.mrf.mxu0 }
 0x4a6   :  { %v5171_v10 = vadd.f32 %v8190_v32, %v5170_v20 }
 0x4ad   :  { %v5172_v57 = vpop.f32.mrf.mxu0 }
 0x4b5   :  { %v5183_v17 = vpop.f32.mrf.mxu1 }
 0x4b6   :  { %v5184_v18 = vadd.f32 %v5183_v17, %v5171_v10 }
 0x4b8   :  { %5189 = vst [vmem:[%s8707_s6] sm:$0xff] %v5184_v18 }
 0x4bd   :  { %v5185_v21 = vpop.f32.mrf.mxu1 }
 0x4be   :  { %5198 = vsyncpa [#allocation3], 1 }
 0x4bf   :  { %5199 = vsyncpa [#allocation5], 1 }
 0x4c0   :  { %5200 = vsyncpa [#allocation8], 1 }

</bundles_post_ra>
